<compile_context>
chip_gen: v6e
topology: v6e:2x2x1
jax: 0.10.0
libtpu: 0.0.40
codegen_flags: <defaults>
</compile_context>

<pallas_src>
import math
import functools

import jax
import jax.numpy as jnp
from jax.experimental import pallas as pl
from jax.experimental.pallas import tpu as pltpu


_INV_SQRT2 = 1.0 / math.sqrt(2.0)


# ------------------------------- helpers -------------------------------

def _row_tile(m, target=256):
    """Largest row tile <= target that exactly divides m (multiple of 8 when possible)."""
    if m <= target:
        return m
    t = target - (target % 8)
    while t >= 8:
        if m % t == 0:
            return t
        t -= 8
    return m


def _ce(flops, bytes_accessed, transcendentals=0):
    return pl.CostEstimate(flops=int(flops), transcendentals=int(transcendentals),
                           bytes_accessed=int(bytes_accessed))


_PARALLEL = pltpu.CompilerParams(dimension_semantics=("parallel",))


# ----------------------------- Pallas kernels -----------------------------

def _inproj_kernel(x_ref, w_in_ref, b_in_ref, w_q_ref, b_q_ref, w_c_ref, b_c_ref,
                   q_ref, c_ref):
    # context = x @ Wc + bc ;  q = (x @ Win + bin) @ Wq + bq   (x read once)
    x = x_ref[...]
    c_ref[...] = (jnp.dot(x, w_c_ref[...], preferred_element_type=jnp.float32)
                  + b_c_ref[...]).astype(c_ref.dtype)
    h = jnp.dot(x, w_in_ref[...], preferred_element_type=jnp.float32) + b_in_ref[...]
    q_ref[...] = (jnp.dot(h.astype(x.dtype), w_q_ref[...],
                          preferred_element_type=jnp.float32)
                  + b_q_ref[...]).astype(q_ref.dtype)


def inproj_pallas(x2d, w_in, b_in, w_q, b_q, w_c, b_c):
    M, E = x2d.shape
    Q = w_in.shape[1]
    tm = _row_tile(M)
    flops = 2 * M * E * Q * 2 + 2 * M * Q * Q
    byts = 4 * (M * E + 2 * E * Q + Q * Q + 3 * Q + 2 * M * Q)
    return pl.pallas_call(
        _inproj_kernel,
        out_shape=(jax.ShapeDtypeStruct((M, Q), x2d.dtype),
                   jax.ShapeDtypeStruct((M, Q), x2d.dtype)),
        grid=(M // tm,),
        in_specs=[pl.BlockSpec((tm, E), lambda i: (i, 0)),
                  pl.BlockSpec((E, Q), lambda i: (0, 0)),
                  pl.BlockSpec((1, Q), lambda i: (0, 0)),
                  pl.BlockSpec((Q, Q), lambda i: (0, 0)),
                  pl.BlockSpec((1, Q), lambda i: (0, 0)),
                  pl.BlockSpec((E, Q), lambda i: (0, 0)),
                  pl.BlockSpec((1, Q), lambda i: (0, 0))],
        out_specs=(pl.BlockSpec((tm, Q), lambda i: (i, 0)),
                   pl.BlockSpec((tm, Q), lambda i: (i, 0))),
        compiler_params=_PARALLEL,
        cost_estimate=_ce(flops, byts),
    )(x2d, w_in, b_in.reshape(1, Q), w_q, b_q.reshape(1, Q), w_c, b_c.reshape(1, Q))


def _chain2_kernel(x_ref, w1_ref, b1_ref, w2_ref, b2_ref, o_ref):
    # o = (x @ W1 + b1) @ W2 + b2   (chained projections, one HBM read of x)
    x = x_ref[...]
    h = jnp.dot(x, w1_ref[...], preferred_element_type=jnp.float32) + b1_ref[...]
    o_ref[...] = (jnp.dot(h.astype(x.dtype), w2_ref[...],
                          preferred_element_type=jnp.float32)
                  + b2_ref[...]).astype(o_ref.dtype)


def chain2_pallas(x2d, w1, b1, w2, b2):
    M, E = x2d.shape
    Q = w1.shape[1]
    N = w2.shape[1]
    tm = _row_tile(M)
    flops = 2 * M * E * Q + 2 * M * Q * N
    byts = 4 * (M * E + E * Q + Q * N + Q + N + M * N)
    return pl.pallas_call(
        _chain2_kernel,
        out_shape=jax.ShapeDtypeStruct((M, N), x2d.dtype),
        grid=(M // tm,),
        in_specs=[pl.BlockSpec((tm, E), lambda i: (i, 0)),
                  pl.BlockSpec((E, Q), lambda i: (0, 0)),
                  pl.BlockSpec((1, Q), lambda i: (0, 0)),
                  pl.BlockSpec((Q, N), lambda i: (0, 0)),
                  pl.BlockSpec((1, N), lambda i: (0, 0))],
        out_specs=pl.BlockSpec((tm, N), lambda i: (i, 0)),
        compiler_params=_PARALLEL,
        cost_estimate=_ce(flops, byts),
    )(x2d, w1, b1.reshape(1, Q), w2, b2.reshape(1, N))


def _linear2_kernel(x_ref, w1_ref, b1_ref, w2_ref, b2_ref, o1_ref, o2_ref):
    # Two independent projections that share the same input (k/v style).
    x = x_ref[...]
    o1_ref[...] = (jnp.dot(x, w1_ref[...], preferred_element_type=jnp.float32)
                   + b1_ref[...]).astype(o1_ref.dtype)
    o2_ref[...] = (jnp.dot(x, w2_ref[...], preferred_element_type=jnp.float32)
                   + b2_ref[...]).astype(o2_ref.dtype)


def linear2_pallas(x2d, w1, b1, w2, b2):
    M, K = x2d.shape
    N = w1.shape[1]
    tm = _row_tile(M)
    flops = 2 * M * K * N * 2
    byts = 4 * (M * K + 2 * K * N + 2 * N + 2 * M * N)
    return pl.pallas_call(
        _linear2_kernel,
        out_shape=(jax.ShapeDtypeStruct((M, N), x2d.dtype),
                   jax.ShapeDtypeStruct((M, N), x2d.dtype)),
        grid=(M // tm,),
        in_specs=[pl.BlockSpec((tm, K), lambda i: (i, 0)),
                  pl.BlockSpec((K, N), lambda i: (0, 0)),
                  pl.BlockSpec((1, N), lambda i: (0, 0)),
                  pl.BlockSpec((K, N), lambda i: (0, 0)),
                  pl.BlockSpec((1, N), lambda i: (0, 0))],
        out_specs=(pl.BlockSpec((tm, N), lambda i: (i, 0)),
                   pl.BlockSpec((tm, N), lambda i: (i, 0))),
        compiler_params=_PARALLEL,
        cost_estimate=_ce(flops, byts),
    )(x2d, w1, b1.reshape(1, N), w2, b2.reshape(1, N))


def _mha_kernel(scale, nheads, q_ref, k_ref, v_ref, o_ref):
    # One batch element, ALL heads folded into the lane dim of the block.
    # q: (Lq, Q), k/v: (Lk, Q) with Q = nheads * head_dim.
    Q = q_ref.shape[2]
    d = Q // nheads
    q = q_ref[0].astype(jnp.float32) * scale
    k = k_ref[0].astype(jnp.float32)
    v = v_ref[0].astype(jnp.float32)
    outs = []
    for h in range(nheads):                      # static unroll inside ONE kernel launch
        sl = slice(h * d, (h + 1) * d)
        s = jax.lax.dot_general(q[:, sl], k[:, sl], (((1,), (1,)), ((), ())),
                                preferred_element_type=jnp.float32)   # (Lq, Lk)
        e = jnp.exp(s - jnp.max(s, axis=-1, keepdims=True))
        o = jnp.dot(e, v[:, sl], preferred_element_type=jnp.float32)  # (Lq, d)
        # deferred (exact) softmax normalization: divide the small (Lq, d) result
        outs.append(o * (1.0 / jnp.sum(e, axis=-1, keepdims=True)))
    o_ref[0] = jnp.concatenate(outs, axis=-1).astype(o_ref.dtype)     # lane-dense store


def mha_pallas(q, k, v, nheads, scale):
    B, Lq, Q = q.shape
    Lk = k.shape[1]
    flops = B * (2 * Lq * Lk * Q * 2)
    byts = 4 * B * (Lq * Q + 2 * Lk * Q + Lq * Q)
    return pl.pallas_call(
        functools.partial(_mha_kernel, scale, nheads),
        out_shape=jax.ShapeDtypeStruct((B, Lq, Q), q.dtype),
        grid=(B,),
        in_specs=[pl.BlockSpec((1, Lq, Q), lambda b: (b, 0, 0)),
                  pl.BlockSpec((1, Lk, Q), lambda b: (b, 0, 0)),
                  pl.BlockSpec((1, Lk, Q), lambda b: (b, 0, 0))],
        out_specs=pl.BlockSpec((1, Lq, Q), lambda b: (b, 0, 0)),
        compiler_params=_PARALLEL,
        cost_estimate=_ce(flops, byts, transcendentals=B * nheads * Lq * Lk),
    )(q, k, v)


def _proj_add_ln_kernel(a_ref, w_ref, b_ref, r_ref, g_ref, bb_ref, o_ref):
    # out = LayerNorm(residual + a @ W + b)
    y = jnp.dot(a_ref[...], w_ref[...], preferred_element_type=jnp.float32) + b_ref[...]
    x = r_ref[...].astype(jnp.float32) + y
    mu = jnp.mean(x, axis=-1, keepdims=True)
    var = jnp.mean(jnp.square(x - mu), axis=-1, keepdims=True)
    xn = (x - mu) * jax.lax.rsqrt(var + 1e-5)
    o_ref[...] = (xn * g_ref[...] + bb_ref[...]).astype(o_ref.dtype)


def proj_add_ln_pallas(a2d, w, b, resid2d, gamma, beta):
    M, K = a2d.shape
    E = w.shape[1]
    tm = _row_tile(M)
    flops = 2 * M * K * E + 8 * M * E
    byts = 4 * (M * K + K * E + E + M * E + 2 * E + M * E)
    return pl.pallas_call(
        _proj_add_ln_kernel,
        out_shape=jax.ShapeDtypeStruct((M, E), resid2d.dtype),
        grid=(M // tm,),
        in_specs=[pl.BlockSpec((tm, K), lambda i: (i, 0)),
                  pl.BlockSpec((K, E), lambda i: (0, 0)),
                  pl.BlockSpec((1, E), lambda i: (0, 0)),
                  pl.BlockSpec((tm, E), lambda i: (i, 0)),
                  pl.BlockSpec((1, E), lambda i: (0, 0)),
                  pl.BlockSpec((1, E), lambda i: (0, 0))],
        out_specs=pl.BlockSpec((tm, E), lambda i: (i, 0)),
        compiler_params=_PARALLEL,
        cost_estimate=_ce(flops, byts),
    )(a2d, w, b.reshape(1, E), resid2d, gamma.reshape(1, E), beta.reshape(1, E))


def _mlp_add_ln_kernel(x_ref, w1_ref, b1_ref, w2_ref, b2_ref, g_ref, bb_ref, o_ref):
    # out = LayerNorm(x + dense2(gelu(dense1(x))))
    x = x_ref[...]
    h = jnp.dot(x, w1_ref[...], preferred_element_type=jnp.float32) + b1_ref[...]
    h = 0.5 * h * (1.0 + jax.lax.erf(h * _INV_SQRT2))       # exact GELU (torch default)
    ff = jnp.dot(h.astype(x.dtype), w2_ref[...],
                 preferred_element_type=jnp.float32) + b2_ref[...]
    xr = x.astype(jnp.float32) + ff
    mu = jnp.mean(xr, axis=-1, keepdims=True)
    var = jnp.mean(jnp.square(xr - mu), axis=-1, keepdims=True)
    xn = (xr - mu) * jax.lax.rsqrt(var + 1e-5)
    o_ref[...] = (xn * g_ref[...] + bb_ref[...]).astype(o_ref.dtype)


def mlp_add_ln_pallas(x2d, w1, b1, w2, b2, gamma, beta):
    # TODO(synk): for very large mlp_dim, split the hidden dim as an "arbitrary" grid
    # reduction axis with a VMEM accumulator instead of holding the full (tm, H) tile.
    M, E = x2d.shape
    H = w1.shape[1]
    tm = _row_tile(M)
    flops = 2 * M * E * H * 2 + 8 * M * E
    byts = 4 * (M * E + E * H + H * E + H + 3 * E + M * E)
    return pl.pallas_call(
        _mlp_add_ln_kernel,
        out_shape=jax.ShapeDtypeStruct((M, E), x2d.dtype),
        grid=(M // tm,),
        in_specs=[pl.BlockSpec((tm, E), lambda i: (i, 0)),
                  pl.BlockSpec((E, H), lambda i: (0, 0)),
                  pl.BlockSpec((1, H), lambda i: (0, 0)),
                  pl.BlockSpec((H, E), lambda i: (0, 0)),
                  pl.BlockSpec((1, E), lambda i: (0, 0)),
                  pl.BlockSpec((1, E), lambda i: (0, 0)),
                  pl.BlockSpec((1, E), lambda i: (0, 0))],
        out_specs=pl.BlockSpec((tm, E), lambda i: (i, 0)),
        compiler_params=_PARALLEL,
        cost_estimate=_ce(flops, byts, transcendentals=M * H),
    )(x2d, w1, b1.reshape(1, H), w2, b2.reshape(1, E),
      gamma.reshape(1, E), beta.reshape(1, E))


# --------------------------- parameters (deterministic) ---------------------------

def init_params(key, emb_dim, qkv_dim, mlp_dim):
    # weights stored as (in, out) == torch Linear.weight.T ; shapes match module __init__
    lins = [("in_proj", emb_dim, qkv_dim), ("in_proj_p", emb_dim, qkv_dim),
            ("in_proj_c", emb_dim, qkv_dim),
            ("q_proj", qkv_dim, qkv_dim), ("pq_proj", qkv_dim, qkv_dim),
            ("k_proj", qkv_dim, qkv_dim), ("pk_proj", qkv_dim, qkv_dim),
            ("v_proj", qkv_dim, qkv_dim), ("pv_proj", qkv_dim, qkv_dim),
            ("out_proj", qkv_dim, emb_dim), ("out_proj_p", qkv_dim, emb_dim),
            ("dense1", emb_dim, mlp_dim), ("dense2", mlp_dim, emb_dim)]
    params = {}
    for name, din, dout in lins:
        key, kw, kb = jax.random.split(key, 3)
        s = 1.0 / math.sqrt(din)
        params[name + "_w"] = jax.random.uniform(kw, (din, dout), jnp.float32, -s, s)
        params[name + "_b"] = jax.random.uniform(kb, (dout,), jnp.float32, -s, s)
    for name in ("ln_post", "ln_post_p", "ln_ff"):
        params[name + "_g"] = jnp.ones((emb_dim,), jnp.float32)
        params[name + "_b"] = jnp.zeros((emb_dim,), jnp.float32)
    return params


# ------------------------------- forward pass -------------------------------

def luna_transformer_block(params, x, packed, num_heads, num_pheads):
    """x: (B, S, E), packed: (B, P, E)  ->  (x_out (B,S,E), p_out (B,P,E))"""
    B, S, E = x.shape
    P = packed.shape[1]
    Q = params["q_proj_w"].shape[0]           # qkv_dim

    x_flat = x.reshape(B * S, E)              # contiguous (free) reshapes only — no transposes
    p_flat = packed.reshape(B * P, E)

    # fused input projections: context = in_proj_c(x); q = q_proj(in_proj(x))
    q, context = inproj_pallas(
        x_flat,
        params["in_proj_w"], params["in_proj_b"],
        params["q_proj_w"], params["q_proj_b"],
        params["in_proj_c_w"], params["in_proj_c_b"])

    # fused chain: pq = pq_proj(in_proj_p(packed))
    pq = chain2_pallas(p_flat,
                       params["in_proj_p_w"], params["in_proj_p_b"],
                       params["pq_proj_w"], params["pq_proj_b"])

    # fused pk / pv projections of the shared context
    pk, pv = linear2_pallas(context,
                            params["pk_proj_w"], params["pk_proj_b"],
                            params["pv_proj_w"], params["pv_proj_b"])

    # packed-context attention: pquery attends over context (all pheads per grid step)
    phd = Q // num_pheads
    p_context = mha_pallas(pq.reshape(B, P, Q), pk.reshape(B, S, Q), pv.reshape(B, S, Q),
                           num_pheads, phd ** -0.5)                   # (B, P, Q)
    pc_flat = p_context.reshape(B * P, Q)

    # fused k / v projections of the shared p_context
    k, v = linear2_pallas(pc_flat,
                          params["k_proj_w"], params["k_proj_b"],
                          params["v_proj_w"], params["v_proj_b"])

    # main attention: query attends over p_context (all heads per grid step)
    hd = Q // num_heads
    attn = mha_pallas(q.reshape(B, S, Q), k.reshape(B, P, Q), v.reshape(B, P, Q),
                      num_heads, hd ** -0.5)                          # (B, S, Q)

    # TODO(synk): dropout / dropout_p / dropout_attn / dropout_pcontext are identity (eval mode).
    # fused out-projection + residual add + post-LayerNorm
    x1 = proj_add_ln_pallas(attn.reshape(B * S, Q),
                            params["out_proj_w"], params["out_proj_b"],
                            x_flat, params["ln_post_g"], params["ln_post_b"])
    p1 = proj_add_ln_pallas(pc_flat,
                            params["out_proj_p_w"], params["out_proj_p_b"],
                            p_flat, params["ln_post_p_g"], params["ln_post_p_b"])

    # fused MLP block + residual add + final LayerNorm
    x2 = mlp_add_ln_pallas(x1,
                           params["dense1_w"], params["dense1_b"],
                           params["dense2_w"], params["dense2_b"],
                           params["ln_ff_g"], params["ln_ff_b"])

    return x2.reshape(B, S, E), p1.reshape(B, P, E)


# --------------------------- pure-JAX reference ---------------------------

def reference(params, x, packed, num_heads, num_pheads):
    # Faithful seq-major re-implementation of the PyTorch module (eval mode).
    def lin(t, name):
        return t @ params[name + "_w"] + params[name + "_b"]

    def ln(t, g, b):
        mu = t.mean(-1, keepdims=True)
        var = jnp.square(t - mu).mean(-1, keepdims=True)
        return (t - mu) / jnp.sqrt(var + 1e-5) * g + b

    def sdpa(q, k, v, scale):
        s = jnp.einsum('bqd,bkd->bqk', q * scale, k)
        return jnp.einsum('bqk,bkd->bqd', jax.nn.softmax(s, axis=-1), v)

    B, S, E = x.shape
    P = packed.shape[1]
    q_in = jnp.transpose(x, (1, 0, 2))
    p_in = jnp.transpose(packed, (1, 0, 2))
    query, pquery, context = lin(q_in, "in_proj"), lin(p_in, "in_proj_p"), lin(q_in, "in_proj_c")
    Q = query.shape[-1]
    phd, hd = Q // num_pheads, Q // num_heads
    pk = lin(context, "pk_proj").reshape(S, B * num_pheads, phd).transpose(1, 0, 2)
    pv = lin(context, "pv_proj").reshape(S, B * num_pheads, phd).transpose(1, 0, 2)
    pq = lin(pquery, "pq_proj").reshape(P, B * num_pheads, phd).transpose(1, 0, 2)
    p_context = sdpa(pq, pk, pv, phd ** -0.5).transpose(1, 0, 2).reshape(P, B, Q)
    qh = lin(query, "q_proj").reshape(S, B * num_heads, hd).transpose(1, 0, 2)
    kh = lin(p_context, "k_proj").reshape(P, B * num_heads, hd).transpose(1, 0, 2)
    vh = lin(p_context, "v_proj").reshape(P, B * num_heads, hd).transpose(1, 0, 2)
    attn = sdpa(qh, kh, vh, hd ** -0.5).transpose(1, 0, 2).reshape(S, B, Q)
    attn = jnp.transpose(lin(attn, "out_proj"), (1, 0, 2))
    p_out = jnp.transpose(lin(p_context, "out_proj_p"), (1, 0, 2))
    x1 = ln(x + attn, params["ln_post_g"], params["ln_post_b"])
    p1 = ln(packed + p_out, params["ln_post_p_g"], params["ln_post_p_b"])
    h = x1 @ params["dense1_w"] + params["dense1_b"]
    h = 0.5 * h * (1.0 + jax.lax.erf(h * _INV_SQRT2))
    ff = h @ params["dense2_w"] + params["dense2_b"]
    x2 = ln(x1 + ff, params["ln_ff_g"], params["ln_ff_b"])
    return x2, p1


# ----------------------------------- main -----------------------------------

if __name__ == "__main__":
    B, S, P = 2, 8, 4            # batch, sequence length, packed (luna context) length
    EMB, QKV, MLP = 32, 32, 64
    NH, NPH = 8, 8               # num_heads, num_pheads (head_dim = phead_dim = 4)

    key = jax.random.PRNGKey(0)
    kx, kp, kparams = jax.random.split(key, 3)
    x = jax.random.normal(kx, (B, S, EMB), jnp.float32)
    packed = jax.random.normal(kp, (B, P, EMB), jnp.float32)
    params = init_params(kparams, EMB, QKV, MLP)

    fwd = jax.jit(functools.partial(luna_transformer_block,
                                    num_heads=NH, num_pheads=NPH))
    x_out, p_out = fwd(params, x, packed)
    jax.block_until_ready((x_out, p_out))

    x_ref, p_ref = reference(params, x, packed, NH, NPH)
    assert x_out.shape == (B, S, EMB) and p_out.shape == (B, P, EMB)
    assert jnp.allclose(x_out, x_ref, rtol=1e-4, atol=1e-4), \
        float(jnp.max(jnp.abs(x_out - x_ref)))
    assert jnp.allclose(p_out, p_ref, rtol=1e-4, atol=1e-4), \
        float(jnp.max(jnp.abs(p_out - p_ref)))

    print("KERNEL_OK")
</pallas_src>

<mosaic_0001>
module attributes {stable_mosaic.version = 11 : i64} {
  func.func @_linear2_kernel(%arg0: i32, %arg1: memref<16x32xf32, #tpu.memory_space<vmem>>, %arg2: memref<32x32xf32, #tpu.memory_space<vmem>>, %arg3: memref<1x32xf32, #tpu.memory_space<vmem>>, %arg4: memref<32x32xf32, #tpu.memory_space<vmem>>, %arg5: memref<1x32xf32, #tpu.memory_space<vmem>>, %arg6: memref<16x32xf32, #tpu.memory_space<vmem>>, %arg7: memref<16x32xf32, #tpu.memory_space<vmem>>) attributes {dimension_semantics = [#tpu.dimension_semantics<parallel>], iteration_bounds = array<i64: 1>, scalar_prefetch = 0 : i64, scratch_operands = 0 : i64, tpu.core_type = #tpu.core_type<tc>, window_params = [{transform_indices = @transform_0, window_bounds = array<i64: 16, 32>}, {pipeline_mode = #tpu.pipeline_mode<synchronous>, transform_indices = @transform_1, window_bounds = array<i64: 32, 32>}, {pipeline_mode = #tpu.pipeline_mode<synchronous>, transform_indices = @transform_2, window_bounds = array<i64: 1, 32>}, {pipeline_mode = #tpu.pipeline_mode<synchronous>, transform_indices = @transform_3, window_bounds = array<i64: 32, 32>}, {pipeline_mode = #tpu.pipeline_mode<synchronous>, transform_indices = @transform_4, window_bounds = array<i64: 1, 32>}, {transform_indices = @transform_5, window_bounds = array<i64: 16, 32>}, {transform_indices = @transform_6, window_bounds = array<i64: 16, 32>}]} {
    %c0 = arith.constant 0 : index
    %c0_0 = arith.constant 0 : index
    %0 = vector.load %arg1[%c0, %c0_0] : memref<16x32xf32, #tpu.memory_space<vmem>>, vector<16x32xf32>
    %c0_1 = arith.constant 0 : index
    %c0_2 = arith.constant 0 : index
    %1 = vector.load %arg2[%c0_1, %c0_2] : memref<32x32xf32, #tpu.memory_space<vmem>>, vector<32x32xf32>
    %cst = arith.constant dense<0.000000e+00> : vector<16x32xf32>
    %2 = tpu.matmul %0, %1, %cst {dimension_numbers = #tpu.dot_dimension_numbers<[1], [0], [0], [1], [0, 0, 1, 1], [], []>} : vector<16x32xf32>, vector<32x32xf32>, vector<16x32xf32> -> vector<16x32xf32>
    %c0_3 = arith.constant 0 : index
    %c0_4 = arith.constant 0 : index
    %3 = vector.load %arg3[%c0_3, %c0_4] : memref<1x32xf32, #tpu.memory_space<vmem>>, vector<1x32xf32>
    %4 = vector.broadcast %3 : vector<1x32xf32> to vector<16x32xf32>
    %5 = arith.addf %2, %4 : vector<16x32xf32>
    %c0_5 = arith.constant 0 : index
    %c0_6 = arith.constant 0 : index
    %6 = vector.load %arg6[%c0_5, %c0_6] : memref<16x32xf32, #tpu.memory_space<vmem>>, vector<16x32xf32>
    tpu.vector_store %arg6[%c0_5, %c0_6], %5 {strides = array<i32>} : memref<16x32xf32, #tpu.memory_space<vmem>>, vector<16x32xf32>,
    %c0_7 = arith.constant 0 : index
    %c0_8 = arith.constant 0 : index
    %7 = vector.load %arg4[%c0_7, %c0_8] : memref<32x32xf32, #tpu.memory_space<vmem>>, vector<32x32xf32>
    %cst_9 = arith.constant dense<0.000000e+00> : vector<16x32xf32>
    %8 = tpu.matmul %0, %7, %cst_9 {dimension_numbers = #tpu.dot_dimension_numbers<[1], [0], [0], [1], [0, 0, 1, 1], [], []>} : vector<16x32xf32>, vector<32x32xf32>, vector<16x32xf32> -> vector<16x32xf32>
    %c0_10 = arith.constant 0 : index
    %c0_11 = arith.constant 0 : index
    %9 = vector.load %arg5[%c0_10, %c0_11] : memref<1x32xf32, #tpu.memory_space<vmem>>, vector<1x32xf32>
    %10 = vector.broadcast %9 : vector<1x32xf32> to vector<16x32xf32>
    %11 = arith.addf %8, %10 : vector<16x32xf32>
    %c0_12 = arith.constant 0 : index
    %c0_13 = arith.constant 0 : index
    %12 = vector.load %arg7[%c0_12, %c0_13] : memref<16x32xf32, #tpu.memory_space<vmem>>, vector<16x32xf32>
    tpu.vector_store %arg7[%c0_12, %c0_13], %11 {strides = array<i32>} : memref<16x32xf32, #tpu.memory_space<vmem>>, vector<16x32xf32>,
    return
  }
  func.func @transform_0(%arg0: i32) -> (i32, i32) {
    %c0_i32 = arith.constant 0 : i32
    %c0_i32_0 = arith.constant 0 : i32
    return %arg0, %c0_i32 : i32, i32
  }
  func.func @transform_1(%arg0: i32) -> (i32, i32) {
    %c0_i32 = arith.constant 0 : i32
    %c0_i32_0 = arith.constant 0 : i32
    %c0_i32_1 = arith.constant 0 : i32
    return %c0_i32, %c0_i32_0 : i32, i32
  }
  func.func @transform_2(%arg0: i32) -> (i32, i32) {
    %c0_i32 = arith.constant 0 : i32
    %c0_i32_0 = arith.constant 0 : i32
    %c0_i32_1 = arith.constant 0 : i32
    return %c0_i32, %c0_i32_0 : i32, i32
  }
  func.func @transform_3(%arg0: i32) -> (i32, i32) {
    %c0_i32 = arith.constant 0 : i32
    %c0_i32_0 = arith.constant 0 : i32
    %c0_i32_1 = arith.constant 0 : i32
    return %c0_i32, %c0_i32_0 : i32, i32
  }
  func.func @transform_4(%arg0: i32) -> (i32, i32) {
    %c0_i32 = arith.constant 0 : i32
    %c0_i32_0 = arith.constant 0 : i32
    %c0_i32_1 = arith.constant 0 : i32
    return %c0_i32, %c0_i32_0 : i32, i32
  }
  func.func @transform_5(%arg0: i32) -> (i32, i32) {
    %c0_i32 = arith.constant 0 : i32
    %c0_i32_0 = arith.constant 0 : i32
    return %arg0, %c0_i32 : i32, i32
  }
  func.func @transform_6(%arg0: i32) -> (i32, i32) {
    %c0_i32 = arith.constant 0 : i32
    %c0_i32_0 = arith.constant 0 : i32
    return %arg0, %c0_i32 : i32, i32
  }
}

module attributes {stable_mosaic.version = 11 : i64} {
  func.func @_chain2_kernel(%arg0: i32, %arg1: memref<8x32xf32, #tpu.memory_space<vmem>>, %arg2: memref<32x32xf32, #tpu.memory_space<vmem>>, %arg3: memref<1x32xf32, #tpu.memory_space<vmem>>, %arg4: memref<32x32xf32, #tpu.memory_space<vmem>>, %arg5: memref<1x32xf32, #tpu.memory_space<vmem>>, %arg6: memref<8x32xf32, #tpu.memory_space<vmem>>) attributes {dimension_semantics = [#tpu.dimension_semantics<parallel>], iteration_bounds = array<i64: 1>, scalar_prefetch = 0 : i64, scratch_operands = 0 : i64, tpu.core_type = #tpu.core_type<tc>, window_params = [{transform_indices = @transform_0, window_bounds = array<i64: 8, 32>}, {pipeline_mode = #tpu.pipeline_mode<synchronous>, transform_indices = @transform_1, window_bounds = array<i64: 32, 32>}, {pipeline_mode = #tpu.pipeline_mode<synchronous>, transform_indices = @transform_2, window_bounds = array<i64: 1, 32>}, {pipeline_mode = #tpu.pipeline_mode<synchronous>, transform_indices = @transform_3, window_bounds = array<i64: 32, 32>}, {pipeline_mode = #tpu.pipeline_mode<synchronous>, transform_indices = @transform_4, window_bounds = array<i64: 1, 32>}, {transform_indices = @transform_5, window_bounds = array<i64: 8, 32>}]} {
    %c0 = arith.constant 0 : index
    %c0_0 = arith.constant 0 : index
    %0 = vector.load %arg1[%c0, %c0_0] : memref<8x32xf32, #tpu.memory_space<vmem>>, vector<8x32xf32>
    %c0_1 = arith.constant 0 : index
    %c0_2 = arith.constant 0 : index
    %1 = vector.load %arg2[%c0_1, %c0_2] : memref<32x32xf32, #tpu.memory_space<vmem>>, vector<32x32xf32>
    %cst = arith.constant dense<0.000000e+00> : vector<8x32xf32>
    %2 = tpu.matmul %0, %1, %cst {dimension_numbers = #tpu.dot_dimension_numbers<[1], [0], [0], [1], [0, 0, 1, 1], [], []>} : vector<8x32xf32>, vector<32x32xf32>, vector<8x32xf32> -> vector<8x32xf32>
    %c0_3 = arith.constant 0 : index
    %c0_4 = arith.constant 0 : index
    %3 = vector.load %arg3[%c0_3, %c0_4] : memref<1x32xf32, #tpu.memory_space<vmem>>, vector<1x32xf32>
    %4 = vector.broadcast %3 : vector<1x32xf32> to vector<8x32xf32>
    %5 = arith.addf %2, %4 : vector<8x32xf32>
    %c0_5 = arith.constant 0 : index
    %c0_6 = arith.constant 0 : index
    %6 = vector.load %arg4[%c0_5, %c0_6] : memref<32x32xf32, #tpu.memory_space<vmem>>, vector<32x32xf32>
    %cst_7 = arith.constant dense<0.000000e+00> : vector<8x32xf32>
    %7 = tpu.matmul %5, %6, %cst_7 {dimension_numbers = #tpu.dot_dimension_numbers<[1], [0], [0], [1], [0, 0, 1, 1], [], []>} : vector<8x32xf32>, vector<32x32xf32>, vector<8x32xf32> -> vector<8x32xf32>
    %c0_8 = arith.constant 0 : index
    %c0_9 = arith.constant 0 : index
    %8 = vector.load %arg5[%c0_8, %c0_9] : memref<1x32xf32, #tpu.memory_space<vmem>>, vector<1x32xf32>
    %9 = vector.broadcast %8 : vector<1x32xf32> to vector<8x32xf32>
    %10 = arith.addf %7, %9 : vector<8x32xf32>
    %c0_10 = arith.constant 0 : index
    %c0_11 = arith.constant 0 : index
    %11 = vector.load %arg6[%c0_10, %c0_11] : memref<8x32xf32, #tpu.memory_space<vmem>>, vector<8x32xf32>
    tpu.vector_store %arg6[%c0_10, %c0_11], %10 {strides = array<i32>} : memref<8x32xf32, #tpu.memory_space<vmem>>, vector<8x32xf32>,
    return
  }
  func.func @transform_0(%arg0: i32) -> (i32, i32) {
    %c0_i32 = arith.constant 0 : i32
    %c0_i32_0 = arith.constant 0 : i32
    return %arg0, %c0_i32 : i32, i32
  }
  func.func @transform_1(%arg0: i32) -> (i32, i32) {
    %c0_i32 = arith.constant 0 : i32
    %c0_i32_0 = arith.constant 0 : i32
    %c0_i32_1 = arith.constant 0 : i32
    return %c0_i32, %c0_i32_0 : i32, i32
  }
  func.func @transform_2(%arg0: i32) -> (i32, i32) {
    %c0_i32 = arith.constant 0 : i32
    %c0_i32_0 = arith.constant 0 : i32
    %c0_i32_1 = arith.constant 0 : i32
    return %c0_i32, %c0_i32_0 : i32, i32
  }
  func.func @transform_3(%arg0: i32) -> (i32, i32) {
    %c0_i32 = arith.constant 0 : i32
    %c0_i32_0 = arith.constant 0 : i32
    %c0_i32_1 = arith.constant 0 : i32
    return %c0_i32, %c0_i32_0 : i32, i32
  }
  func.func @transform_4(%arg0: i32) -> (i32, i32) {
    %c0_i32 = arith.constant 0 : i32
    %c0_i32_0 = arith.constant 0 : i32
    %c0_i32_1 = arith.constant 0 : i32
    return %c0_i32, %c0_i32_0 : i32, i32
  }
  func.func @transform_5(%arg0: i32) -> (i32, i32) {
    %c0_i32 = arith.constant 0 : i32
    %c0_i32_0 = arith.constant 0 : i32
    return %arg0, %c0_i32 : i32, i32
  }
}

module attributes {stable_mosaic.version = 11 : i64} {
  func.func @_inproj_kernel(%arg0: i32, %arg1: memref<16x32xf32, #tpu.memory_space<vmem>>, %arg2: memref<32x32xf32, #tpu.memory_space<vmem>>, %arg3: memref<1x32xf32, #tpu.memory_space<vmem>>, %arg4: memref<32x32xf32, #tpu.memory_space<vmem>>, %arg5: memref<1x32xf32, #tpu.memory_space<vmem>>, %arg6: memref<32x32xf32, #tpu.memory_space<vmem>>, %arg7: memref<1x32xf32, #tpu.memory_space<vmem>>, %arg8: memref<16x32xf32, #tpu.memory_space<vmem>>, %arg9: memref<16x32xf32, #tpu.memory_space<vmem>>) attributes {dimension_semantics = [#tpu.dimension_semantics<parallel>], iteration_bounds = array<i64: 1>, scalar_prefetch = 0 : i64, scratch_operands = 0 : i64, tpu.core_type = #tpu.core_type<tc>, window_params = [{transform_indices = @transform_0, window_bounds = array<i64: 16, 32>}, {pipeline_mode = #tpu.pipeline_mode<synchronous>, transform_indices = @transform_1, window_bounds = array<i64: 32, 32>}, {pipeline_mode = #tpu.pipeline_mode<synchronous>, transform_indices = @transform_2, window_bounds = array<i64: 1, 32>}, {pipeline_mode = #tpu.pipeline_mode<synchronous>, transform_indices = @transform_3, window_bounds = array<i64: 32, 32>}, {pipeline_mode = #tpu.pipeline_mode<synchronous>, transform_indices = @transform_4, window_bounds = array<i64: 1, 32>}, {pipeline_mode = #tpu.pipeline_mode<synchronous>, transform_indices = @transform_5, window_bounds = array<i64: 32, 32>}, {pipeline_mode = #tpu.pipeline_mode<synchronous>, transform_indices = @transform_6, window_bounds = array<i64: 1, 32>}, {transform_indices = @transform_7, window_bounds = array<i64: 16, 32>}, {transform_indices = @transform_8, window_bounds = array<i64: 16, 32>}]} {
    %c0 = arith.constant 0 : index
    %c0_0 = arith.constant 0 : index
    %0 = vector.load %arg1[%c0, %c0_0] : memref<16x32xf32, #tpu.memory_space<vmem>>, vector<16x32xf32>
    %c0_1 = arith.constant 0 : index
    %c0_2 = arith.constant 0 : index
    %1 = vector.load %arg6[%c0_1, %c0_2] : memref<32x32xf32, #tpu.memory_space<vmem>>, vector<32x32xf32>
    %cst = arith.constant dense<0.000000e+00> : vector<16x32xf32>
    %2 = tpu.matmul %0, %1, %cst {dimension_numbers = #tpu.dot_dimension_numbers<[1], [0], [0], [1], [0, 0, 1, 1], [], []>} : vector<16x32xf32>, vector<32x32xf32>, vector<16x32xf32> -> vector<16x32xf32>
    %c0_3 = arith.constant 0 : index
    %c0_4 = arith.constant 0 : index
    %3 = vector.load %arg7[%c0_3, %c0_4] : memref<1x32xf32, #tpu.memory_space<vmem>>, vector<1x32xf32>
    %4 = vector.broadcast %3 : vector<1x32xf32> to vector<16x32xf32>
    %5 = arith.addf %2, %4 : vector<16x32xf32>
    %c0_5 = arith.constant 0 : index
    %c0_6 = arith.constant 0 : index
    %6 = vector.load %arg9[%c0_5, %c0_6] : memref<16x32xf32, #tpu.memory_space<vmem>>, vector<16x32xf32>
    tpu.vector_store %arg9[%c0_5, %c0_6], %5 {strides = array<i32>} : memref<16x32xf32, #tpu.memory_space<vmem>>, vector<16x32xf32>,
    %c0_7 = arith.constant 0 : index
    %c0_8 = arith.constant 0 : index
    %7 = vector.load %arg2[%c0_7, %c0_8] : memref<32x32xf32, #tpu.memory_space<vmem>>, vector<32x32xf32>
    %cst_9 = arith.constant dense<0.000000e+00> : vector<16x32xf32>
    %8 = tpu.matmul %0, %7, %cst_9 {dimension_numbers = #tpu.dot_dimension_numbers<[1], [0], [0], [1], [0, 0, 1, 1], [], []>} : vector<16x32xf32>, vector<32x32xf32>, vector<16x32xf32> -> vector<16x32xf32>
    %c0_10 = arith.constant 0 : index
    %c0_11 = arith.constant 0 : index
    %9 = vector.load %arg3[%c0_10, %c0_11] : memref<1x32xf32, #tpu.memory_space<vmem>>, vector<1x32xf32>
    %10 = vector.broadcast %9 : vector<1x32xf32> to vector<16x32xf32>
    %11 = arith.addf %8, %10 : vector<16x32xf32>
    %c0_12 = arith.constant 0 : index
    %c0_13 = arith.constant 0 : index
    %12 = vector.load %arg4[%c0_12, %c0_13] : memref<32x32xf32, #tpu.memory_space<vmem>>, vector<32x32xf32>
    %cst_14 = arith.constant dense<0.000000e+00> : vector<16x32xf32>
    %13 = tpu.matmul %11, %12, %cst_14 {dimension_numbers = #tpu.dot_dimension_numbers<[1], [0], [0], [1], [0, 0, 1, 1], [], []>} : vector<16x32xf32>, vector<32x32xf32>, vector<16x32xf32> -> vector<16x32xf32>
    %c0_15 = arith.constant 0 : index
    %c0_16 = arith.constant 0 : index
    %14 = vector.load %arg5[%c0_15, %c0_16] : memref<1x32xf32, #tpu.memory_space<vmem>>, vector<1x32xf32>
    %15 = vector.broadcast %14 : vector<1x32xf32> to vector<16x32xf32>
    %16 = arith.addf %13, %15 : vector<16x32xf32>
    %c0_17 = arith.constant 0 : index
    %c0_18 = arith.constant 0 : index
    %17 = vector.load %arg8[%c0_17, %c0_18] : memref<16x32xf32, #tpu.memory_space<vmem>>, vector<16x32xf32>
    tpu.vector_store %arg8[%c0_17, %c0_18], %16 {strides = array<i32>} : memref<16x32xf32, #tpu.memory_space<vmem>>, vector<16x32xf32>,
    return
  }
  func.func @transform_0(%arg0: i32) -> (i32, i32) {
    %c0_i32 = arith.constant 0 : i32
    %c0_i32_0 = arith.constant 0 : i32
    return %arg0, %c0_i32 : i32, i32
  }
  func.func @transform_1(%arg0: i32) -> (i32, i32) {
    %c0_i32 = arith.constant 0 : i32
    %c0_i32_0 = arith.constant 0 : i32
    %c0_i32_1 = arith.constant 0 : i32
    return %c0_i32, %c0_i32_0 : i32, i32
  }
  func.func @transform_2(%arg0: i32) -> (i32, i32) {
    %c0_i32 = arith.constant 0 : i32
    %c0_i32_0 = arith.constant 0 : i32
    %c0_i32_1 = arith.constant 0 : i32
    return %c0_i32, %c0_i32_0 : i32, i32
  }
  func.func @transform_3(%arg0: i32) -> (i32, i32) {
    %c0_i32 = arith.constant 0 : i32
    %c0_i32_0 = arith.constant 0 : i32
    %c0_i32_1 = arith.constant 0 : i32
    return %c0_i32, %c0_i32_0 : i32, i32
  }
  func.func @transform_4(%arg0: i32) -> (i32, i32) {
    %c0_i32 = arith.constant 0 : i32
    %c0_i32_0 = arith.constant 0 : i32
    %c0_i32_1 = arith.constant 0 : i32
    return %c0_i32, %c0_i32_0 : i32, i32
  }
  func.func @transform_5(%arg0: i32) -> (i32, i32) {
    %c0_i32 = arith.constant 0 : i32
    %c0_i32_0 = arith.constant 0 : i32
    %c0_i32_1 = arith.constant 0 : i32
    return %c0_i32, %c0_i32_0 : i32, i32
  }
  func.func @transform_6(%arg0: i32) -> (i32, i32) {
    %c0_i32 = arith.constant 0 : i32
    %c0_i32_0 = arith.constant 0 : i32
    %c0_i32_1 = arith.constant 0 : i32
    return %c0_i32, %c0_i32_0 : i32, i32
  }
  func.func @transform_7(%arg0: i32) -> (i32, i32) {
    %c0_i32 = arith.constant 0 : i32
    %c0_i32_0 = arith.constant 0 : i32
    return %arg0, %c0_i32 : i32, i32
  }
  func.func @transform_8(%arg0: i32) -> (i32, i32) {
    %c0_i32 = arith.constant 0 : i32
    %c0_i32_0 = arith.constant 0 : i32
    return %arg0, %c0_i32 : i32, i32
  }
}

module attributes {stable_mosaic.version = 11 : i64} {
  func.func @_mha_kernel(%arg0: i32, %arg1: memref<1x4x32xf32, #tpu.memory_space<vmem>>, %arg2: memref<1x8x32xf32, #tpu.memory_space<vmem>>, %arg3: memref<1x8x32xf32, #tpu.memory_space<vmem>>, %arg4: memref<1x4x32xf32, #tpu.memory_space<vmem>>) attributes {dimension_semantics = [#tpu.dimension_semantics<parallel>], iteration_bounds = array<i64: 2>, scalar_prefetch = 0 : i64, scratch_operands = 0 : i64, tpu.core_type = #tpu.core_type<tc>, window_params = [{transform_indices = @transform_0, window_bounds = array<i64: 1, 4, 32>}, {transform_indices = @transform_1, window_bounds = array<i64: 1, 8, 32>}, {transform_indices = @transform_2, window_bounds = array<i64: 1, 8, 32>}, {transform_indices = @transform_3, window_bounds = array<i64: 1, 4, 32>}]} {
    %c0 = arith.constant 0 : index
    %c0_0 = arith.constant 0 : index
    %c0_1 = arith.constant 0 : index
    %0 = vector.load %arg1[%c0, %c0_0, %c0_1] : memref<1x4x32xf32, #tpu.memory_space<vmem>>, vector<1x4x32xf32>
    %1 = vector.shape_cast %0 : vector<1x4x32xf32> to vector<4x32xf32>
    %cst = arith.constant 5.000000e-01 : f32
    %2 = vector.broadcast %cst : f32 to vector<4x32xf32>
    %3 = arith.mulf %1, %2 : vector<4x32xf32>
    %c0_2 = arith.constant 0 : index
    %c0_3 = arith.constant 0 : index
    %c0_4 = arith.constant 0 : index
    %4 = vector.load %arg2[%c0_2, %c0_3, %c0_4] : memref<1x8x32xf32, #tpu.memory_space<vmem>>, vector<1x8x32xf32>
    %5 = vector.shape_cast %4 : vector<1x8x32xf32> to vector<8x32xf32>
    %c0_5 = arith.constant 0 : index
    %c0_6 = arith.constant 0 : index
    %c0_7 = arith.constant 0 : index
    %6 = vector.load %arg3[%c0_5, %c0_6, %c0_7] : memref<1x8x32xf32, #tpu.memory_space<vmem>>, vector<1x8x32xf32>
    %7 = vector.shape_cast %6 : vector<1x8x32xf32> to vector<8x32xf32>
    %8 = vector.extract_strided_slice %3 {offsets = [0, 0], sizes = [4, 4], strides = [1, 1]} : vector<4x32xf32> to vector<4x4xf32>
    %9 = vector.extract_strided_slice %5 {offsets = [0, 0], sizes = [8, 4], strides = [1, 1]} : vector<8x32xf32> to vector<8x4xf32>
    %cst_8 = arith.constant dense<0.000000e+00> : vector<4x8xf32>
    %10 = tpu.matmul %8, %9, %cst_8 {dimension_numbers = #tpu.dot_dimension_numbers<[1], [1], [0], [0], [0, 0, 1, 0], [], []>} : vector<4x4xf32>, vector<8x4xf32>, vector<4x8xf32> -> vector<4x8xf32>
    %cst_9 = arith.constant dense<0xFF800000> : vector<4xf32>
    %11 = vector.multi_reduction <maximumf>, %10, %cst_9 [1] : vector<4x8xf32> to vector<4xf32>
    %12 = vector.shape_cast %11 : vector<4xf32> to vector<4x1xf32>
    %13 = vector.broadcast %12 : vector<4x1xf32> to vector<4x8xf32>
    %14 = arith.subf %10, %13 : vector<4x8xf32>
    %15 = math.exp %14 : vector<4x8xf32>
    %16 = vector.extract_strided_slice %7 {offsets = [0, 0], sizes = [8, 4], strides = [1, 1]} : vector<8x32xf32> to vector<8x4xf32>
    %cst_10 = arith.constant dense<0.000000e+00> : vector<4x4xf32>
    %17 = tpu.matmul %15, %16, %cst_10 {dimension_numbers = #tpu.dot_dimension_numbers<[1], [0], [0], [1], [0, 0, 1, 1], [], []>} : vector<4x8xf32>, vector<8x4xf32>, vector<4x4xf32> -> vector<4x4xf32>
    %cst_11 = arith.constant dense<0.000000e+00> : vector<4xf32>
    %18 = vector.multi_reduction <add>, %15, %cst_11 [1] : vector<4x8xf32> to vector<4xf32>
    %19 = vector.shape_cast %18 : vector<4xf32> to vector<4x1xf32>
    %cst_12 = arith.constant 1.000000e+00 : f32
    %20 = vector.broadcast %cst_12 : f32 to vector<4x1xf32>
    %21 = arith.divf %20, %19 : vector<4x1xf32>
    %22 = vector.broadcast %21 : vector<4x1xf32> to vector<4x4xf32>
    %23 = arith.mulf %17, %22 : vector<4x4xf32>
    %24 = vector.extract_strided_slice %3 {offsets = [0, 4], sizes = [4, 4], strides = [1, 1]} : vector<4x32xf32> to vector<4x4xf32>
    %25 = vector.extract_strided_slice %5 {offsets = [0, 4], sizes = [8, 4], strides = [1, 1]} : vector<8x32xf32> to vector<8x4xf32>
    %cst_13 = arith.constant dense<0.000000e+00> : vector<4x8xf32>
    %26 = tpu.matmul %24, %25, %cst_13 {dimension_numbers = #tpu.dot_dimension_numbers<[1], [1], [0], [0], [0, 0, 1, 0], [], []>} : vector<4x4xf32>, vector<8x4xf32>, vector<4x8xf32> -> vector<4x8xf32>
    %cst_14 = arith.constant dense<0xFF800000> : vector<4xf32>
    %27 = vector.multi_reduction <maximumf>, %26, %cst_14 [1] : vector<4x8xf32> to vector<4xf32>
    %28 = vector.shape_cast %27 : vector<4xf32> to vector<4x1xf32>
    %29 = vector.broadcast %28 : vector<4x1xf32> to vector<4x8xf32>
    %30 = arith.subf %26, %29 : vector<4x8xf32>
    %31 = math.exp %30 : vector<4x8xf32>
    %32 = vector.extract_strided_slice %7 {offsets = [0, 4], sizes = [8, 4], strides = [1, 1]} : vector<8x32xf32> to vector<8x4xf32>
    %cst_15 = arith.constant dense<0.000000e+00> : vector<4x4xf32>
    %33 = tpu.matmul %31, %32, %cst_15 {dimension_numbers = #tpu.dot_dimension_numbers<[1], [0], [0], [1], [0, 0, 1, 1], [], []>} : vector<4x8xf32>, vector<8x4xf32>, vector<4x4xf32> -> vector<4x4xf32>
    %cst_16 = arith.constant dense<0.000000e+00> : vector<4xf32>
    %34 = vector.multi_reduction <add>, %31, %cst_16 [1] : vector<4x8xf32> to vector<4xf32>
    %35 = vector.shape_cast %34 : vector<4xf32> to vector<4x1xf32>
    %cst_17 = arith.constant 1.000000e+00 : f32
    %36 = vector.broadcast %cst_17 : f32 to vector<4x1xf32>
    %37 = arith.divf %36, %35 : vector<4x1xf32>
    %38 = vector.broadcast %37 : vector<4x1xf32> to vector<4x4xf32>
    %39 = arith.mulf %33, %38 : vector<4x4xf32>
    %40 = vector.extract_strided_slice %3 {offsets = [0, 8], sizes = [4, 4], strides = [1, 1]} : vector<4x32xf32> to vector<4x4xf32>
    %41 = vector.extract_strided_slice %5 {offsets = [0, 8], sizes = [8, 4], strides = [1, 1]} : vector<8x32xf32> to vector<8x4xf32>
    %cst_18 = arith.constant dense<0.000000e+00> : vector<4x8xf32>
    %42 = tpu.matmul %40, %41, %cst_18 {dimension_numbers = #tpu.dot_dimension_numbers<[1], [1], [0], [0], [0, 0, 1, 0], [], []>} : vector<4x4xf32>, vector<8x4xf32>, vector<4x8xf32> -> vector<4x8xf32>
    %cst_19 = arith.constant dense<0xFF800000> : vector<4xf32>
    %43 = vector.multi_reduction <maximumf>, %42, %cst_19 [1] : vector<4x8xf32> to vector<4xf32>
    %44 = vector.shape_cast %43 : vector<4xf32> to vector<4x1xf32>
    %45 = vector.broadcast %44 : vector<4x1xf32> to vector<4x8xf32>
    %46 = arith.subf %42, %45 : vector<4x8xf32>
    %47 = math.exp %46 : vector<4x8xf32>
    %48 = vector.extract_strided_slice %7 {offsets = [0, 8], sizes = [8, 4], strides = [1, 1]} : vector<8x32xf32> to vector<8x4xf32>
    %cst_20 = arith.constant dense<0.000000e+00> : vector<4x4xf32>
    %49 = tpu.matmul %47, %48, %cst_20 {dimension_numbers = #tpu.dot_dimension_numbers<[1], [0], [0], [1], [0, 0, 1, 1], [], []>} : vector<4x8xf32>, vector<8x4xf32>, vector<4x4xf32> -> vector<4x4xf32>
    %cst_21 = arith.constant dense<0.000000e+00> : vector<4xf32>
    %50 = vector.multi_reduction <add>, %47, %cst_21 [1] : vector<4x8xf32> to vector<4xf32>
    %51 = vector.shape_cast %50 : vector<4xf32> to vector<4x1xf32>
    %cst_22 = arith.constant 1.000000e+00 : f32
    %52 = vector.broadcast %cst_22 : f32 to vector<4x1xf32>
    %53 = arith.divf %52, %51 : vector<4x1xf32>
    %54 = vector.broadcast %53 : vector<4x1xf32> to vector<4x4xf32>
    %55 = arith.mulf %49, %54 : vector<4x4xf32>
    %56 = vector.extract_strided_slice %3 {offsets = [0, 12], sizes = [4, 4], strides = [1, 1]} : vector<4x32xf32> to vector<4x4xf32>
    %57 = vector.extract_strided_slice %5 {offsets = [0, 12], sizes = [8, 4], strides = [1, 1]} : vector<8x32xf32> to vector<8x4xf32>
    %cst_23 = arith.constant dense<0.000000e+00> : vector<4x8xf32>
    %58 = tpu.matmul %56, %57, %cst_23 {dimension_numbers = #tpu.dot_dimension_numbers<[1], [1], [0], [0], [0, 0, 1, 0], [], []>} : vector<4x4xf32>, vector<8x4xf32>, vector<4x8xf32> -> vector<4x8xf32>
    %cst_24 = arith.constant dense<0xFF800000> : vector<4xf32>
    %59 = vector.multi_reduction <maximumf>, %58, %cst_24 [1] : vector<4x8xf32> to vector<4xf32>
    %60 = vector.shape_cast %59 : vector<4xf32> to vector<4x1xf32>
    %61 = vector.broadcast %60 : vector<4x1xf32> to vector<4x8xf32>
    %62 = arith.subf %58, %61 : vector<4x8xf32>
    %63 = math.exp %62 : vector<4x8xf32>
    %64 = vector.extract_strided_slice %7 {offsets = [0, 12], sizes = [8, 4], strides = [1, 1]} : vector<8x32xf32> to vector<8x4xf32>
    %cst_25 = arith.constant dense<0.000000e+00> : vector<4x4xf32>
    %65 = tpu.matmul %63, %64, %cst_25 {dimension_numbers = #tpu.dot_dimension_numbers<[1], [0], [0], [1], [0, 0, 1, 1], [], []>} : vector<4x8xf32>, vector<8x4xf32>, vector<4x4xf32> -> vector<4x4xf32>
    %cst_26 = arith.constant dense<0.000000e+00> : vector<4xf32>
    %66 = vector.multi_reduction <add>, %63, %cst_26 [1] : vector<4x8xf32> to vector<4xf32>
    %67 = vector.shape_cast %66 : vector<4xf32> to vector<4x1xf32>
    %cst_27 = arith.constant 1.000000e+00 : f32
    %68 = vector.broadcast %cst_27 : f32 to vector<4x1xf32>
    %69 = arith.divf %68, %67 : vector<4x1xf32>
    %70 = vector.broadcast %69 : vector<4x1xf32> to vector<4x4xf32>
    %71 = arith.mulf %65, %70 : vector<4x4xf32>
    %72 = vector.extract_strided_slice %3 {offsets = [0, 16], sizes = [4, 4], strides = [1, 1]} : vector<4x32xf32> to vector<4x4xf32>
    %73 = vector.extract_strided_slice %5 {offsets = [0, 16], sizes = [8, 4], strides = [1, 1]} : vector<8x32xf32> to vector<8x4xf32>
    %cst_28 = arith.constant dense<0.000000e+00> : vector<4x8xf32>
    %74 = tpu.matmul %72, %73, %cst_28 {dimension_numbers = #tpu.dot_dimension_numbers<[1], [1], [0], [0], [0, 0, 1, 0], [], []>} : vector<4x4xf32>, vector<8x4xf32>, vector<4x8xf32> -> vector<4x8xf32>
    %cst_29 = arith.constant dense<0xFF800000> : vector<4xf32>
    %75 = vector.multi_reduction <maximumf>, %74, %cst_29 [1] : vector<4x8xf32> to vector<4xf32>
    %76 = vector.shape_cast %75 : vector<4xf32> to vector<4x1xf32>
    %77 = vector.broadcast %76 : vector<4x1xf32> to vector<4x8xf32>
    %78 = arith.subf %74, %77 : vector<4x8xf32>
    %79 = math.exp %78 : vector<4x8xf32>
    %80 = vector.extract_strided_slice %7 {offsets = [0, 16], sizes = [8, 4], strides = [1, 1]} : vector<8x32xf32> to vector<8x4xf32>
    %cst_30 = arith.constant dense<0.000000e+00> : vector<4x4xf32>
    %81 = tpu.matmul %79, %80, %cst_30 {dimension_numbers = #tpu.dot_dimension_numbers<[1], [0], [0], [1], [0, 0, 1, 1], [], []>} : vector<4x8xf32>, vector<8x4xf32>, vector<4x4xf32> -> vector<4x4xf32>
    %cst_31 = arith.constant dense<0.000000e+00> : vector<4xf32>
    %82 = vector.multi_reduction <add>, %79, %cst_31 [1] : vector<4x8xf32> to vector<4xf32>
    %83 = vector.shape_cast %82 : vector<4xf32> to vector<4x1xf32>
    %cst_32 = arith.constant 1.000000e+00 : f32
    %84 = vector.broadcast %cst_32 : f32 to vector<4x1xf32>
    %85 = arith.divf %84, %83 : vector<4x1xf32>
    %86 = vector.broadcast %85 : vector<4x1xf32> to vector<4x4xf32>
    %87 = arith.mulf %81, %86 : vector<4x4xf32>
    %88 = vector.extract_strided_slice %3 {offsets = [0, 20], sizes = [4, 4], strides = [1, 1]} : vector<4x32xf32> to vector<4x4xf32>
    %89 = vector.extract_strided_slice %5 {offsets = [0, 20], sizes = [8, 4], strides = [1, 1]} : vector<8x32xf32> to vector<8x4xf32>
    %cst_33 = arith.constant dense<0.000000e+00> : vector<4x8xf32>
    %90 = tpu.matmul %88, %89, %cst_33 {dimension_numbers = #tpu.dot_dimension_numbers<[1], [1], [0], [0], [0, 0, 1, 0], [], []>} : vector<4x4xf32>, vector<8x4xf32>, vector<4x8xf32> -> vector<4x8xf32>
    %cst_34 = arith.constant dense<0xFF800000> : vector<4xf32>
    %91 = vector.multi_reduction <maximumf>, %90, %cst_34 [1] : vector<4x8xf32> to vector<4xf32>
    %92 = vector.shape_cast %91 : vector<4xf32> to vector<4x1xf32>
    %93 = vector.broadcast %92 : vector<4x1xf32> to vector<4x8xf32>
    %94 = arith.subf %90, %93 : vector<4x8xf32>
    %95 = math.exp %94 : vector<4x8xf32>
    %96 = vector.extract_strided_slice %7 {offsets = [0, 20], sizes = [8, 4], strides = [1, 1]} : vector<8x32xf32> to vector<8x4xf32>
    %cst_35 = arith.constant dense<0.000000e+00> : vector<4x4xf32>
    %97 = tpu.matmul %95, %96, %cst_35 {dimension_numbers = #tpu.dot_dimension_numbers<[1], [0], [0], [1], [0, 0, 1, 1], [], []>} : vector<4x8xf32>, vector<8x4xf32>, vector<4x4xf32> -> vector<4x4xf32>
    %cst_36 = arith.constant dense<0.000000e+00> : vector<4xf32>
    %98 = vector.multi_reduction <add>, %95, %cst_36 [1] : vector<4x8xf32> to vector<4xf32>
    %99 = vector.shape_cast %98 : vector<4xf32> to vector<4x1xf32>
    %cst_37 = arith.constant 1.000000e+00 : f32
    %100 = vector.broadcast %cst_37 : f32 to vector<4x1xf32>
    %101 = arith.divf %100, %99 : vector<4x1xf32>
    %102 = vector.broadcast %101 : vector<4x1xf32> to vector<4x4xf32>
    %103 = arith.mulf %97, %102 : vector<4x4xf32>
    %104 = vector.extract_strided_slice %3 {offsets = [0, 24], sizes = [4, 4], strides = [1, 1]} : vector<4x32xf32> to vector<4x4xf32>
    %105 = vector.extract_strided_slice %5 {offsets = [0, 24], sizes = [8, 4], strides = [1, 1]} : vector<8x32xf32> to vector<8x4xf32>
    %cst_38 = arith.constant dense<0.000000e+00> : vector<4x8xf32>
    %106 = tpu.matmul %104, %105, %cst_38 {dimension_numbers = #tpu.dot_dimension_numbers<[1], [1], [0], [0], [0, 0, 1, 0], [], []>} : vector<4x4xf32>, vector<8x4xf32>, vector<4x8xf32> -> vector<4x8xf32>
    %cst_39 = arith.constant dense<0xFF800000> : vector<4xf32>
    %107 = vector.multi_reduction <maximumf>, %106, %cst_39 [1] : vector<4x8xf32> to vector<4xf32>
    %108 = vector.shape_cast %107 : vector<4xf32> to vector<4x1xf32>
    %109 = vector.broadcast %108 : vector<4x1xf32> to vector<4x8xf32>
    %110 = arith.subf %106, %109 : vector<4x8xf32>
    %111 = math.exp %110 : vector<4x8xf32>
    %112 = vector.extract_strided_slice %7 {offsets = [0, 24], sizes = [8, 4], strides = [1, 1]} : vector<8x32xf32> to vector<8x4xf32>
    %cst_40 = arith.constant dense<0.000000e+00> : vector<4x4xf32>
    %113 = tpu.matmul %111, %112, %cst_40 {dimension_numbers = #tpu.dot_dimension_numbers<[1], [0], [0], [1], [0, 0, 1, 1], [], []>} : vector<4x8xf32>, vector<8x4xf32>, vector<4x4xf32> -> vector<4x4xf32>
    %cst_41 = arith.constant dense<0.000000e+00> : vector<4xf32>
    %114 = vector.multi_reduction <add>, %111, %cst_41 [1] : vector<4x8xf32> to vector<4xf32>
    %115 = vector.shape_cast %114 : vector<4xf32> to vector<4x1xf32>
    %cst_42 = arith.constant 1.000000e+00 : f32
    %116 = vector.broadcast %cst_42 : f32 to vector<4x1xf32>
    %117 = arith.divf %116, %115 : vector<4x1xf32>
    %118 = vector.broadcast %117 : vector<4x1xf32> to vector<4x4xf32>
    %119 = arith.mulf %113, %118 : vector<4x4xf32>
    %120 = vector.extract_strided_slice %3 {offsets = [0, 28], sizes = [4, 4], strides = [1, 1]} : vector<4x32xf32> to vector<4x4xf32>
    %121 = vector.extract_strided_slice %5 {offsets = [0, 28], sizes = [8, 4], strides = [1, 1]} : vector<8x32xf32> to vector<8x4xf32>
    %cst_43 = arith.constant dense<0.000000e+00> : vector<4x8xf32>
    %122 = tpu.matmul %120, %121, %cst_43 {dimension_numbers = #tpu.dot_dimension_numbers<[1], [1], [0], [0], [0, 0, 1, 0], [], []>} : vector<4x4xf32>, vector<8x4xf32>, vector<4x8xf32> -> vector<4x8xf32>
    %cst_44 = arith.constant dense<0xFF800000> : vector<4xf32>
    %123 = vector.multi_reduction <maximumf>, %122, %cst_44 [1] : vector<4x8xf32> to vector<4xf32>
    %124 = vector.shape_cast %123 : vector<4xf32> to vector<4x1xf32>
    %125 = vector.broadcast %124 : vector<4x1xf32> to vector<4x8xf32>
    %126 = arith.subf %122, %125 : vector<4x8xf32>
    %127 = math.exp %126 : vector<4x8xf32>
    %128 = vector.extract_strided_slice %7 {offsets = [0, 28], sizes = [8, 4], strides = [1, 1]} : vector<8x32xf32> to vector<8x4xf32>
    %cst_45 = arith.constant dense<0.000000e+00> : vector<4x4xf32>
    %129 = tpu.matmul %127, %128, %cst_45 {dimension_numbers = #tpu.dot_dimension_numbers<[1], [0], [0], [1], [0, 0, 1, 1], [], []>} : vector<4x8xf32>, vector<8x4xf32>, vector<4x4xf32> -> vector<4x4xf32>
    %cst_46 = arith.constant dense<0.000000e+00> : vector<4xf32>
    %130 = vector.multi_reduction <add>, %127, %cst_46 [1] : vector<4x8xf32> to vector<4xf32>
    %131 = vector.shape_cast %130 : vector<4xf32> to vector<4x1xf32>
    %cst_47 = arith.constant 1.000000e+00 : f32
    %132 = vector.broadcast %cst_47 : f32 to vector<4x1xf32>
    %133 = arith.divf %132, %131 : vector<4x1xf32>
    %134 = vector.broadcast %133 : vector<4x1xf32> to vector<4x4xf32>
    %135 = arith.mulf %129, %134 : vector<4x4xf32>
    %136 = tpu.concatenate %23, %39, %55, %71, %87, %103, %119, %135 in 1 : vector<4x4xf32>, vector<4x4xf32>, vector<4x4xf32>, vector<4x4xf32>, vector<4x4xf32>, vector<4x4xf32>, vector<4x4xf32>, vector<4x4xf32> -> vector<4x32xf32>
    %c0_48 = arith.constant 0 : index
    %c0_49 = arith.constant 0 : index
    %c0_50 = arith.constant 0 : index
    %137 = vector.load %arg4[%c0_48, %c0_49, %c0_50] : memref<1x4x32xf32, #tpu.memory_space<vmem>>, vector<1x4x32xf32>
    %138 = vector.shape_cast %137 : vector<1x4x32xf32> to vector<4x32xf32>
    %139 = vector.shape_cast %136 : vector<4x32xf32> to vector<1x4x32xf32>
    tpu.vector_store %arg4[%c0_48, %c0_49, %c0_50], %139 {strides = array<i32>} : memref<1x4x32xf32, #tpu.memory_space<vmem>>, vector<1x4x32xf32>,
    return
  }
  func.func @transform_0(%arg0: i32) -> (i32, i32, i32) {
    %c0_i32 = arith.constant 0 : i32
    %c0_i32_0 = arith.constant 0 : i32
    %c0_i32_1 = arith.constant 0 : i32
    return %arg0, %c0_i32, %c0_i32_0 : i32, i32, i32
  }
  func.func @transform_1(%arg0: i32) -> (i32, i32, i32) {
    %c0_i32 = arith.constant 0 : i32
    %c0_i32_0 = arith.constant 0 : i32
    %c0_i32_1 = arith.constant 0 : i32
    return %arg0, %c0_i32, %c0_i32_0 : i32, i32, i32
  }
  func.func @transform_2(%arg0: i32) -> (i32, i32, i32) {
    %c0_i32 = arith.constant 0 : i32
    %c0_i32_0 = arith.constant 0 : i32
    %c0_i32_1 = arith.constant 0 : i32
    return %arg0, %c0_i32, %c0_i32_0 : i32, i32, i32
  }
  func.func @transform_3(%arg0: i32) -> (i32, i32, i32) {
    %c0_i32 = arith.constant 0 : i32
    %c0_i32_0 = arith.constant 0 : i32
    %c0_i32_1 = arith.constant 0 : i32
    return %arg0, %c0_i32, %c0_i32_0 : i32, i32, i32
  }
}

module attributes {stable_mosaic.version = 11 : i64} {
  func.func @_proj_add_ln_kernel(%arg0: i32, %arg1: memref<8x32xf32, #tpu.memory_space<vmem>>, %arg2: memref<32x32xf32, #tpu.memory_space<vmem>>, %arg3: memref<1x32xf32, #tpu.memory_space<vmem>>, %arg4: memref<8x32xf32, #tpu.memory_space<vmem>>, %arg5: memref<1x32xf32, #tpu.memory_space<vmem>>, %arg6: memref<1x32xf32, #tpu.memory_space<vmem>>, %arg7: memref<8x32xf32, #tpu.memory_space<vmem>>) attributes {dimension_semantics = [#tpu.dimension_semantics<parallel>], iteration_bounds = array<i64: 1>, scalar_prefetch = 0 : i64, scratch_operands = 0 : i64, tpu.core_type = #tpu.core_type<tc>, window_params = [{transform_indices = @transform_0, window_bounds = array<i64: 8, 32>}, {pipeline_mode = #tpu.pipeline_mode<synchronous>, transform_indices = @transform_1, window_bounds = array<i64: 32, 32>}, {pipeline_mode = #tpu.pipeline_mode<synchronous>, transform_indices = @transform_2, window_bounds = array<i64: 1, 32>}, {transform_indices = @transform_3, window_bounds = array<i64: 8, 32>}, {pipeline_mode = #tpu.pipeline_mode<synchronous>, transform_indices = @transform_4, window_bounds = array<i64: 1, 32>}, {pipeline_mode = #tpu.pipeline_mode<synchronous>, transform_indices = @transform_5, window_bounds = array<i64: 1, 32>}, {transform_indices = @transform_6, window_bounds = array<i64: 8, 32>}]} {
    %c0 = arith.constant 0 : index
    %c0_0 = arith.constant 0 : index
    %0 = vector.load %arg1[%c0, %c0_0] : memref<8x32xf32, #tpu.memory_space<vmem>>, vector<8x32xf32>
    %c0_1 = arith.constant 0 : index
    %c0_2 = arith.constant 0 : index
    %1 = vector.load %arg2[%c0_1, %c0_2] : memref<32x32xf32, #tpu.memory_space<vmem>>, vector<32x32xf32>
    %cst = arith.constant dense<0.000000e+00> : vector<8x32xf32>
    %2 = tpu.matmul %0, %1, %cst {dimension_numbers = #tpu.dot_dimension_numbers<[1], [0], [0], [1], [0, 0, 1, 1], [], []>} : vector<8x32xf32>, vector<32x32xf32>, vector<8x32xf32> -> vector<8x32xf32>
    %c0_3 = arith.constant 0 : index
    %c0_4 = arith.constant 0 : index
    %3 = vector.load %arg3[%c0_3, %c0_4] : memref<1x32xf32, #tpu.memory_space<vmem>>, vector<1x32xf32>
    %4 = vector.broadcast %3 : vector<1x32xf32> to vector<8x32xf32>
    %5 = arith.addf %2, %4 : vector<8x32xf32>
    %c0_5 = arith.constant 0 : index
    %c0_6 = arith.constant 0 : index
    %6 = vector.load %arg4[%c0_5, %c0_6] : memref<8x32xf32, #tpu.memory_space<vmem>>, vector<8x32xf32>
    %7 = arith.addf %6, %5 : vector<8x32xf32>
    %cst_7 = arith.constant dense<0.000000e+00> : vector<8xf32>
    %8 = vector.multi_reduction <add>, %7, %cst_7 [1] : vector<8x32xf32> to vector<8xf32>
    %9 = vector.shape_cast %8 : vector<8xf32> to vector<8x1xf32>
    %cst_8 = arith.constant 3.200000e+01 : f32
    %10 = vector.broadcast %cst_8 : f32 to vector<8x1xf32>
    %11 = arith.divf %9, %10 : vector<8x1xf32>
    %12 = vector.broadcast %11 : vector<8x1xf32> to vector<8x32xf32>
    %13 = arith.subf %7, %12 : vector<8x32xf32>
    %14 = arith.mulf %13, %13 : vector<8x32xf32>
    %cst_9 = arith.constant dense<0.000000e+00> : vector<8xf32>
    %15 = vector.multi_reduction <add>, %14, %cst_9 [1] : vector<8x32xf32> to vector<8xf32>
    %16 = vector.shape_cast %15 : vector<8xf32> to vector<8x1xf32>
    %cst_10 = arith.constant 3.200000e+01 : f32
    %17 = vector.broadcast %cst_10 : f32 to vector<8x1xf32>
    %18 = arith.divf %16, %17 : vector<8x1xf32>
    %19 = vector.broadcast %11 : vector<8x1xf32> to vector<8x32xf32>
    %20 = arith.subf %7, %19 : vector<8x32xf32>
    %cst_11 = arith.constant 9.99999974E-6 : f32
    %21 = vector.broadcast %cst_11 : f32 to vector<8x1xf32>
    %22 = arith.addf %18, %21 : vector<8x1xf32>
    %23 = math.rsqrt %22 : vector<8x1xf32>
    %24 = vector.broadcast %23 : vector<8x1xf32> to vector<8x32xf32>
    %25 = arith.mulf %20, %24 : vector<8x32xf32>
    %c0_12 = arith.constant 0 : index
    %c0_13 = arith.constant 0 : index
    %26 = vector.load %arg5[%c0_12, %c0_13] : memref<1x32xf32, #tpu.memory_space<vmem>>, vector<1x32xf32>
    %27 = vector.broadcast %26 : vector<1x32xf32> to vector<8x32xf32>
    %28 = arith.mulf %25, %27 : vector<8x32xf32>
    %c0_14 = arith.constant 0 : index
    %c0_15 = arith.constant 0 : index
    %29 = vector.load %arg6[%c0_14, %c0_15] : memref<1x32xf32, #tpu.memory_space<vmem>>, vector<1x32xf32>
    %30 = vector.broadcast %29 : vector<1x32xf32> to vector<8x32xf32>
    %31 = arith.addf %28, %30 : vector<8x32xf32>
    %c0_16 = arith.constant 0 : index
    %c0_17 = arith.constant 0 : index
    %32 = vector.load %arg7[%c0_16, %c0_17] : memref<8x32xf32, #tpu.memory_space<vmem>>, vector<8x32xf32>
    tpu.vector_store %arg7[%c0_16, %c0_17], %31 {strides = array<i32>} : memref<8x32xf32, #tpu.memory_space<vmem>>, vector<8x32xf32>,
    return
  }
  func.func @transform_0(%arg0: i32) -> (i32, i32) {
    %c0_i32 = arith.constant 0 : i32
    %c0_i32_0 = arith.constant 0 : i32
    return %arg0, %c0_i32 : i32, i32
  }
  func.func @transform_1(%arg0: i32) -> (i32, i32) {
    %c0_i32 = arith.constant 0 : i32
    %c0_i32_0 = arith.constant 0 : i32
    %c0_i32_1 = arith.constant 0 : i32
    return %c0_i32, %c0_i32_0 : i32, i32
  }
  func.func @transform_2(%arg0: i32) -> (i32, i32) {
    %c0_i32 = arith.constant 0 : i32
    %c0_i32_0 = arith.constant 0 : i32
    %c0_i32_1 = arith.constant 0 : i32
    return %c0_i32, %c0_i32_0 : i32, i32
  }
  func.func @transform_3(%arg0: i32) -> (i32, i32) {
    %c0_i32 = arith.constant 0 : i32
    %c0_i32_0 = arith.constant 0 : i32
    return %arg0, %c0_i32 : i32, i32
  }
  func.func @transform_4(%arg0: i32) -> (i32, i32) {
    %c0_i32 = arith.constant 0 : i32
    %c0_i32_0 = arith.constant 0 : i32
    %c0_i32_1 = arith.constant 0 : i32
    return %c0_i32, %c0_i32_0 : i32, i32
  }
  func.func @transform_5(%arg0: i32) -> (i32, i32) {
    %c0_i32 = arith.constant 0 : i32
    %c0_i32_0 = arith.constant 0 : i32
    %c0_i32_1 = arith.constant 0 : i32
    return %c0_i32, %c0_i32_0 : i32, i32
  }
  func.func @transform_6(%arg0: i32) -> (i32, i32) {
    %c0_i32 = arith.constant 0 : i32
    %c0_i32_0 = arith.constant 0 : i32
    return %arg0, %c0_i32 : i32, i32
  }
}

module attributes {stable_mosaic.version = 11 : i64} {
  func.func @_linear2_kernel(%arg0: i32, %arg1: memref<8x32xf32, #tpu.memory_space<vmem>>, %arg2: memref<32x32xf32, #tpu.memory_space<vmem>>, %arg3: memref<1x32xf32, #tpu.memory_space<vmem>>, %arg4: memref<32x32xf32, #tpu.memory_space<vmem>>, %arg5: memref<1x32xf32, #tpu.memory_space<vmem>>, %arg6: memref<8x32xf32, #tpu.memory_space<vmem>>, %arg7: memref<8x32xf32, #tpu.memory_space<vmem>>) attributes {dimension_semantics = [#tpu.dimension_semantics<parallel>], iteration_bounds = array<i64: 1>, scalar_prefetch = 0 : i64, scratch_operands = 0 : i64, tpu.core_type = #tpu.core_type<tc>, window_params = [{transform_indices = @transform_0, window_bounds = array<i64: 8, 32>}, {pipeline_mode = #tpu.pipeline_mode<synchronous>, transform_indices = @transform_1, window_bounds = array<i64: 32, 32>}, {pipeline_mode = #tpu.pipeline_mode<synchronous>, transform_indices = @transform_2, window_bounds = array<i64: 1, 32>}, {pipeline_mode = #tpu.pipeline_mode<synchronous>, transform_indices = @transform_3, window_bounds = array<i64: 32, 32>}, {pipeline_mode = #tpu.pipeline_mode<synchronous>, transform_indices = @transform_4, window_bounds = array<i64: 1, 32>}, {transform_indices = @transform_5, window_bounds = array<i64: 8, 32>}, {transform_indices = @transform_6, window_bounds = array<i64: 8, 32>}]} {
    %c0 = arith.constant 0 : index
    %c0_0 = arith.constant 0 : index
    %0 = vector.load %arg1[%c0, %c0_0] : memref<8x32xf32, #tpu.memory_space<vmem>>, vector<8x32xf32>
    %c0_1 = arith.constant 0 : index
    %c0_2 = arith.constant 0 : index
    %1 = vector.load %arg2[%c0_1, %c0_2] : memref<32x32xf32, #tpu.memory_space<vmem>>, vector<32x32xf32>
    %cst = arith.constant dense<0.000000e+00> : vector<8x32xf32>
    %2 = tpu.matmul %0, %1, %cst {dimension_numbers = #tpu.dot_dimension_numbers<[1], [0], [0], [1], [0, 0, 1, 1], [], []>} : vector<8x32xf32>, vector<32x32xf32>, vector<8x32xf32> -> vector<8x32xf32>
    %c0_3 = arith.constant 0 : index
    %c0_4 = arith.constant 0 : index
    %3 = vector.load %arg3[%c0_3, %c0_4] : memref<1x32xf32, #tpu.memory_space<vmem>>, vector<1x32xf32>
    %4 = vector.broadcast %3 : vector<1x32xf32> to vector<8x32xf32>
    %5 = arith.addf %2, %4 : vector<8x32xf32>
    %c0_5 = arith.constant 0 : index
    %c0_6 = arith.constant 0 : index
    %6 = vector.load %arg6[%c0_5, %c0_6] : memref<8x32xf32, #tpu.memory_space<vmem>>, vector<8x32xf32>
    tpu.vector_store %arg6[%c0_5, %c0_6], %5 {strides = array<i32>} : memref<8x32xf32, #tpu.memory_space<vmem>>, vector<8x32xf32>,
    %c0_7 = arith.constant 0 : index
    %c0_8 = arith.constant 0 : index
    %7 = vector.load %arg4[%c0_7, %c0_8] : memref<32x32xf32, #tpu.memory_space<vmem>>, vector<32x32xf32>
    %cst_9 = arith.constant dense<0.000000e+00> : vector<8x32xf32>
    %8 = tpu.matmul %0, %7, %cst_9 {dimension_numbers = #tpu.dot_dimension_numbers<[1], [0], [0], [1], [0, 0, 1, 1], [], []>} : vector<8x32xf32>, vector<32x32xf32>, vector<8x32xf32> -> vector<8x32xf32>
    %c0_10 = arith.constant 0 : index
    %c0_11 = arith.constant 0 : index
    %9 = vector.load %arg5[%c0_10, %c0_11] : memref<1x32xf32, #tpu.memory_space<vmem>>, vector<1x32xf32>
    %10 = vector.broadcast %9 : vector<1x32xf32> to vector<8x32xf32>
    %11 = arith.addf %8, %10 : vector<8x32xf32>
    %c0_12 = arith.constant 0 : index
    %c0_13 = arith.constant 0 : index
    %12 = vector.load %arg7[%c0_12, %c0_13] : memref<8x32xf32, #tpu.memory_space<vmem>>, vector<8x32xf32>
    tpu.vector_store %arg7[%c0_12, %c0_13], %11 {strides = array<i32>} : memref<8x32xf32, #tpu.memory_space<vmem>>, vector<8x32xf32>,
    return
  }
  func.func @transform_0(%arg0: i32) -> (i32, i32) {
    %c0_i32 = arith.constant 0 : i32
    %c0_i32_0 = arith.constant 0 : i32
    return %arg0, %c0_i32 : i32, i32
  }
  func.func @transform_1(%arg0: i32) -> (i32, i32) {
    %c0_i32 = arith.constant 0 : i32
    %c0_i32_0 = arith.constant 0 : i32
    %c0_i32_1 = arith.constant 0 : i32
    return %c0_i32, %c0_i32_0 : i32, i32
  }
  func.func @transform_2(%arg0: i32) -> (i32, i32) {
    %c0_i32 = arith.constant 0 : i32
    %c0_i32_0 = arith.constant 0 : i32
    %c0_i32_1 = arith.constant 0 : i32
    return %c0_i32, %c0_i32_0 : i32, i32
  }
  func.func @transform_3(%arg0: i32) -> (i32, i32) {
    %c0_i32 = arith.constant 0 : i32
    %c0_i32_0 = arith.constant 0 : i32
    %c0_i32_1 = arith.constant 0 : i32
    return %c0_i32, %c0_i32_0 : i32, i32
  }
  func.func @transform_4(%arg0: i32) -> (i32, i32) {
    %c0_i32 = arith.constant 0 : i32
    %c0_i32_0 = arith.constant 0 : i32
    %c0_i32_1 = arith.constant 0 : i32
    return %c0_i32, %c0_i32_0 : i32, i32
  }
  func.func @transform_5(%arg0: i32) -> (i32, i32) {
    %c0_i32 = arith.constant 0 : i32
    %c0_i32_0 = arith.constant 0 : i32
    return %arg0, %c0_i32 : i32, i32
  }
  func.func @transform_6(%arg0: i32) -> (i32, i32) {
    %c0_i32 = arith.constant 0 : i32
    %c0_i32_0 = arith.constant 0 : i32
    return %arg0, %c0_i32 : i32, i32
  }
}

module attributes {stable_mosaic.version = 11 : i64} {
  func.func @_mha_kernel(%arg0: i32, %arg1: memref<1x8x32xf32, #tpu.memory_space<vmem>>, %arg2: memref<1x4x32xf32, #tpu.memory_space<vmem>>, %arg3: memref<1x4x32xf32, #tpu.memory_space<vmem>>, %arg4: memref<1x8x32xf32, #tpu.memory_space<vmem>>) attributes {dimension_semantics = [#tpu.dimension_semantics<parallel>], iteration_bounds = array<i64: 2>, scalar_prefetch = 0 : i64, scratch_operands = 0 : i64, tpu.core_type = #tpu.core_type<tc>, window_params = [{transform_indices = @transform_0, window_bounds = array<i64: 1, 8, 32>}, {transform_indices = @transform_1, window_bounds = array<i64: 1, 4, 32>}, {transform_indices = @transform_2, window_bounds = array<i64: 1, 4, 32>}, {transform_indices = @transform_3, window_bounds = array<i64: 1, 8, 32>}]} {
    %c0 = arith.constant 0 : index
    %c0_0 = arith.constant 0 : index
    %c0_1 = arith.constant 0 : index
    %0 = vector.load %arg1[%c0, %c0_0, %c0_1] : memref<1x8x32xf32, #tpu.memory_space<vmem>>, vector<1x8x32xf32>
    %1 = vector.shape_cast %0 : vector<1x8x32xf32> to vector<8x32xf32>
    %cst = arith.constant 5.000000e-01 : f32
    %2 = vector.broadcast %cst : f32 to vector<8x32xf32>
    %3 = arith.mulf %1, %2 : vector<8x32xf32>
    %c0_2 = arith.constant 0 : index
    %c0_3 = arith.constant 0 : index
    %c0_4 = arith.constant 0 : index
    %4 = vector.load %arg2[%c0_2, %c0_3, %c0_4] : memref<1x4x32xf32, #tpu.memory_space<vmem>>, vector<1x4x32xf32>
    %5 = vector.shape_cast %4 : vector<1x4x32xf32> to vector<4x32xf32>
    %c0_5 = arith.constant 0 : index
    %c0_6 = arith.constant 0 : index
    %c0_7 = arith.constant 0 : index
    %6 = vector.load %arg3[%c0_5, %c0_6, %c0_7] : memref<1x4x32xf32, #tpu.memory_space<vmem>>, vector<1x4x32xf32>
    %7 = vector.shape_cast %6 : vector<1x4x32xf32> to vector<4x32xf32>
    %8 = vector.extract_strided_slice %3 {offsets = [0, 0], sizes = [8, 4], strides = [1, 1]} : vector<8x32xf32> to vector<8x4xf32>
    %9 = vector.extract_strided_slice %5 {offsets = [0, 0], sizes = [4, 4], strides = [1, 1]} : vector<4x32xf32> to vector<4x4xf32>
    %cst_8 = arith.constant dense<0.000000e+00> : vector<8x4xf32>
    %10 = tpu.matmul %8, %9, %cst_8 {dimension_numbers = #tpu.dot_dimension_numbers<[1], [1], [0], [0], [0, 0, 1, 0], [], []>} : vector<8x4xf32>, vector<4x4xf32>, vector<8x4xf32> -> vector<8x4xf32>
    %cst_9 = arith.constant dense<0xFF800000> : vector<8xf32>
    %11 = vector.multi_reduction <maximumf>, %10, %cst_9 [1] : vector<8x4xf32> to vector<8xf32>
    %12 = vector.shape_cast %11 : vector<8xf32> to vector<8x1xf32>
    %13 = vector.broadcast %12 : vector<8x1xf32> to vector<8x4xf32>
    %14 = arith.subf %10, %13 : vector<8x4xf32>
    %15 = math.exp %14 : vector<8x4xf32>
    %16 = vector.extract_strided_slice %7 {offsets = [0, 0], sizes = [4, 4], strides = [1, 1]} : vector<4x32xf32> to vector<4x4xf32>
    %cst_10 = arith.constant dense<0.000000e+00> : vector<8x4xf32>
    %17 = tpu.matmul %15, %16, %cst_10 {dimension_numbers = #tpu.dot_dimension_numbers<[1], [0], [0], [1], [0, 0, 1, 1], [], []>} : vector<8x4xf32>, vector<4x4xf32>, vector<8x4xf32> -> vector<8x4xf32>
    %cst_11 = arith.constant dense<0.000000e+00> : vector<8xf32>
    %18 = vector.multi_reduction <add>, %15, %cst_11 [1] : vector<8x4xf32> to vector<8xf32>
    %19 = vector.shape_cast %18 : vector<8xf32> to vector<8x1xf32>
    %cst_12 = arith.constant 1.000000e+00 : f32
    %20 = vector.broadcast %cst_12 : f32 to vector<8x1xf32>
    %21 = arith.divf %20, %19 : vector<8x1xf32>
    %22 = vector.broadcast %21 : vector<8x1xf32> to vector<8x4xf32>
    %23 = arith.mulf %17, %22 : vector<8x4xf32>
    %24 = vector.extract_strided_slice %3 {offsets = [0, 4], sizes = [8, 4], strides = [1, 1]} : vector<8x32xf32> to vector<8x4xf32>
    %25 = vector.extract_strided_slice %5 {offsets = [0, 4], sizes = [4, 4], strides = [1, 1]} : vector<4x32xf32> to vector<4x4xf32>
    %cst_13 = arith.constant dense<0.000000e+00> : vector<8x4xf32>
    %26 = tpu.matmul %24, %25, %cst_13 {dimension_numbers = #tpu.dot_dimension_numbers<[1], [1], [0], [0], [0, 0, 1, 0], [], []>} : vector<8x4xf32>, vector<4x4xf32>, vector<8x4xf32> -> vector<8x4xf32>
    %cst_14 = arith.constant dense<0xFF800000> : vector<8xf32>
    %27 = vector.multi_reduction <maximumf>, %26, %cst_14 [1] : vector<8x4xf32> to vector<8xf32>
    %28 = vector.shape_cast %27 : vector<8xf32> to vector<8x1xf32>
    %29 = vector.broadcast %28 : vector<8x1xf32> to vector<8x4xf32>
    %30 = arith.subf %26, %29 : vector<8x4xf32>
    %31 = math.exp %30 : vector<8x4xf32>
    %32 = vector.extract_strided_slice %7 {offsets = [0, 4], sizes = [4, 4], strides = [1, 1]} : vector<4x32xf32> to vector<4x4xf32>
    %cst_15 = arith.constant dense<0.000000e+00> : vector<8x4xf32>
    %33 = tpu.matmul %31, %32, %cst_15 {dimension_numbers = #tpu.dot_dimension_numbers<[1], [0], [0], [1], [0, 0, 1, 1], [], []>} : vector<8x4xf32>, vector<4x4xf32>, vector<8x4xf32> -> vector<8x4xf32>
    %cst_16 = arith.constant dense<0.000000e+00> : vector<8xf32>
    %34 = vector.multi_reduction <add>, %31, %cst_16 [1] : vector<8x4xf32> to vector<8xf32>
    %35 = vector.shape_cast %34 : vector<8xf32> to vector<8x1xf32>
    %cst_17 = arith.constant 1.000000e+00 : f32
    %36 = vector.broadcast %cst_17 : f32 to vector<8x1xf32>
    %37 = arith.divf %36, %35 : vector<8x1xf32>
    %38 = vector.broadcast %37 : vector<8x1xf32> to vector<8x4xf32>
    %39 = arith.mulf %33, %38 : vector<8x4xf32>
    %40 = vector.extract_strided_slice %3 {offsets = [0, 8], sizes = [8, 4], strides = [1, 1]} : vector<8x32xf32> to vector<8x4xf32>
    %41 = vector.extract_strided_slice %5 {offsets = [0, 8], sizes = [4, 4], strides = [1, 1]} : vector<4x32xf32> to vector<4x4xf32>
    %cst_18 = arith.constant dense<0.000000e+00> : vector<8x4xf32>
    %42 = tpu.matmul %40, %41, %cst_18 {dimension_numbers = #tpu.dot_dimension_numbers<[1], [1], [0], [0], [0, 0, 1, 0], [], []>} : vector<8x4xf32>, vector<4x4xf32>, vector<8x4xf32> -> vector<8x4xf32>
    %cst_19 = arith.constant dense<0xFF800000> : vector<8xf32>
    %43 = vector.multi_reduction <maximumf>, %42, %cst_19 [1] : vector<8x4xf32> to vector<8xf32>
    %44 = vector.shape_cast %43 : vector<8xf32> to vector<8x1xf32>
    %45 = vector.broadcast %44 : vector<8x1xf32> to vector<8x4xf32>
    %46 = arith.subf %42, %45 : vector<8x4xf32>
    %47 = math.exp %46 : vector<8x4xf32>
    %48 = vector.extract_strided_slice %7 {offsets = [0, 8], sizes = [4, 4], strides = [1, 1]} : vector<4x32xf32> to vector<4x4xf32>
    %cst_20 = arith.constant dense<0.000000e+00> : vector<8x4xf32>
    %49 = tpu.matmul %47, %48, %cst_20 {dimension_numbers = #tpu.dot_dimension_numbers<[1], [0], [0], [1], [0, 0, 1, 1], [], []>} : vector<8x4xf32>, vector<4x4xf32>, vector<8x4xf32> -> vector<8x4xf32>
    %cst_21 = arith.constant dense<0.000000e+00> : vector<8xf32>
    %50 = vector.multi_reduction <add>, %47, %cst_21 [1] : vector<8x4xf32> to vector<8xf32>
    %51 = vector.shape_cast %50 : vector<8xf32> to vector<8x1xf32>
    %cst_22 = arith.constant 1.000000e+00 : f32
    %52 = vector.broadcast %cst_22 : f32 to vector<8x1xf32>
    %53 = arith.divf %52, %51 : vector<8x1xf32>
    %54 = vector.broadcast %53 : vector<8x1xf32> to vector<8x4xf32>
    %55 = arith.mulf %49, %54 : vector<8x4xf32>
    %56 = vector.extract_strided_slice %3 {offsets = [0, 12], sizes = [8, 4], strides = [1, 1]} : vector<8x32xf32> to vector<8x4xf32>
    %57 = vector.extract_strided_slice %5 {offsets = [0, 12], sizes = [4, 4], strides = [1, 1]} : vector<4x32xf32> to vector<4x4xf32>
    %cst_23 = arith.constant dense<0.000000e+00> : vector<8x4xf32>
    %58 = tpu.matmul %56, %57, %cst_23 {dimension_numbers = #tpu.dot_dimension_numbers<[1], [1], [0], [0], [0, 0, 1, 0], [], []>} : vector<8x4xf32>, vector<4x4xf32>, vector<8x4xf32> -> vector<8x4xf32>
    %cst_24 = arith.constant dense<0xFF800000> : vector<8xf32>
    %59 = vector.multi_reduction <maximumf>, %58, %cst_24 [1] : vector<8x4xf32> to vector<8xf32>
    %60 = vector.shape_cast %59 : vector<8xf32> to vector<8x1xf32>
    %61 = vector.broadcast %60 : vector<8x1xf32> to vector<8x4xf32>
    %62 = arith.subf %58, %61 : vector<8x4xf32>
    %63 = math.exp %62 : vector<8x4xf32>
    %64 = vector.extract_strided_slice %7 {offsets = [0, 12], sizes = [4, 4], strides = [1, 1]} : vector<4x32xf32> to vector<4x4xf32>
    %cst_25 = arith.constant dense<0.000000e+00> : vector<8x4xf32>
    %65 = tpu.matmul %63, %64, %cst_25 {dimension_numbers = #tpu.dot_dimension_numbers<[1], [0], [0], [1], [0, 0, 1, 1], [], []>} : vector<8x4xf32>, vector<4x4xf32>, vector<8x4xf32> -> vector<8x4xf32>
    %cst_26 = arith.constant dense<0.000000e+00> : vector<8xf32>
    %66 = vector.multi_reduction <add>, %63, %cst_26 [1] : vector<8x4xf32> to vector<8xf32>
    %67 = vector.shape_cast %66 : vector<8xf32> to vector<8x1xf32>
    %cst_27 = arith.constant 1.000000e+00 : f32
    %68 = vector.broadcast %cst_27 : f32 to vector<8x1xf32>
    %69 = arith.divf %68, %67 : vector<8x1xf32>
    %70 = vector.broadcast %69 : vector<8x1xf32> to vector<8x4xf32>
    %71 = arith.mulf %65, %70 : vector<8x4xf32>
    %72 = vector.extract_strided_slice %3 {offsets = [0, 16], sizes = [8, 4], strides = [1, 1]} : vector<8x32xf32> to vector<8x4xf32>
    %73 = vector.extract_strided_slice %5 {offsets = [0, 16], sizes = [4, 4], strides = [1, 1]} : vector<4x32xf32> to vector<4x4xf32>
    %cst_28 = arith.constant dense<0.000000e+00> : vector<8x4xf32>
    %74 = tpu.matmul %72, %73, %cst_28 {dimension_numbers = #tpu.dot_dimension_numbers<[1], [1], [0], [0], [0, 0, 1, 0], [], []>} : vector<8x4xf32>, vector<4x4xf32>, vector<8x4xf32> -> vector<8x4xf32>
    %cst_29 = arith.constant dense<0xFF800000> : vector<8xf32>
    %75 = vector.multi_reduction <maximumf>, %74, %cst_29 [1] : vector<8x4xf32> to vector<8xf32>
    %76 = vector.shape_cast %75 : vector<8xf32> to vector<8x1xf32>
    %77 = vector.broadcast %76 : vector<8x1xf32> to vector<8x4xf32>
    %78 = arith.subf %74, %77 : vector<8x4xf32>
    %79 = math.exp %78 : vector<8x4xf32>
    %80 = vector.extract_strided_slice %7 {offsets = [0, 16], sizes = [4, 4], strides = [1, 1]} : vector<4x32xf32> to vector<4x4xf32>
    %cst_30 = arith.constant dense<0.000000e+00> : vector<8x4xf32>
    %81 = tpu.matmul %79, %80, %cst_30 {dimension_numbers = #tpu.dot_dimension_numbers<[1], [0], [0], [1], [0, 0, 1, 1], [], []>} : vector<8x4xf32>, vector<4x4xf32>, vector<8x4xf32> -> vector<8x4xf32>
    %cst_31 = arith.constant dense<0.000000e+00> : vector<8xf32>
    %82 = vector.multi_reduction <add>, %79, %cst_31 [1] : vector<8x4xf32> to vector<8xf32>
    %83 = vector.shape_cast %82 : vector<8xf32> to vector<8x1xf32>
    %cst_32 = arith.constant 1.000000e+00 : f32
    %84 = vector.broadcast %cst_32 : f32 to vector<8x1xf32>
    %85 = arith.divf %84, %83 : vector<8x1xf32>
    %86 = vector.broadcast %85 : vector<8x1xf32> to vector<8x4xf32>
    %87 = arith.mulf %81, %86 : vector<8x4xf32>
    %88 = vector.extract_strided_slice %3 {offsets = [0, 20], sizes = [8, 4], strides = [1, 1]} : vector<8x32xf32> to vector<8x4xf32>
    %89 = vector.extract_strided_slice %5 {offsets = [0, 20], sizes = [4, 4], strides = [1, 1]} : vector<4x32xf32> to vector<4x4xf32>
    %cst_33 = arith.constant dense<0.000000e+00> : vector<8x4xf32>
    %90 = tpu.matmul %88, %89, %cst_33 {dimension_numbers = #tpu.dot_dimension_numbers<[1], [1], [0], [0], [0, 0, 1, 0], [], []>} : vector<8x4xf32>, vector<4x4xf32>, vector<8x4xf32> -> vector<8x4xf32>
    %cst_34 = arith.constant dense<0xFF800000> : vector<8xf32>
    %91 = vector.multi_reduction <maximumf>, %90, %cst_34 [1] : vector<8x4xf32> to vector<8xf32>
    %92 = vector.shape_cast %91 : vector<8xf32> to vector<8x1xf32>
    %93 = vector.broadcast %92 : vector<8x1xf32> to vector<8x4xf32>
    %94 = arith.subf %90, %93 : vector<8x4xf32>
    %95 = math.exp %94 : vector<8x4xf32>
    %96 = vector.extract_strided_slice %7 {offsets = [0, 20], sizes = [4, 4], strides = [1, 1]} : vector<4x32xf32> to vector<4x4xf32>
    %cst_35 = arith.constant dense<0.000000e+00> : vector<8x4xf32>
    %97 = tpu.matmul %95, %96, %cst_35 {dimension_numbers = #tpu.dot_dimension_numbers<[1], [0], [0], [1], [0, 0, 1, 1], [], []>} : vector<8x4xf32>, vector<4x4xf32>, vector<8x4xf32> -> vector<8x4xf32>
    %cst_36 = arith.constant dense<0.000000e+00> : vector<8xf32>
    %98 = vector.multi_reduction <add>, %95, %cst_36 [1] : vector<8x4xf32> to vector<8xf32>
    %99 = vector.shape_cast %98 : vector<8xf32> to vector<8x1xf32>
    %cst_37 = arith.constant 1.000000e+00 : f32
    %100 = vector.broadcast %cst_37 : f32 to vector<8x1xf32>
    %101 = arith.divf %100, %99 : vector<8x1xf32>
    %102 = vector.broadcast %101 : vector<8x1xf32> to vector<8x4xf32>
    %103 = arith.mulf %97, %102 : vector<8x4xf32>
    %104 = vector.extract_strided_slice %3 {offsets = [0, 24], sizes = [8, 4], strides = [1, 1]} : vector<8x32xf32> to vector<8x4xf32>
    %105 = vector.extract_strided_slice %5 {offsets = [0, 24], sizes = [4, 4], strides = [1, 1]} : vector<4x32xf32> to vector<4x4xf32>
    %cst_38 = arith.constant dense<0.000000e+00> : vector<8x4xf32>
    %106 = tpu.matmul %104, %105, %cst_38 {dimension_numbers = #tpu.dot_dimension_numbers<[1], [1], [0], [0], [0, 0, 1, 0], [], []>} : vector<8x4xf32>, vector<4x4xf32>, vector<8x4xf32> -> vector<8x4xf32>
    %cst_39 = arith.constant dense<0xFF800000> : vector<8xf32>
    %107 = vector.multi_reduction <maximumf>, %106, %cst_39 [1] : vector<8x4xf32> to vector<8xf32>
    %108 = vector.shape_cast %107 : vector<8xf32> to vector<8x1xf32>
    %109 = vector.broadcast %108 : vector<8x1xf32> to vector<8x4xf32>
    %110 = arith.subf %106, %109 : vector<8x4xf32>
    %111 = math.exp %110 : vector<8x4xf32>
    %112 = vector.extract_strided_slice %7 {offsets = [0, 24], sizes = [4, 4], strides = [1, 1]} : vector<4x32xf32> to vector<4x4xf32>
    %cst_40 = arith.constant dense<0.000000e+00> : vector<8x4xf32>
    %113 = tpu.matmul %111, %112, %cst_40 {dimension_numbers = #tpu.dot_dimension_numbers<[1], [0], [0], [1], [0, 0, 1, 1], [], []>} : vector<8x4xf32>, vector<4x4xf32>, vector<8x4xf32> -> vector<8x4xf32>
    %cst_41 = arith.constant dense<0.000000e+00> : vector<8xf32>
    %114 = vector.multi_reduction <add>, %111, %cst_41 [1] : vector<8x4xf32> to vector<8xf32>
    %115 = vector.shape_cast %114 : vector<8xf32> to vector<8x1xf32>
    %cst_42 = arith.constant 1.000000e+00 : f32
    %116 = vector.broadcast %cst_42 : f32 to vector<8x1xf32>
    %117 = arith.divf %116, %115 : vector<8x1xf32>
    %118 = vector.broadcast %117 : vector<8x1xf32> to vector<8x4xf32>
    %119 = arith.mulf %113, %118 : vector<8x4xf32>
    %120 = vector.extract_strided_slice %3 {offsets = [0, 28], sizes = [8, 4], strides = [1, 1]} : vector<8x32xf32> to vector<8x4xf32>
    %121 = vector.extract_strided_slice %5 {offsets = [0, 28], sizes = [4, 4], strides = [1, 1]} : vector<4x32xf32> to vector<4x4xf32>
    %cst_43 = arith.constant dense<0.000000e+00> : vector<8x4xf32>
    %122 = tpu.matmul %120, %121, %cst_43 {dimension_numbers = #tpu.dot_dimension_numbers<[1], [1], [0], [0], [0, 0, 1, 0], [], []>} : vector<8x4xf32>, vector<4x4xf32>, vector<8x4xf32> -> vector<8x4xf32>
    %cst_44 = arith.constant dense<0xFF800000> : vector<8xf32>
    %123 = vector.multi_reduction <maximumf>, %122, %cst_44 [1] : vector<8x4xf32> to vector<8xf32>
    %124 = vector.shape_cast %123 : vector<8xf32> to vector<8x1xf32>
    %125 = vector.broadcast %124 : vector<8x1xf32> to vector<8x4xf32>
    %126 = arith.subf %122, %125 : vector<8x4xf32>
    %127 = math.exp %126 : vector<8x4xf32>
    %128 = vector.extract_strided_slice %7 {offsets = [0, 28], sizes = [4, 4], strides = [1, 1]} : vector<4x32xf32> to vector<4x4xf32>
    %cst_45 = arith.constant dense<0.000000e+00> : vector<8x4xf32>
    %129 = tpu.matmul %127, %128, %cst_45 {dimension_numbers = #tpu.dot_dimension_numbers<[1], [0], [0], [1], [0, 0, 1, 1], [], []>} : vector<8x4xf32>, vector<4x4xf32>, vector<8x4xf32> -> vector<8x4xf32>
    %cst_46 = arith.constant dense<0.000000e+00> : vector<8xf32>
    %130 = vector.multi_reduction <add>, %127, %cst_46 [1] : vector<8x4xf32> to vector<8xf32>
    %131 = vector.shape_cast %130 : vector<8xf32> to vector<8x1xf32>
    %cst_47 = arith.constant 1.000000e+00 : f32
    %132 = vector.broadcast %cst_47 : f32 to vector<8x1xf32>
    %133 = arith.divf %132, %131 : vector<8x1xf32>
    %134 = vector.broadcast %133 : vector<8x1xf32> to vector<8x4xf32>
    %135 = arith.mulf %129, %134 : vector<8x4xf32>
    %136 = tpu.concatenate %23, %39, %55, %71, %87, %103, %119, %135 in 1 : vector<8x4xf32>, vector<8x4xf32>, vector<8x4xf32>, vector<8x4xf32>, vector<8x4xf32>, vector<8x4xf32>, vector<8x4xf32>, vector<8x4xf32> -> vector<8x32xf32>
    %c0_48 = arith.constant 0 : index
    %c0_49 = arith.constant 0 : index
    %c0_50 = arith.constant 0 : index
    %137 = vector.load %arg4[%c0_48, %c0_49, %c0_50] : memref<1x8x32xf32, #tpu.memory_space<vmem>>, vector<1x8x32xf32>
    %138 = vector.shape_cast %137 : vector<1x8x32xf32> to vector<8x32xf32>
    %139 = vector.shape_cast %136 : vector<8x32xf32> to vector<1x8x32xf32>
    tpu.vector_store %arg4[%c0_48, %c0_49, %c0_50], %139 {strides = array<i32>} : memref<1x8x32xf32, #tpu.memory_space<vmem>>, vector<1x8x32xf32>,
    return
  }
  func.func @transform_0(%arg0: i32) -> (i32, i32, i32) {
    %c0_i32 = arith.constant 0 : i32
    %c0_i32_0 = arith.constant 0 : i32
    %c0_i32_1 = arith.constant 0 : i32
    return %arg0, %c0_i32, %c0_i32_0 : i32, i32, i32
  }
  func.func @transform_1(%arg0: i32) -> (i32, i32, i32) {
    %c0_i32 = arith.constant 0 : i32
    %c0_i32_0 = arith.constant 0 : i32
    %c0_i32_1 = arith.constant 0 : i32
    return %arg0, %c0_i32, %c0_i32_0 : i32, i32, i32
  }
  func.func @transform_2(%arg0: i32) -> (i32, i32, i32) {
    %c0_i32 = arith.constant 0 : i32
    %c0_i32_0 = arith.constant 0 : i32
    %c0_i32_1 = arith.constant 0 : i32
    return %arg0, %c0_i32, %c0_i32_0 : i32, i32, i32
  }
  func.func @transform_3(%arg0: i32) -> (i32, i32, i32) {
    %c0_i32 = arith.constant 0 : i32
    %c0_i32_0 = arith.constant 0 : i32
    %c0_i32_1 = arith.constant 0 : i32
    return %arg0, %c0_i32, %c0_i32_0 : i32, i32, i32
  }
}

module attributes {stable_mosaic.version = 11 : i64} {
  func.func @_proj_add_ln_kernel(%arg0: i32, %arg1: memref<16x32xf32, #tpu.memory_space<vmem>>, %arg2: memref<32x32xf32, #tpu.memory_space<vmem>>, %arg3: memref<1x32xf32, #tpu.memory_space<vmem>>, %arg4: memref<16x32xf32, #tpu.memory_space<vmem>>, %arg5: memref<1x32xf32, #tpu.memory_space<vmem>>, %arg6: memref<1x32xf32, #tpu.memory_space<vmem>>, %arg7: memref<16x32xf32, #tpu.memory_space<vmem>>) attributes {dimension_semantics = [#tpu.dimension_semantics<parallel>], iteration_bounds = array<i64: 1>, scalar_prefetch = 0 : i64, scratch_operands = 0 : i64, tpu.core_type = #tpu.core_type<tc>, window_params = [{transform_indices = @transform_0, window_bounds = array<i64: 16, 32>}, {pipeline_mode = #tpu.pipeline_mode<synchronous>, transform_indices = @transform_1, window_bounds = array<i64: 32, 32>}, {pipeline_mode = #tpu.pipeline_mode<synchronous>, transform_indices = @transform_2, window_bounds = array<i64: 1, 32>}, {transform_indices = @transform_3, window_bounds = array<i64: 16, 32>}, {pipeline_mode = #tpu.pipeline_mode<synchronous>, transform_indices = @transform_4, window_bounds = array<i64: 1, 32>}, {pipeline_mode = #tpu.pipeline_mode<synchronous>, transform_indices = @transform_5, window_bounds = array<i64: 1, 32>}, {transform_indices = @transform_6, window_bounds = array<i64: 16, 32>}]} {
    %c0 = arith.constant 0 : index
    %c0_0 = arith.constant 0 : index
    %0 = vector.load %arg1[%c0, %c0_0] : memref<16x32xf32, #tpu.memory_space<vmem>>, vector<16x32xf32>
    %c0_1 = arith.constant 0 : index
    %c0_2 = arith.constant 0 : index
    %1 = vector.load %arg2[%c0_1, %c0_2] : memref<32x32xf32, #tpu.memory_space<vmem>>, vector<32x32xf32>
    %cst = arith.constant dense<0.000000e+00> : vector<16x32xf32>
    %2 = tpu.matmul %0, %1, %cst {dimension_numbers = #tpu.dot_dimension_numbers<[1], [0], [0], [1], [0, 0, 1, 1], [], []>} : vector<16x32xf32>, vector<32x32xf32>, vector<16x32xf32> -> vector<16x32xf32>
    %c0_3 = arith.constant 0 : index
    %c0_4 = arith.constant 0 : index
    %3 = vector.load %arg3[%c0_3, %c0_4] : memref<1x32xf32, #tpu.memory_space<vmem>>, vector<1x32xf32>
    %4 = vector.broadcast %3 : vector<1x32xf32> to vector<16x32xf32>
    %5 = arith.addf %2, %4 : vector<16x32xf32>
    %c0_5 = arith.constant 0 : index
    %c0_6 = arith.constant 0 : index
    %6 = vector.load %arg4[%c0_5, %c0_6] : memref<16x32xf32, #tpu.memory_space<vmem>>, vector<16x32xf32>
    %7 = arith.addf %6, %5 : vector<16x32xf32>
    %cst_7 = arith.constant dense<0.000000e+00> : vector<16xf32>
    %8 = vector.multi_reduction <add>, %7, %cst_7 [1] : vector<16x32xf32> to vector<16xf32>
    %9 = vector.shape_cast %8 : vector<16xf32> to vector<16x1xf32>
    %cst_8 = arith.constant 3.200000e+01 : f32
    %10 = vector.broadcast %cst_8 : f32 to vector<16x1xf32>
    %11 = arith.divf %9, %10 : vector<16x1xf32>
    %12 = vector.broadcast %11 : vector<16x1xf32> to vector<16x32xf32>
    %13 = arith.subf %7, %12 : vector<16x32xf32>
    %14 = arith.mulf %13, %13 : vector<16x32xf32>
    %cst_9 = arith.constant dense<0.000000e+00> : vector<16xf32>
    %15 = vector.multi_reduction <add>, %14, %cst_9 [1] : vector<16x32xf32> to vector<16xf32>
    %16 = vector.shape_cast %15 : vector<16xf32> to vector<16x1xf32>
    %cst_10 = arith.constant 3.200000e+01 : f32
    %17 = vector.broadcast %cst_10 : f32 to vector<16x1xf32>
    %18 = arith.divf %16, %17 : vector<16x1xf32>
    %19 = vector.broadcast %11 : vector<16x1xf32> to vector<16x32xf32>
    %20 = arith.subf %7, %19 : vector<16x32xf32>
    %cst_11 = arith.constant 9.99999974E-6 : f32
    %21 = vector.broadcast %cst_11 : f32 to vector<16x1xf32>
    %22 = arith.addf %18, %21 : vector<16x1xf32>
    %23 = math.rsqrt %22 : vector<16x1xf32>
    %24 = vector.broadcast %23 : vector<16x1xf32> to vector<16x32xf32>
    %25 = arith.mulf %20, %24 : vector<16x32xf32>
    %c0_12 = arith.constant 0 : index
    %c0_13 = arith.constant 0 : index
    %26 = vector.load %arg5[%c0_12, %c0_13] : memref<1x32xf32, #tpu.memory_space<vmem>>, vector<1x32xf32>
    %27 = vector.broadcast %26 : vector<1x32xf32> to vector<16x32xf32>
    %28 = arith.mulf %25, %27 : vector<16x32xf32>
    %c0_14 = arith.constant 0 : index
    %c0_15 = arith.constant 0 : index
    %29 = vector.load %arg6[%c0_14, %c0_15] : memref<1x32xf32, #tpu.memory_space<vmem>>, vector<1x32xf32>
    %30 = vector.broadcast %29 : vector<1x32xf32> to vector<16x32xf32>
    %31 = arith.addf %28, %30 : vector<16x32xf32>
    %c0_16 = arith.constant 0 : index
    %c0_17 = arith.constant 0 : index
    %32 = vector.load %arg7[%c0_16, %c0_17] : memref<16x32xf32, #tpu.memory_space<vmem>>, vector<16x32xf32>
    tpu.vector_store %arg7[%c0_16, %c0_17], %31 {strides = array<i32>} : memref<16x32xf32, #tpu.memory_space<vmem>>, vector<16x32xf32>,
    return
  }
  func.func @transform_0(%arg0: i32) -> (i32, i32) {
    %c0_i32 = arith.constant 0 : i32
    %c0_i32_0 = arith.constant 0 : i32
    return %arg0, %c0_i32 : i32, i32
  }
  func.func @transform_1(%arg0: i32) -> (i32, i32) {
    %c0_i32 = arith.constant 0 : i32
    %c0_i32_0 = arith.constant 0 : i32
    %c0_i32_1 = arith.constant 0 : i32
    return %c0_i32, %c0_i32_0 : i32, i32
  }
  func.func @transform_2(%arg0: i32) -> (i32, i32) {
    %c0_i32 = arith.constant 0 : i32
    %c0_i32_0 = arith.constant 0 : i32
    %c0_i32_1 = arith.constant 0 : i32
    return %c0_i32, %c0_i32_0 : i32, i32
  }
  func.func @transform_3(%arg0: i32) -> (i32, i32) {
    %c0_i32 = arith.constant 0 : i32
    %c0_i32_0 = arith.constant 0 : i32
    return %arg0, %c0_i32 : i32, i32
  }
  func.func @transform_4(%arg0: i32) -> (i32, i32) {
    %c0_i32 = arith.constant 0 : i32
    %c0_i32_0 = arith.constant 0 : i32
    %c0_i32_1 = arith.constant 0 : i32
    return %c0_i32, %c0_i32_0 : i32, i32
  }
  func.func @transform_5(%arg0: i32) -> (i32, i32) {
    %c0_i32 = arith.constant 0 : i32
    %c0_i32_0 = arith.constant 0 : i32
    %c0_i32_1 = arith.constant 0 : i32
    return %c0_i32, %c0_i32_0 : i32, i32
  }
  func.func @transform_6(%arg0: i32) -> (i32, i32) {
    %c0_i32 = arith.constant 0 : i32
    %c0_i32_0 = arith.constant 0 : i32
    return %arg0, %c0_i32 : i32, i32
  }
}

module attributes {stable_mosaic.version = 11 : i64} {
  func.func @_mlp_add_ln_kernel(%arg0: i32, %arg1: memref<16x32xf32, #tpu.memory_space<vmem>>, %arg2: memref<32x64xf32, #tpu.memory_space<vmem>>, %arg3: memref<1x64xf32, #tpu.memory_space<vmem>>, %arg4: memref<64x32xf32, #tpu.memory_space<vmem>>, %arg5: memref<1x32xf32, #tpu.memory_space<vmem>>, %arg6: memref<1x32xf32, #tpu.memory_space<vmem>>, %arg7: memref<1x32xf32, #tpu.memory_space<vmem>>, %arg8: memref<16x32xf32, #tpu.memory_space<vmem>>) attributes {dimension_semantics = [#tpu.dimension_semantics<parallel>], iteration_bounds = array<i64: 1>, scalar_prefetch = 0 : i64, scratch_operands = 0 : i64, tpu.core_type = #tpu.core_type<tc>, window_params = [{transform_indices = @transform_0, window_bounds = array<i64: 16, 32>}, {pipeline_mode = #tpu.pipeline_mode<synchronous>, transform_indices = @transform_1, window_bounds = array<i64: 32, 64>}, {pipeline_mode = #tpu.pipeline_mode<synchronous>, transform_indices = @transform_2, window_bounds = array<i64: 1, 64>}, {pipeline_mode = #tpu.pipeline_mode<synchronous>, transform_indices = @transform_3, window_bounds = array<i64: 64, 32>}, {pipeline_mode = #tpu.pipeline_mode<synchronous>, transform_indices = @transform_4, window_bounds = array<i64: 1, 32>}, {pipeline_mode = #tpu.pipeline_mode<synchronous>, transform_indices = @transform_5, window_bounds = array<i64: 1, 32>}, {pipeline_mode = #tpu.pipeline_mode<synchronous>, transform_indices = @transform_6, window_bounds = array<i64: 1, 32>}, {transform_indices = @transform_7, window_bounds = array<i64: 16, 32>}]} {
    %c0 = arith.constant 0 : index
    %c0_0 = arith.constant 0 : index
    %0 = vector.load %arg1[%c0, %c0_0] : memref<16x32xf32, #tpu.memory_space<vmem>>, vector<16x32xf32>
    %c0_1 = arith.constant 0 : index
    %c0_2 = arith.constant 0 : index
    %1 = vector.load %arg2[%c0_1, %c0_2] : memref<32x64xf32, #tpu.memory_space<vmem>>, vector<32x64xf32>
    %cst = arith.constant dense<0.000000e+00> : vector<16x64xf32>
    %2 = tpu.matmul %0, %1, %cst {dimension_numbers = #tpu.dot_dimension_numbers<[1], [0], [0], [1], [0, 0, 1, 1], [], []>} : vector<16x32xf32>, vector<32x64xf32>, vector<16x64xf32> -> vector<16x64xf32>
    %c0_3 = arith.constant 0 : index
    %c0_4 = arith.constant 0 : index
    %3 = vector.load %arg3[%c0_3, %c0_4] : memref<1x64xf32, #tpu.memory_space<vmem>>, vector<1x64xf32>
    %4 = vector.broadcast %3 : vector<1x64xf32> to vector<16x64xf32>
    %5 = arith.addf %2, %4 : vector<16x64xf32>
    %cst_5 = arith.constant 5.000000e-01 : f32
    %6 = vector.broadcast %cst_5 : f32 to vector<16x64xf32>
    %7 = arith.mulf %6, %5 : vector<16x64xf32>
    %cst_6 = arith.constant 0.707106769 : f32
    %8 = vector.broadcast %cst_6 : f32 to vector<16x64xf32>
    %9 = arith.mulf %5, %8 : vector<16x64xf32>
    %10 = math.erf %9 : vector<16x64xf32>
    %cst_7 = arith.constant 1.000000e+00 : f32
    %11 = vector.broadcast %cst_7 : f32 to vector<16x64xf32>
    %12 = arith.addf %11, %10 : vector<16x64xf32>
    %13 = arith.mulf %7, %12 : vector<16x64xf32>
    %c0_8 = arith.constant 0 : index
    %c0_9 = arith.constant 0 : index
    %14 = vector.load %arg4[%c0_8, %c0_9] : memref<64x32xf32, #tpu.memory_space<vmem>>, vector<64x32xf32>
    %cst_10 = arith.constant dense<0.000000e+00> : vector<16x32xf32>
    %15 = tpu.matmul %13, %14, %cst_10 {dimension_numbers = #tpu.dot_dimension_numbers<[1], [0], [0], [1], [0, 0, 1, 1], [], []>} : vector<16x64xf32>, vector<64x32xf32>, vector<16x32xf32> -> vector<16x32xf32>
    %c0_11 = arith.constant 0 : index
    %c0_12 = arith.constant 0 : index
    %16 = vector.load %arg5[%c0_11, %c0_12] : memref<1x32xf32, #tpu.memory_space<vmem>>, vector<1x32xf32>
    %17 = vector.broadcast %16 : vector<1x32xf32> to vector<16x32xf32>
    %18 = arith.addf %15, %17 : vector<16x32xf32>
    %19 = arith.addf %0, %18 : vector<16x32xf32>
    %cst_13 = arith.constant dense<0.000000e+00> : vector<16xf32>
    %20 = vector.multi_reduction <add>, %19, %cst_13 [1] : vector<16x32xf32> to vector<16xf32>
    %21 = vector.shape_cast %20 : vector<16xf32> to vector<16x1xf32>
    %cst_14 = arith.constant 3.200000e+01 : f32
    %22 = vector.broadcast %cst_14 : f32 to vector<16x1xf32>
    %23 = arith.divf %21, %22 : vector<16x1xf32>
    %24 = vector.broadcast %23 : vector<16x1xf32> to vector<16x32xf32>
    %25 = arith.subf %19, %24 : vector<16x32xf32>
    %26 = arith.mulf %25, %25 : vector<16x32xf32>
    %cst_15 = arith.constant dense<0.000000e+00> : vector<16xf32>
    %27 = vector.multi_reduction <add>, %26, %cst_15 [1] : vector<16x32xf32> to vector<16xf32>
    %28 = vector.shape_cast %27 : vector<16xf32> to vector<16x1xf32>
    %cst_16 = arith.constant 3.200000e+01 : f32
    %29 = vector.broadcast %cst_16 : f32 to vector<16x1xf32>
    %30 = arith.divf %28, %29 : vector<16x1xf32>
    %31 = vector.broadcast %23 : vector<16x1xf32> to vector<16x32xf32>
    %32 = arith.subf %19, %31 : vector<16x32xf32>
    %cst_17 = arith.constant 9.99999974E-6 : f32
    %33 = vector.broadcast %cst_17 : f32 to vector<16x1xf32>
    %34 = arith.addf %30, %33 : vector<16x1xf32>
    %35 = math.rsqrt %34 : vector<16x1xf32>
    %36 = vector.broadcast %35 : vector<16x1xf32> to vector<16x32xf32>
    %37 = arith.mulf %32, %36 : vector<16x32xf32>
    %c0_18 = arith.constant 0 : index
    %c0_19 = arith.constant 0 : index
    %38 = vector.load %arg6[%c0_18, %c0_19] : memref<1x32xf32, #tpu.memory_space<vmem>>, vector<1x32xf32>
    %39 = vector.broadcast %38 : vector<1x32xf32> to vector<16x32xf32>
    %40 = arith.mulf %37, %39 : vector<16x32xf32>
    %c0_20 = arith.constant 0 : index
    %c0_21 = arith.constant 0 : index
    %41 = vector.load %arg7[%c0_20, %c0_21] : memref<1x32xf32, #tpu.memory_space<vmem>>, vector<1x32xf32>
    %42 = vector.broadcast %41 : vector<1x32xf32> to vector<16x32xf32>
    %43 = arith.addf %40, %42 : vector<16x32xf32>
    %c0_22 = arith.constant 0 : index
    %c0_23 = arith.constant 0 : index
    %44 = vector.load %arg8[%c0_22, %c0_23] : memref<16x32xf32, #tpu.memory_space<vmem>>, vector<16x32xf32>
    tpu.vector_store %arg8[%c0_22, %c0_23], %43 {strides = array<i32>} : memref<16x32xf32, #tpu.memory_space<vmem>>, vector<16x32xf32>,
    return
  }
  func.func @transform_0(%arg0: i32) -> (i32, i32) {
    %c0_i32 = arith.constant 0 : i32
    %c0_i32_0 = arith.constant 0 : i32
    return %arg0, %c0_i32 : i32, i32
  }
  func.func @transform_1(%arg0: i32) -> (i32, i32) {
    %c0_i32 = arith.constant 0 : i32
    %c0_i32_0 = arith.constant 0 : i32
    %c0_i32_1 = arith.constant 0 : i32
    return %c0_i32, %c0_i32_0 : i32, i32
  }
  func.func @transform_2(%arg0: i32) -> (i32, i32) {
    %c0_i32 = arith.constant 0 : i32
    %c0_i32_0 = arith.constant 0 : i32
    %c0_i32_1 = arith.constant 0 : i32
    return %c0_i32, %c0_i32_0 : i32, i32
  }
  func.func @transform_3(%arg0: i32) -> (i32, i32) {
    %c0_i32 = arith.constant 0 : i32
    %c0_i32_0 = arith.constant 0 : i32
    %c0_i32_1 = arith.constant 0 : i32
    return %c0_i32, %c0_i32_0 : i32, i32
  }
  func.func @transform_4(%arg0: i32) -> (i32, i32) {
    %c0_i32 = arith.constant 0 : i32
    %c0_i32_0 = arith.constant 0 : i32
    %c0_i32_1 = arith.constant 0 : i32
    return %c0_i32, %c0_i32_0 : i32, i32
  }
  func.func @transform_5(%arg0: i32) -> (i32, i32) {
    %c0_i32 = arith.constant 0 : i32
    %c0_i32_0 = arith.constant 0 : i32
    %c0_i32_1 = arith.constant 0 : i32
    return %c0_i32, %c0_i32_0 : i32, i32
  }
  func.func @transform_6(%arg0: i32) -> (i32, i32) {
    %c0_i32 = arith.constant 0 : i32
    %c0_i32_0 = arith.constant 0 : i32
    %c0_i32_1 = arith.constant 0 : i32
    return %c0_i32, %c0_i32_0 : i32, i32
  }
  func.func @transform_7(%arg0: i32) -> (i32, i32) {
    %c0_i32 = arith.constant 0 : i32
    %c0_i32_0 = arith.constant 0 : i32
    return %arg0, %c0_i32 : i32, i32
  }
}

</mosaic_0001>

<bundles_post_ra>
// kernel: luna_transformer_block.10
= control target key start
LH: loop header
LB: loop body
LE: loop exit
PB: predicated region body
PF: predicated region fallthrough
CT: control target
= control target key end

     0   :  { %v233_v0 = vmov 0.0   ;;  %vm234_vm0 = vmmov 0   ;;  %vm32_vm1 = vcmask 261120   ;;  %s306_s1 = inlined_call_operand.vmem [shape: f32[32,32], index: 1, kind: input, shape index: {}]   ;;  %s307_s3 = inlined_call_operand.vmem [shape: f32[32,32], index: 3, kind: input, shape index: {}]   ;;  %s308_s0 = inlined_call_operand.vmem [shape: f32[8,32], index: 0, kind: input, shape index: {}]   ;;  %s309_s2 = inlined_call_operand.vmem [shape: f32[1,32], index: 2, kind: input, shape index: {}]   ;;  %s310_s4 = inlined_call_operand.vmem [shape: f32[1,32], index: 4, kind: input, shape index: {}]   ;;  %s311_s5 = inlined_call_operand.vmem [shape: f32[8,32], index: 5, kind: output, shape index: {}]  }
   0x1   :  { %209 = vmatprep.subr.mxu0 %v233_v0  ;;  %v24_v1 = vld [vmem:[%s306_s1 + $0x18] sm:$0xff]  ;;  %v23_v2 = vld [vmem:[%s306_s1 + $0x10] sm:$0xff]  ;;  %217 = vmatprep.mubr.msk.f32.mxu0 %vm234_vm0, %v233_v0  ;;  %v22_v4 = vld [vmem:[%s306_s1 + $0x8] sm:$0xff] }
   0x2   :  { %210 = vmatpush3.msra.mxu0 %v24_v1  ;;  %220 = vmatprep.subr.mxu1 %v233_v0  ;;  %v109_v3 = vld [vmem:[%s307_s3 + $0x18] sm:$0xff]  ;;  %v108_v5 = vld [vmem:[%s307_s3 + $0x10] sm:$0xff]  ;;  %v21_v6 = vld [vmem:[%s306_s1] sm:$0xff] }
   0x3   :  { %211 = vmatprep.subr.mxu0 %v233_v0  ;;  %221 = vmatpush3.msra.mxu1 %v109_v3  ;;  %v20_v7 = vld [vmem:[%s308_s0] sm:$0xff]  ;;  %v107_v8 = vld [vmem:[%s307_s3 + $0x8] sm:$0xff] }
   0x4   :  { %212 = vmatpush3.msra.mxu0 %v23_v2  ;;  %222 = vmatprep.subr.mxu1 %v233_v0  ;;  %v106_v9 = vld [vmem:[%s307_s3] sm:$0xff] }
   0x5   :  { %213 = vmatprep.subr.mxu0 %v233_v0  ;;  %223 = vmatpush3.msra.mxu1 %v108_v5  ;;  %v195_v10 = vld [vmem:[%s309_s2] ss:$0 sm:$0xff] }
   0x6   :  { %214 = vmatpush3.msra.mxu0 %v22_v4  ;;  %224 = vmatprep.subr.mxu1 %v233_v0  ;;  %v197_v14 = vld [vmem:[%s310_s4] ss:$0 sm:$0xff] }
   0x7   :  { %215 = vmatprep.subr.mxu0 %v233_v0  ;;  %228 = vmatprep.mubr.msk.f32.mxu1 %vm234_vm0, %v233_v0 }
   0x8   :  { %216 = vmatpush3.msra.mxu0 %v21_v6  ;;  %225 = vmatpush3.msra.mxu1 %v107_v8 }
   0x9   :  { %218 = vmatmul.mubr.msk.f32.vlgmr.msra.gmra.mxu0 %vm32_vm1, %v20_v7  ;;  %226 = vmatprep.subr.mxu1 %v233_v0 }
   0xa   :  { %227 = vmatpush3.msra.mxu1 %v106_v9 }
  0xc9   :  { %v102_v11 = vpop.f32.mrf.mxu0 }
  0xca   :  { %v103_v12 = vadd.f32 %v195_v10, %v102_v11 }
  0xcb   :  { %v219_v13 = vpop.f32.mrf.mxu0 }
  0xcc   :  { %229 = vmatmul.mubr.msk.f32.vlgmr.msra.gmra.mxu1 %vm32_vm1, %v103_v12 }
 0x18c   :  { %v186_v15 = vpop.f32.mrf.mxu1 }
 0x18d   :  { %v187_v16 = vadd.f32 %v197_v14, %v186_v15 }
 0x18e   :  { %v230_v17 = vpop.f32.mrf.mxu1 }
 0x18f   :  { %190 = vst.msk [vmem:[%s311_s5] sm:$0xff] %vm32_vm1, %v187_v16 }

// kernel: luna_transformer_block.11
= control target key start
LH: loop header
LB: loop body
LE: loop exit
PB: predicated region body
PF: predicated region fallthrough
CT: control target
= control target key end

     0   :  { %vm35_vm0 = vcmask 261120   ;;  %s346_s1 = inlined_call_operand.vmem [shape: f32[32,32], index: 1, kind: input, shape index: {}]   ;;  %s347_s3 = inlined_call_operand.vmem [shape: f32[32,32], index: 3, kind: input, shape index: {}]   ;;  %s348_s0 = inlined_call_operand.vmem [shape: f32[16,32], index: 0, kind: input, shape index: {}]   ;;  %s349_s2 = inlined_call_operand.vmem [shape: f32[1,32], index: 2, kind: input, shape index: {}]   ;;  %s350_s4 = inlined_call_operand.vmem [shape: f32[1,32], index: 4, kind: input, shape index: {}]   ;;  %s351_s5 = inlined_call_operand.vmem [shape: f32[16,32], index: 5, kind: output, shape index: {0}]   ;;  %s352_s6 = inlined_call_operand.vmem [shape: f32[16,32], index: 6, kind: output, shape index: {1}]  }
   0x1   :  { %v27_v0 = vld [vmem:[%s346_s1 + $0x18] sm:$0xff]  ;;  %v26_v2 = vld [vmem:[%s346_s1 + $0x10] sm:$0xff]  ;;  %v25_v4 = vld [vmem:[%s346_s1 + $0x8] sm:$0xff] }
   0x2   :  { %v122_v1 = vld [vmem:[%s347_s3 + $0x18] sm:$0xff]  ;;  %233 = vmatprep.subr.mxu0 %v27_v0  ;;  %v121_v3 = vld [vmem:[%s347_s3 + $0x10] sm:$0xff]  ;;  %v120_v5 = vld [vmem:[%s347_s3 + $0x8] sm:$0xff] }
   0x3   :  { %244 = vmatprep.subr.mxu1 %v122_v1  ;;  %234 = vmatpush3.msra.mxu0 %v27_v0  ;;  %v24_v6 = vld [vmem:[%s346_s1] sm:$0xff]  ;;  %v23_v9 = vld [vmem:[%s348_s0 + $0x8] sm:$0xff] }
   0x4   :  { %245 = vmatpush3.msra.mxu1 %v122_v1  ;;  %235 = vmatprep.subr.mxu0 %v26_v2  ;;  %v119_v7 = vld [vmem:[%s347_s3] sm:$0xff] }
   0x5   :  { %246 = vmatprep.subr.mxu1 %v121_v3  ;;  %236 = vmatpush3.msra.mxu0 %v26_v2  ;;  %v22_v8 = vld [vmem:[%s348_s0] sm:$0xff] }
   0x6   :  { %247 = vmatpush3.msra.mxu1 %v121_v3  ;;  %237 = vmatprep.subr.mxu0 %v25_v4  ;;  %v215_v10 = vld [vmem:[%s349_s2] ss:$0 sm:$0xff] }
   0x7   :  { %248 = vmatprep.subr.mxu1 %v120_v5  ;;  %238 = vmatpush3.msra.mxu0 %v25_v4  ;;  %v218_v11 = vld [vmem:[%s350_s4] ss:$0 sm:$0xff] }
   0x8   :  { %249 = vmatpush3.msra.mxu1 %v120_v5  ;;  %239 = vmatprep.subr.mxu0 %v24_v6 }
   0x9   :  { %250 = vmatprep.subr.mxu1 %v119_v7  ;;  %240 = vmatpush3.msra.mxu0 %v24_v6 }
   0xa   :  { %241 = vmatprep.mubr.msk.f32.mxu0 %vm35_vm0, %v22_v8  ;;  %251 = vmatpush3.msra.mxu1 %v119_v7 }
   0xb   :  { %252 = vmatprep.mubr.msk.f32.mxu1 %vm35_vm0, %v22_v8  ;;  %242 = vmatmul.mubr.msk.f32.vlgmr.msra.gmra.mxu0 %vm35_vm0, %v23_v9 }
   0xc   :  { %253 = vmatmul.mubr.msk.f32.vlgmr.msra.gmra.mxu1 %vm35_vm0, %v23_v9 }
  0xcb   :  { %v243_v12 = vpop.f32.mrf.mxu0 }
  0xcc   :  { %v254_v13 = vpop.f32.mrf.mxu1  ;;  %v114_v14 = vadd.f32 %v243_v12, %v215_v10 }
  0xcd   :  { %v202_v15 = vadd.f32 %v254_v13, %v218_v11  ;;  %v108_v16 = vpop.f32.mrf.mxu0 }
  0xce   :  { %v196_v17 = vpop.f32.mrf.mxu1  ;;  %118 = vst.msk [vmem:[%s351_s5 + $0x8] sm:$0xff] %vm35_vm0, %v114_v14  ;;  %v109_v18 = vadd.f32 %v215_v10, %v108_v16 }
  0xcf   :  { %206 = vst.msk [vmem:[%s352_s6 + $0x8] sm:$0xff] %vm35_vm0, %v202_v15  ;;  %v197_v19 = vadd.f32 %v218_v11, %v196_v17 }
  0xd0   :  { %117 = vst.msk [vmem:[%s351_s5] sm:$0xff] %vm35_vm0, %v109_v18 }
  0xd1   :  { %205 = vst.msk [vmem:[%s352_s6] sm:$0xff] %vm35_vm0, %v197_v19 }

// kernel: luna_transformer_block.9
= control target key start
LH: loop header
LB: loop body
LE: loop exit
PB: predicated region body
PF: predicated region fallthrough
CT: control target
= control target key end

     0   :  { %14 = vsyncpa [#allocation3], 0  ;;  %s413_s27 = smov [#allocation2]   ;;  %s525_s0 = inlined_call_operand.vmem [shape: f32[16,32], index: 0, kind: input, shape index: {}]   ;;  %s526_s1 = inlined_call_operand.vmem [shape: f32[32,32], index: 1, kind: input, shape index: {}]   ;;  %s527_s2 = inlined_call_operand.vmem [shape: f32[1,32], index: 2, kind: input, shape index: {}]   ;;  %s528_s3 = inlined_call_operand.vmem [shape: f32[32,32], index: 3, kind: input, shape index: {}]   ;;  %s529_s4 = inlined_call_operand.vmem [shape: f32[1,32], index: 4, kind: input, shape index: {}]   ;;  %s530_s5 = inlined_call_operand.hbm [shape: f32[32,32], index: 5, kind: input, shape index: {}]   ;;  %s531_s6 = inlined_call_operand.vmem [shape: f32[1,32], index: 6, kind: input, shape index: {}]   ;;  %s532_s7 = inlined_call_operand.vmem [shape: f32[16,32], index: 7, kind: output, shape index: {0}]   ;;  %s533_s8 = inlined_call_operand.vmem [shape: f32[16,32], index: 8, kind: output, shape index: {1}]  }
   0x1   :  { %s30_s28 = sshll.u32 %s413_s27, 4  ;;  %s31_s28 = int_to_ptr.vmem [resolvable:$true] %s30_s28 }
   0x2   :  { %s399_s29 = scalar_lea.vmem %s31_s28, 512  ;;  %p404_p1 = scmp.lt.s32.totalorder %s31_s28, %s31_s28 }
   0x3   :  { %p400_p0 = scmp.ne.s32.totalorder %s31_s28, %s399_s29  ;;  %p405_p2 = scmp.lt.s32.totalorder %s399_s29, %s399_s29 }
   0x5   :  { %p406_p3 = por %p405_p2, %p404_p1 }
   0x7   :  { %p407_p4 = pnand %p406_p3, %p400_p0 }
   0x9   :  { %410 = shalt.err (!%p407_p4)
}
   0xa   :  { %s414_s30 = smov 128   ;;  %s415_s9 = smov 8  }
   0xb   :  { %36 = dma.hbm_to_vmem [thread:$0]  %s530_s5, 512, %s31_s28, [#allocation3], %s414_s30, %s414_s30, %s415_s9  }
   0xc   :  { %411 = dma.done.wait [#allocation3], 512  }
   0xd   :  { %412 = vsyncadd [#allocation3], 4294966784  ;;  %vm55_vm0 = vcmask 261120   ;;  %v142_v0 = vld [vmem:[%s526_s1 + $0x18] sm:$0xff]  ;;  %v141_v1 = vld [vmem:[%s526_s1 + $0x10] sm:$0xff] }
   0xe   :  { %366 = vmatprep.subr.mxu1 %v142_v0  ;;  %v42_v2 = vld [vmem:[%s525_s0] sm:$0xff]  ;;  %v140_v3 = vld [vmem:[%s526_s1 + $0x8] sm:$0xff]  ;;  %v47_v4 = vld [vmem:[#allocation2 + $0x18] sm:$0xff] }
   0xf   :  { %367 = vmatpush3.msra.mxu1 %v142_v0  ;;  %374 = vmatprep.mubr.msk.f32.mxu1 %vm55_vm0, %v42_v2  ;;  %v46_v5 = vld [vmem:[#allocation2 + $0x10] sm:$0xff]  ;;  %v139_v6 = vld [vmem:[%s526_s1] sm:$0xff]  ;;  %v45_v7 = vld [vmem:[#allocation2 + $0x8] sm:$0xff] }
  0x10   :  { %368 = vmatprep.subr.mxu1 %v141_v1  ;;  %355 = vmatprep.subr.mxu0 %v47_v4  ;;  %v43_v8 = vld [vmem:[%s525_s0 + $0x8] sm:$0xff]  ;;  %v44_v9 = vld [vmem:[#allocation2] sm:$0xff]  ;;  %v228_v10 = vld [vmem:[%s528_s3 + $0x18] sm:$0xff] }
  0x11   :  { %369 = vmatpush3.msra.mxu1 %v141_v1  ;;  %356 = vmatpush3.msra.mxu0 %v47_v4  ;;  %v227_v11 = vld [vmem:[%s528_s3 + $0x10] sm:$0xff]  ;;  %v226_v12 = vld [vmem:[%s528_s3 + $0x8] sm:$0xff]  ;;  %v225_v13 = vld [vmem:[%s528_s3] sm:$0xff] }
  0x12   :  { %370 = vmatprep.subr.mxu1 %v140_v3  ;;  %357 = vmatprep.subr.mxu0 %v46_v5  ;;  %v328_v15 = vld [vmem:[%s531_s6] ss:$0 sm:$0xff] }
  0x13   :  { %371 = vmatpush3.msra.mxu1 %v140_v3  ;;  %358 = vmatpush3.msra.mxu0 %v46_v5  ;;  %v331_v16 = vld [vmem:[%s527_s2] ss:$0 sm:$0xff] }
  0x14   :  { %372 = vmatprep.subr.mxu1 %v139_v6  ;;  %359 = vmatprep.subr.mxu0 %v45_v7  ;;  %v334_v24 = vld [vmem:[%s529_s4] ss:$0 sm:$0xff] }
  0x15   :  { %373 = vmatpush3.msra.mxu1 %v139_v6  ;;  %360 = vmatpush3.msra.mxu0 %v45_v7 }
  0x16   :  { %375 = vmatmul.mubr.msk.f32.vlgmr.msra.gmra.mxu1 %vm55_vm0, %v43_v8  ;;  %361 = vmatprep.subr.mxu0 %v44_v9 }
  0x17   :  { %362 = vmatpush3.msra.mxu0 %v44_v9  ;;  %363 = vmatprep.mubr.msk.f32.mxu0 %vm55_vm0, %v42_v2 }
  0x18   :  { %364 = vmatmul.mubr.msk.f32.vlgmr.msra.gmra.mxu0 %vm55_vm0, %v43_v8  ;;  %377 = vmatprep.subr.mxu0 %v228_v10 }
  0x19   :  { %378 = vmatpush3.msra.mxu0 %v228_v10 }
  0x1a   :  { %379 = vmatprep.subr.mxu0 %v227_v11 }
  0x1b   :  { %380 = vmatpush3.msra.mxu0 %v227_v11 }
  0x1c   :  { %381 = vmatprep.subr.mxu0 %v226_v12 }
  0x1d   :  { %382 = vmatpush3.msra.mxu0 %v226_v12 }
  0x1e   :  { %383 = vmatprep.subr.mxu0 %v225_v13 }
  0x1f   :  { %384 = vmatpush3.msra.mxu0 %v225_v13 }
  0xd6   :  { %v376_v14 = vpop.f32.mrf.mxu1 }
  0xd7   :  { %v222_v21 = vadd.f32 %v376_v14, %v331_v16 }
  0xd8   :  { %v216_v17 = vpop.f32.mrf.mxu1  ;;  %v365_v18 = vpop.f32.mrf.mxu0 }
  0xd9   :  { %v217_v19 = vadd.f32 %v331_v16, %v216_v17  ;;  %v134_v20 = vadd.f32 %v365_v18, %v328_v15 }
  0xda   :  { %v128_v22 = vpop.f32.mrf.mxu0 }
  0xdb   :  { %385 = vmatprep.mubr.msk.f32.mxu0 %vm55_vm0, %v217_v19  ;;  %138 = vst.msk [vmem:[%s533_s8 + $0x8] sm:$0xff] %vm55_vm0, %v134_v20  ;;  %v129_v23 = vadd.f32 %v328_v15, %v128_v22 }
  0xdc   :  { %386 = vmatmul.mubr.msk.f32.vlgmr.msra.gmra.mxu0 %vm55_vm0, %v222_v21 }
  0xdd   :  { %137 = vst.msk [vmem:[%s533_s8] sm:$0xff] %vm55_vm0, %v129_v23 }
 0x19c   :  { %v387_v25 = vpop.f32.mrf.mxu0 }
 0x19d   :  { %v314_v26 = vadd.f32 %v387_v25, %v334_v24 }
 0x19e   :  { %v308_v27 = vpop.f32.mrf.mxu0 }
 0x19f   :  { %318 = vst.msk [vmem:[%s532_s7 + $0x8] sm:$0xff] %vm55_vm0, %v314_v26  ;;  %v309_v28 = vadd.f32 %v334_v24, %v308_v27 }
 0x1a1   :  { %317 = vst.msk [vmem:[%s532_s7] sm:$0xff] %vm55_vm0, %v309_v28 }
 0x1a2   :  { %327 = vsyncpa [#allocation3], 1 }

// kernel: luna_transformer_block.12
= control target key start
LH: loop header
LB: loop body
LE: loop exit
PB: predicated region body
PF: predicated region fallthrough
CT: control target
= control target key end

     0   :  { %s1897_s12 = smov 0   ;;  %s2055_s0 = inlined_call_operand.vmem [shape: f32[2,4,32], index: 0, kind: input, shape index: {}]   ;;  %s2056_s1 = inlined_call_operand.vmem [shape: f32[2,8,32], index: 1, kind: input, shape index: {}]   ;;  %s2057_s2 = inlined_call_operand.vmem [shape: f32[2,8,32], index: 2, kind: input, shape index: {}]   ;;  %s2058_s3 = inlined_call_operand.vmem [shape: f32[2,4,32], index: 3, kind: output, shape index: {}]  }
   0x1 LB: > { %s1650_s13 = sadd.s32 4294967295, %s1859_s12   ;;  %p1654_p0 = scmp.ge.s32.totalorder %s1859_s12, 1  ;;  %s1859_s12 = sphi %s1897_s12, %s13_s12  }
   0x2   : > { %p154_p1 = scmp.lt.s32.totalorder %s1859_s12, 3 }
   0x4   : > { %p155_p2 = pnand %p1654_p0, %p154_p1 }
   0x5   : > { %p184_p3 = scmp.lt.s32.totalorder (!%p155_p2), %s1650_s13, 1  ;;  %s1863_s22 = smov (!%p155_p2), 124  }
   0x6   : > { %158 = sbr.rel (%p155_p2) target bundleno = 1062 (0x426), region = 32  ;;  %s1864_s23 = smov (!%p155_p2), 120  }
   0x7   : > { %s1865_s24 = smov (!%p155_p2), 116   ;;  %s1866_s25 = smov (!%p155_p2), 112  }
   0x8   : > { %s1867_s29 = smov (!%p155_p2), 108   ;;  %s1868_s30 = smov (!%p155_p2), 104  }
   0x9   : > { %s1869_s4 = smov (!%p155_p2), 100   ;;  %s1870_s5 = smov (!%p155_p2), 4  }
   0xa   : > { %s1871_s6 = smov (!%p155_p2), 8   ;;  %s1872_s7 = smov (!%p155_p2), 12  }
   0xb   : > { %v1861_v0 = vmov 0.0   ;;  %vm1862_vm0 = vmmov 0   ;;  %s2060_s13 = smov (!%p184_p3, %s1650_s13), 1  ;;  %vm204_vm1 = vcmask 31744   ;;  %vm281_vm2 = vcmask 60416   ;;  %s1873_s8 = smov 16  }
   0xc   : > { %1717 = vmatprep.subr.mxu0 %v1861_v0  ;;  %1719 = vmatprep.mubr.msk.f32.mxu0 %vm1862_vm0, %v1861_v0  ;;  %s1655_s14 = sshll.u32 %s2060_s13, 2  ;;  %s1656_s15 = sshll.u32 %s2060_s13, 3  ;;  %vm288_vm3 = vcmask 64512   ;;  %vm1561_vm4 = vcmask 97280   ;;  %vm1563_vm5 = vcmask 130048   ;;  %vm1565_vm6 = vcmask 162816  }
   0xd   : > { %1722 = vmatprep.subr.mxu1 %v1861_v0  ;;  %1724 = vmatprep.mubr.msk.f32.mxu1 %vm1862_vm0, %v1861_v0  ;;  %s187_s18 = scalar_lea.vmem %s2055_s0, %s1655_s14  ;;  %s191_s21 = scalar_lea.vmem %s2056_s1, %s1656_s15  ;;  %vm1567_vm7 = vcmask 195584   ;;  %vm1569_vm8 = vcmask 228352   ;;  %vm1571_vm9 = vcmask 257024  }
   0xe   : > { %v200_v1 = vld [vmem:[%s187_s18] sm:$0xf]  ;;  %s195_s28 = scalar_lea.vmem %s2057_s2, %s1656_s15  ;;  %s1874_s9 = smov 20  }
   0xf   : > { %v202_v2 = vld [vmem:[%s191_s21] sm:$0xff]  ;;  %v201_v3 = vmul.f32 0.5, %v200_v1  ;;  %s1875_s10 = smov 24   ;;  %s1876_s11 = smov 28  }
  0x10   : > { %1718 = vmatpush3.xpose.msk.msra.mxu0 %vm204_vm1, %v202_v2  ;;  %v1938_v4 = vld [vmem:[%s195_s28] sm:$0xff]  ;;  %s199_s17 = scalar_lea.vmem %s2058_s3, %s1655_s14 }
  0x11   : > { %1732 = vmatprep.subr.mxu0 %v1861_v0  ;;  %368 = vrot.lane.b32.xlu1 %v201_v3, %s1863_s22 }
  0x12   : > { %1723 = vmatpush3.msra.mxu1 %v1938_v4 }
  0x13   : > { %1720 = vmatmul.mubr.msk.f32.vlgmr.msra.gmra.mxu0 %vm204_vm1, %v201_v3  ;;  %1727 = vmatprep.subr.mxu1 %v1861_v0 }
  0x14   : > { %1734 = vmatprep.mubr.msk.f32.mxu0 %vm1862_vm0, %v1861_v0 }
  0x15   : > { %537 = vrot.lane.b32.xlu1 %v202_v2, %s1864_s23 }
  0x19   : > { %535 = vrot.lane.b32.xlu1 %v201_v3, %s1864_s23 }
  0x1d   : > { %703 = vrot.lane.b32.xlu1 %v202_v2, %s1865_s24 }
  0x21   : > { %701 = vrot.lane.b32.xlu1 %v201_v3, %s1865_s24 }
  0x25   : > { %869 = vrot.lane.b32.xlu1 %v202_v2, %s1866_s25 }
  0x29   : > { %867 = vrot.lane.b32.xlu1 %v201_v3, %s1866_s25 }
  0x2d   : > { %1033 = vrot.lane.b32.xlu1 %v201_v3, %s1867_s29 }
  0x31   : > { %1199 = vrot.lane.b32.xlu1 %v201_v3, %s1868_s30 }
  0x35   : > { %1365 = vrot.lane.b32.xlu1 %v201_v3, %s1869_s4 }
  0x83   : > { %v369_v8 = vpop.permute.xlu1 %368 }
  0x87   : > { %v538_v9 = vpop.permute.xlu1 %537 }
  0x8b   : > { %v536_v12 = vpop.permute.xlu1 %535 }
  0x8f   : > { %v704_v15 = vpop.permute.xlu1 %703 }
  0x93   : > { %v702_v18 = vpop.permute.xlu1 %701 }
  0x97   : > { %v870_v22 = vpop.permute.xlu1 %869 }
  0x9b   : > { %v868_v24 = vpop.permute.xlu1 %867 }
  0x9f   : > { %v1034_v25 = vpop.permute.xlu1 %1033 }
  0xa3   : > { %v1200_v26 = vpop.permute.xlu1 %1199 }
  0xa7   : > { %v1366_v27 = vpop.permute.xlu1 %1365 }
  0xd3   : > { %v277_v5 = vpop.f32.mrf.mxu0 }
  0xd4   : > { %v282_v6 = vsel %vm281_vm2, %v277_v5, -inf }
  0xd5   : > { %283 = vmax.xlane.f32.xlu0 %v282_v6  ;;  %v1721_v7 = vpop.f32.mrf.mxu0 }
  0xeb   : > { %370 = vrot.lane.b32.xlu0 %v202_v2, %s1863_s22 }
  0xef   : > { %1035 = vrot.lane.b32.xlu0 %v202_v2, %s1867_s29 }
  0xf3   : > { %1201 = vrot.lane.b32.xlu0 %v202_v2, %s1868_s30 }
  0xf7   : > { %1367 = vrot.lane.b32.xlu0 %v202_v2, %s1869_s4 }
  0xfb   : > { %453 = vrot.lane.b32.xlu0 %v1938_v4, %s1863_s22 }
 0x15e   : > { %v284_v10 = vpop.xlane.xlu0 %283 }
 0x15f   : > { %v285_v11 = vsub.f32 %v277_v5, %v284_v10 }
 0x161   : > { %v286_v13 = vmul.f32 1.442695, %v285_v11 }
 0x162   : > { %v371_v14 = vpop.permute.xlu0 %370 }
 0x163   : > { %1821 = vpow2.f32 %v286_v13 }
 0x166   : > { %v1036_v16 = vpop.permute.xlu0 %1035 }
 0x16a   : > { %v1202_v17 = vpop.permute.xlu0 %1201 }
 0x16e   : > { %v1368_v19 = vpop.permute.xlu0 %1367 }
 0x170   : > { %v1822_v20 = vpop.eup %1821 }
 0x171   : > { %1725 = vmatmul.mubr.msk.f32.vlgmr.msra.gmra.mxu1 %vm288_vm3, %v1822_v20  ;;  %v362_v21 = vsel %vm281_vm2, %v1822_v20, 0.0 }
 0x172   : > { %1728 = vmatpush3.xpose.msk.msra.mxu1 %vm204_vm1, %v371_v14  ;;  %363 = vadd.xlane.f32.xlu0 %v362_v21  ;;  %v454_v23 = vpop.permute.xlu0 %453 }
 0x173   : > { %1729 = vmatprep.mubr.msk.f32.mxu1 %vm1862_vm0, %v1861_v0  ;;  %1737 = vmatprep.subr.mxu1 %v1861_v0 }
 0x174   : > { %1733 = vmatpush3.msra.mxu0 %v454_v23 }
 0x175   : > { %1730 = vmatmul.mubr.msk.f32.vlgmr.msra.gmra.mxu1 %vm204_vm1, %v369_v8  ;;  %1742 = vmatprep.subr.mxu0 %v1861_v0 }
 0x176   : > { %1738 = vmatpush3.xpose.msk.msra.mxu1 %vm204_vm1, %v538_v9  ;;  %1739 = vmatprep.mubr.msk.f32.mxu1 %vm1862_vm0, %v1861_v0 }
 0x177   : > { %1747 = vmatprep.subr.mxu1 %v1861_v0 }
 0x179   : > { %1740 = vmatmul.mubr.msk.f32.vlgmr.msra.gmra.mxu1 %vm204_vm1, %v536_v12 }
 0x17a   : > { %1748 = vmatpush3.xpose.msk.msra.mxu1 %vm204_vm1, %v704_v15  ;;  %1749 = vmatprep.mubr.msk.f32.mxu1 %vm1862_vm0, %v1861_v0 }
 0x17b   : > { %1757 = vmatprep.subr.mxu1 %v1861_v0 }
 0x17d   : > { %1750 = vmatmul.mubr.msk.f32.vlgmr.msra.gmra.mxu1 %vm204_vm1, %v702_v18 }
 0x17e   : > { %1758 = vmatpush3.xpose.msk.msra.mxu1 %vm204_vm1, %v870_v22  ;;  %1759 = vmatprep.mubr.msk.f32.mxu1 %vm1862_vm0, %v1861_v0 }
 0x17f   : > { %1767 = vmatprep.subr.mxu1 %v1861_v0 }
 0x181   : > { %1760 = vmatmul.mubr.msk.f32.vlgmr.msra.gmra.mxu1 %vm204_vm1, %v868_v24 }
 0x182   : > { %1768 = vmatpush3.xpose.msk.msra.mxu1 %vm204_vm1, %v1036_v16  ;;  %1769 = vmatprep.mubr.msk.f32.mxu1 %vm1862_vm0, %v1861_v0 }
 0x183   : > { %1777 = vmatprep.subr.mxu1 %v1861_v0 }
 0x185   : > { %1770 = vmatmul.mubr.msk.f32.vlgmr.msra.gmra.mxu1 %vm204_vm1, %v1034_v25 }
 0x186   : > { %1778 = vmatpush3.xpose.msk.msra.mxu1 %vm204_vm1, %v1202_v17  ;;  %1779 = vmatprep.mubr.msk.f32.mxu1 %vm1862_vm0, %v1861_v0 }
 0x187   : > { %1787 = vmatprep.subr.mxu1 %v1861_v0 }
 0x189   : > { %1780 = vmatmul.mubr.msk.f32.vlgmr.msra.gmra.mxu1 %vm204_vm1, %v1200_v26 }
 0x18a   : > { %1788 = vmatpush3.xpose.msk.msra.mxu1 %vm204_vm1, %v1368_v19  ;;  %1789 = vmatprep.mubr.msk.f32.mxu1 %vm1862_vm0, %v1861_v0 }
 0x18d   : > { %1790 = vmatmul.mubr.msk.f32.vlgmr.msra.gmra.mxu1 %vm204_vm1, %v1366_v27 }
 0x1fb   : > { %v2010_v51 = vpop.xlane.xlu0 %363 }
 0x231   : > { %v1989_v28 = vpop.f32.mrf.mxu1 }
 0x233   : > { %v1726_v29 = vpop.f32.mrf.mxu1 }
 0x235   : > { %v442_v30 = vpop.f32.mrf.mxu1 }
 0x236   : > { %v446_v31 = vsel %vm281_vm2, %v442_v30, -inf }
 0x237   : > { %447 = vmax.xlane.f32.xlu1 %v446_v31  ;;  %v1731_v32 = vpop.f32.mrf.mxu1 }
 0x239   : > { %v609_v33 = vpop.f32.mrf.mxu1 }
 0x23a   : > { %v613_v34 = vsel %vm281_vm2, %v609_v33, -inf }
 0x23b   : > { %614 = vmax.xlane.f32.xlu0 %v613_v34  ;;  %v1741_v35 = vpop.f32.mrf.mxu1 }
 0x23d   : > { %v775_v36 = vpop.f32.mrf.mxu1 }
 0x23e   : > { %v779_v37 = vsel %vm281_vm2, %v775_v36, -inf }
 0x23f   : > { %780 = vmax.xlane.f32.xlu1 %v779_v37  ;;  %v1751_v38 = vpop.f32.mrf.mxu1 }
 0x241   : > { %v941_v39 = vpop.f32.mrf.mxu1 }
 0x242   : > { %v945_v40 = vsel %vm281_vm2, %v941_v39, -inf }
 0x243   : > { %946 = vmax.xlane.f32.xlu1 %v945_v40  ;;  %v1761_v41 = vpop.f32.mrf.mxu1 }
 0x245   : > { %v1107_v42 = vpop.f32.mrf.mxu1 }
 0x246   : > { %v1111_v43 = vsel %vm281_vm2, %v1107_v42, -inf }
 0x247   : > { %1112 = vmax.xlane.f32.xlu1 %v1111_v43  ;;  %v1771_v44 = vpop.f32.mrf.mxu1 }
 0x249   : > { %v1273_v45 = vpop.f32.mrf.mxu1 }
 0x24a   : > { %v1277_v46 = vsel %vm281_vm2, %v1273_v45, -inf }
 0x24b   : > { %1278 = vmax.xlane.f32.xlu1 %v1277_v46  ;;  %v1781_v47 = vpop.f32.mrf.mxu1 }
 0x24d   : > { %v1439_v48 = vpop.f32.mrf.mxu1 }
 0x24e   : > { %v1443_v49 = vsel %vm281_vm2, %v1439_v48, -inf }
 0x24f   : > { %1444 = vmax.xlane.f32.xlu1 %v1443_v49  ;;  %v1791_v50 = vpop.f32.mrf.mxu1 }
 0x251   : > { %619 = vrot.lane.b32.xlu0 %v1938_v4, %s1864_s23 }
 0x255   : > { %951 = vrot.lane.b32.xlu0 %v1938_v4, %s1866_s25 }
 0x259   : > { %1117 = vrot.lane.b32.xlu0 %v1938_v4, %s1867_s29 }
 0x25d   : > { %1283 = vrot.lane.b32.xlu0 %v1938_v4, %s1868_s30 }
 0x260   : > { %785 = vrot.lane.b32.xlu1 %v1938_v4, %s1865_s24 }
 0x261   : > { %1449 = vrot.lane.b32.xlu0 %v1938_v4, %s1869_s4 }
 0x2c0   : > { %v448_v52 = vpop.xlane.xlu1 %447 }
 0x2c1   : > { %v449_v53 = vsub.f32 %v442_v30, %v448_v52 }
 0x2c3   : > { %v450_v54 = vmul.f32 1.442695, %v449_v53 }
 0x2c4   : > { %v615_v55 = vpop.xlane.xlu0 %614 }
 0x2c5   : > { %1823 = vpow2.f32 %v450_v54  ;;  %v616_v56 = vsub.f32 %v609_v33, %v615_v55 }
 0x2c7   : > { %v617_v57 = vmul.f32 1.442695, %v616_v56 }
 0x2c8   : > { %v781_v58 = vpop.xlane.xlu1 %780  ;;  %v620_v3 = vpop.permute.xlu0 %619 }
 0x2c9   : > { %1825 = vpow2.f32 %v617_v57  ;;  %v782_v59 = vsub.f32 %v775_v36, %v781_v58 }
 0x2cb   : > { %v783_v60 = vmul.f32 1.442695, %v782_v59 }
 0x2cc   : > { %v947_v61 = vpop.xlane.xlu1 %946  ;;  %v952_v10 = vpop.permute.xlu0 %951 }
 0x2cd   : > { %1827 = vpow2.f32 %v783_v60  ;;  %v948_v62 = vsub.f32 %v941_v39, %v947_v61 }
 0x2cf   : > { %v949_v63 = vmul.f32 1.442695, %v948_v62 }
 0x2d0   : > { %v1113_v1 = vpop.xlane.xlu1 %1112  ;;  %v1118_v19 = vpop.permute.xlu0 %1117 }
 0x2d1   : > { %1829 = vpow2.f32 %v949_v63  ;;  %v1114_v2 = vsub.f32 %v1107_v42, %v1113_v1 }
 0x2d2   : > { %v1824_v4 = vpop.eup %1823 }
 0x2d3   : > { %v1115_v5 = vmul.f32 1.442695, %v1114_v2  ;;  %1735 = vmatmul.mubr.msk.f32.vlgmr.msra.gmra.mxu0 %vm288_vm3, %v1824_v4  ;;  %v529_v6 = vsel %vm281_vm2, %v1824_v4, 0.0 }
 0x2d4   : > { %v1279_v7 = vpop.xlane.xlu1 %1278  ;;  %530 = vadd.xlane.f32.xlu1 %v529_v6  ;;  %1743 = vmatpush3.msra.mxu0 %v620_v3  ;;  %v1284_v23 = vpop.permute.xlu0 %1283 }
 0x2d5   : > { %1831 = vpow2.f32 %v1115_v5  ;;  %v1280_v8 = vsub.f32 %v1273_v45, %v1279_v7  ;;  %1744 = vmatprep.mubr.msk.f32.mxu0 %vm1862_vm0, %v1861_v0  ;;  %1752 = vmatprep.subr.mxu0 %v1861_v0 }
 0x2d6   : > { %v1826_v9 = vpop.eup %1825 }
 0x2d7   : > { %v1281_v11 = vmul.f32 1.442695, %v1280_v8  ;;  %1745 = vmatmul.mubr.msk.f32.vlgmr.msra.gmra.mxu0 %vm288_vm3, %v1826_v9  ;;  %v695_v12 = vsel %vm281_vm2, %v1826_v9, 0.0 }
 0x2d8   : > { %v1445_v13 = vpop.xlane.xlu1 %1444  ;;  %696 = vadd.xlane.f32.xlu0 %v695_v12  ;;  %1754 = vmatprep.mubr.msk.f32.mxu0 %vm1862_vm0, %v1861_v0  ;;  %v1450_v27 = vpop.permute.xlu0 %1449 }
 0x2d9   : > { %1833 = vpow2.f32 %v1281_v11  ;;  %v1446_v14 = vsub.f32 %v1439_v48, %v1445_v13 }
 0x2da   : > { %v1828_v15 = vpop.eup %1827 }
 0x2db   : > { %v1447_v16 = vmul.f32 1.442695, %v1446_v14  ;;  %v861_v17 = vsel %vm281_vm2, %v1828_v15, 0.0 }
 0x2dc   : > { %v786_v18 = vpop.permute.xlu1 %785  ;;  %862 = vadd.xlane.f32.xlu0 %v861_v17 }
 0x2dd   : > { %1835 = vpow2.f32 %v1447_v16  ;;  %1753 = vmatpush3.msra.mxu0 %v786_v18 }
 0x2de   : > { %v1830_v20 = vpop.eup %1829  ;;  %1755 = vmatmul.mubr.msk.f32.vlgmr.msra.gmra.mxu0 %vm288_vm3, %v1828_v15  ;;  %1762 = vmatprep.subr.mxu0 %v1861_v0 }
 0x2df   : > { %v1027_v21 = vsel %vm281_vm2, %v1830_v20, 0.0  ;;  %1763 = vmatpush3.msra.mxu0 %v952_v10  ;;  %1764 = vmatprep.mubr.msk.f32.mxu0 %vm1862_vm0, %v1861_v0 }
 0x2e0   : > { %1028 = vadd.xlane.f32.xlu1 %v1027_v21  ;;  %1772 = vmatprep.subr.mxu0 %v1861_v0 }
 0x2e2   : > { %v1832_v22 = vpop.eup %1831  ;;  %1765 = vmatmul.mubr.msk.f32.vlgmr.msra.gmra.mxu0 %vm288_vm3, %v1830_v20 }
 0x2e3   : > { %v1193_v24 = vsel %vm281_vm2, %v1832_v22, 0.0  ;;  %1773 = vmatpush3.msra.mxu0 %v1118_v19  ;;  %1774 = vmatprep.mubr.msk.f32.mxu0 %vm1862_vm0, %v1861_v0 }
 0x2e4   : > { %1194 = vadd.xlane.f32.xlu0 %v1193_v24  ;;  %1782 = vmatprep.subr.mxu0 %v1861_v0 }
 0x2e6   : > { %v1834_v25 = vpop.eup %1833  ;;  %1775 = vmatmul.mubr.msk.f32.vlgmr.msra.gmra.mxu0 %vm288_vm3, %v1832_v22 }
 0x2e7   : > { %v1359_v26 = vsel %vm281_vm2, %v1834_v25, 0.0  ;;  %1783 = vmatpush3.msra.mxu0 %v1284_v23  ;;  %1784 = vmatprep.mubr.msk.f32.mxu0 %vm1862_vm0, %v1861_v0 }
 0x2e8   : > { %1360 = vadd.xlane.f32.xlu1 %v1359_v26  ;;  %1792 = vmatprep.subr.mxu0 %v1861_v0 }
 0x2ea   : > { %v1836_v29 = vpop.eup %1835  ;;  %1785 = vmatmul.mubr.msk.f32.vlgmr.msra.gmra.mxu0 %vm288_vm3, %v1834_v25 }
 0x2eb   : > { %v1525_v30 = vsel %vm281_vm2, %v1836_v29, 0.0  ;;  %1793 = vmatpush3.msra.mxu0 %v1450_v27  ;;  %1794 = vmatprep.mubr.msk.f32.mxu0 %vm1862_vm0, %v1861_v0 }
 0x2ec   : > { %1526 = vadd.xlane.f32.xlu0 %v1525_v30 }
 0x2ee   : > { %1795 = vmatmul.mubr.msk.f32.vlgmr.msra.gmra.mxu0 %vm288_vm3, %v1836_v29 }
 0x35d   : > { %v531_v31 = vpop.xlane.xlu1 %530 }
 0x35e   : > { %1837 = vrcp.f32 %v531_v31 }
 0x361   : > { %v697_v32 = vpop.xlane.xlu0 %696 }
 0x362   : > { %1839 = vrcp.f32 %v697_v32 }
 0x365   : > { %v863_v33 = vpop.xlane.xlu0 %862 }
 0x366   : > { %1841 = vrcp.f32 %v863_v33 }
 0x369   : > { %v1029_v34 = vpop.xlane.xlu1 %1028 }
 0x36a   : > { %1843 = vrcp.f32 %v1029_v34 }
 0x36b   : > { %v1838_v35 = vpop.eup %1837 }
 0x36d   : > { %v1195_v39 = vpop.xlane.xlu0 %1194 }
 0x36e   : > { %1845 = vrcp.f32 %v1195_v39 }
 0x36f   : > { %v1840_v40 = vpop.eup %1839 }
 0x371   : > { %v1361_v43 = vpop.xlane.xlu1 %1360 }
 0x372   : > { %1847 = vrcp.f32 %v1361_v43 }
 0x373   : > { %v1842_v44 = vpop.eup %1841 }
 0x375   : > { %v1527_v45 = vpop.xlane.xlu0 %1526 }
 0x376   : > { %1849 = vrcp.f32 %v1527_v45 }
 0x377   : > { %v1844_v49 = vpop.eup %1843  ;;  %1851 = vrcp.f32 %v2010_v51 }
 0x37b   : > { %v1846_v54 = vpop.eup %1845 }
 0x37f   : > { %v1848_v58 = vpop.eup %1847 }
 0x383   : > { %v1850_v62 = vpop.eup %1849 }
 0x384   : > { %v1852_v5 = vpop.eup %1851 }
 0x385   : > { %v367_v7 = vmul.f32 %v1852_v5, %v1989_v28 }
 0x393   : > { %v525_v36 = vpop.f32.mrf.mxu0 }
 0x394   : > { %v534_v37 = vmul.f32 %v1838_v35, %v525_v36 }
 0x395   : > { %v1736_v38 = vpop.f32.mrf.mxu0 }
 0x396   : > { %1532 = vrot.lane.b32.xlu1 %v534_v37, %s1870_s5 }
 0x397   : > { %v691_v0 = vpop.f32.mrf.mxu0 }
 0x398   : > { %v700_v41 = vmul.f32 %v1840_v40, %v691_v0 }
 0x399   : > { %v1746_v42 = vpop.f32.mrf.mxu0 }
 0x39a   : > { %1536 = vrot.lane.b32.xlu0 %v700_v41, %s1871_s6 }
 0x39e   : > { %v857_v46 = vpop.f32.mrf.mxu0 }
 0x39f   : > { %v866_v47 = vmul.f32 %v1842_v44, %v857_v46 }
 0x3a0   : > { %v1756_v48 = vpop.f32.mrf.mxu0 }
 0x3a1   : > { %1540 = vrot.lane.b32.xlu1 %v866_v47, %s1872_s7 }
 0x3a2   : > { %v1023_v50 = vpop.f32.mrf.mxu0 }
 0x3a3   : > { %v1032_v52 = vmul.f32 %v1844_v49, %v1023_v50 }
 0x3a4   : > { %v1766_v53 = vpop.f32.mrf.mxu0 }
 0x3a5   : > { %1544 = vrot.lane.b32.xlu1 %v1032_v52, %s1873_s8 }
 0x3a6   : > { %v1189_v55 = vpop.f32.mrf.mxu0 }
 0x3a7   : > { %v1198_v56 = vmul.f32 %v1846_v54, %v1189_v55 }
 0x3a8   : > { %v1776_v57 = vpop.f32.mrf.mxu0 }
 0x3a9   : > { %1548 = vrot.lane.b32.xlu0 %v1198_v56, %s1874_s9 }
 0x3aa   : > { %v1355_v59 = vpop.f32.mrf.mxu0 }
 0x3ab   : > { %v1364_v60 = vmul.f32 %v1848_v58, %v1355_v59 }
 0x3ac   : > { %v1786_v61 = vpop.f32.mrf.mxu0 }
 0x3ad   : > { %1552 = vrot.lane.b32.xlu1 %v1364_v60, %s1875_s10 }
 0x3ae   : > { %v1521_v63 = vpop.f32.mrf.mxu0 }
 0x3af   : > { %v1530_v1 = vmul.f32 %v1850_v62, %v1521_v63 }
 0x3b0   : > { %v1796_v2 = vpop.f32.mrf.mxu0 }
 0x3b1   : > { %1556 = vrot.lane.b32.xlu0 %v1530_v1, %s1876_s11 }
 0x408   : > { %v1533_v3 = vpop.permute.xlu1 %1532 }
 0x409   : > { %v1559_v9 = vsel %vm204_vm1, %v367_v7, %v1533_v3 }
 0x40c   : > { %v1537_v6 = vpop.permute.xlu0 %1536 }
 0x40d   : > { %v1560_v10 = vsel %vm288_vm3, %v1559_v9, %v1537_v6 }
 0x413   : > { %v1541_v4 = vpop.permute.xlu1 %1540 }
 0x414   : > { %v1562_v12 = vsel %vm1561_vm4, %v1560_v10, %v1541_v4 }
 0x417   : > { %v1545_v8 = vpop.permute.xlu1 %1544 }
 0x418   : > { %v1564_v51 = vsel %vm1563_vm5, %v1562_v12, %v1545_v8 }
 0x41b   : > { %v1549_v11 = vpop.permute.xlu0 %1548 }
 0x41c   : > { %v1566_v14 = vsel %vm1565_vm6, %v1564_v51, %v1549_v11 }
 0x41f   : > { %v1553_v13 = vpop.permute.xlu1 %1552 }
 0x420   : > { %v1568_v28 = vsel %vm1567_vm7, %v1566_v14, %v1553_v13 }
 0x423   : > { %v1557_v15 = vpop.permute.xlu0 %1556 }
 0x424   : > { %v1570_v16 = vsel %vm1569_vm8, %v1568_v28, %v1557_v15 }
 0x425   : > { %1572 = vst.msk [vmem:[%s199_s17] sm:$0xf] %vm1571_vm9, %v1570_v16 }
 0x426 PF: > { %s13_s12 = sadd.s32 1, %s1859_s12  }
 0x427   : > { %p10_p4 = scmp.ge.s32.totalorder %s13_s12, 4  }
 0x429   :  { %12 = sbr.rel (!%p10_p4) target bundleno = 1 (0x1), region = 68 }

// kernel: luna_transformer_block.13
= control target key start
LH: loop header
LB: loop body
LE: loop exit
PB: predicated region body
PF: predicated region fallthrough
CT: control target
= control target key end

     0   :  { %v237_v0 = vmov 0.0   ;;  %vm34_vm0 = vcmask 261120   ;;  %vm238_vm1 = vmmov 0   ;;  %s317_s1 = inlined_call_operand.vmem [shape: f32[32,32], index: 1, kind: input, shape index: {}]   ;;  %s318_s3 = inlined_call_operand.vmem [shape: f32[32,32], index: 3, kind: input, shape index: {}]   ;;  %s319_s0 = inlined_call_operand.vmem [shape: f32[8,32], index: 0, kind: input, shape index: {}]   ;;  %s320_s2 = inlined_call_operand.vmem [shape: f32[1,32], index: 2, kind: input, shape index: {}]   ;;  %s321_s4 = inlined_call_operand.vmem [shape: f32[1,32], index: 4, kind: input, shape index: {}]   ;;  %s322_s5 = inlined_call_operand.vmem [shape: f32[8,32], index: 5, kind: output, shape index: {0}]   ;;  %s323_s6 = inlined_call_operand.vmem [shape: f32[8,32], index: 6, kind: output, shape index: {1}]  }
   0x1   :  { %213 = vmatprep.subr.mxu0 %v237_v0  ;;  %224 = vmatprep.subr.mxu1 %v237_v0  ;;  %v26_v1 = vld [vmem:[%s317_s1 + $0x18] sm:$0xff]  ;;  %v25_v3 = vld [vmem:[%s317_s1 + $0x10] sm:$0xff]  ;;  %v24_v5 = vld [vmem:[%s317_s1 + $0x8] sm:$0xff] }
   0x2   :  { %v112_v2 = vld [vmem:[%s318_s3 + $0x18] sm:$0xff]  ;;  %214 = vmatpush3.msra.mxu0 %v26_v1  ;;  %v111_v4 = vld [vmem:[%s318_s3 + $0x10] sm:$0xff]  ;;  %v110_v6 = vld [vmem:[%s318_s3 + $0x8] sm:$0xff]  ;;  %221 = vmatprep.mubr.msk.f32.mxu0 %vm238_vm1, %v237_v0 }
   0x3   :  { %225 = vmatpush3.msra.mxu1 %v112_v2  ;;  %215 = vmatprep.subr.mxu0 %v237_v0  ;;  %v23_v7 = vld [vmem:[%s317_s1] sm:$0xff] }
   0x4   :  { %226 = vmatprep.subr.mxu1 %v237_v0  ;;  %216 = vmatpush3.msra.mxu0 %v25_v3  ;;  %v109_v8 = vld [vmem:[%s318_s3] sm:$0xff] }
   0x5   :  { %227 = vmatpush3.msra.mxu1 %v111_v4  ;;  %217 = vmatprep.subr.mxu0 %v237_v0  ;;  %v22_v9 = vld [vmem:[%s319_s0] sm:$0xff] }
   0x6   :  { %228 = vmatprep.subr.mxu1 %v237_v0  ;;  %218 = vmatpush3.msra.mxu0 %v24_v5  ;;  %v199_v10 = vld [vmem:[%s320_s2] ss:$0 sm:$0xff] }
   0x7   :  { %229 = vmatpush3.msra.mxu1 %v110_v6  ;;  %219 = vmatprep.subr.mxu0 %v237_v0  ;;  %v201_v11 = vld [vmem:[%s321_s4] ss:$0 sm:$0xff] }
   0x8   :  { %230 = vmatprep.subr.mxu1 %v237_v0  ;;  %220 = vmatpush3.msra.mxu0 %v23_v7 }
   0x9   :  { %231 = vmatpush3.msra.mxu1 %v109_v8  ;;  %232 = vmatprep.mubr.msk.f32.mxu1 %vm238_vm1, %v237_v0 }
   0xa   :  { %222 = vmatmul.mubr.msk.f32.vlgmr.msra.gmra.mxu0 %vm34_vm0, %v22_v9  ;;  %233 = vmatmul.mubr.msk.f32.vlgmr.msra.gmra.mxu1 %vm34_vm0, %v22_v9 }
  0xca   :  { %v104_v12 = vpop.f32.mrf.mxu0  ;;  %v186_v13 = vpop.f32.mrf.mxu1 }
  0xcb   :  { %v105_v14 = vadd.f32 %v199_v10, %v104_v12  ;;  %v187_v15 = vadd.f32 %v201_v11, %v186_v13 }
  0xcc   :  { %v223_v16 = vpop.f32.mrf.mxu0  ;;  %v234_v17 = vpop.f32.mrf.mxu1 }
  0xcd   :  { %108 = vst.msk [vmem:[%s322_s5] sm:$0xff] %vm34_vm0, %v105_v14  ;;  %190 = vst.msk [vmem:[%s323_s6] sm:$0xff] %vm34_vm0, %v187_v15 }

// kernel: luna_transformer_block.16
= control target key start
LH: loop header
LB: loop body
LE: loop exit
PB: predicated region body
PF: predicated region fallthrough
CT: control target
= control target key end

     0   :  { %v204_v1 = vmov 0.0   ;;  %vm205_vm0 = vmmov 0   ;;  %s276_s0 = inlined_call_operand.vmem [shape: f32[8,32], index: 0, kind: input, shape index: {}]   ;;  %s277_s1 = inlined_call_operand.vmem [shape: f32[32,32], index: 1, kind: input, shape index: {}]   ;;  %s278_s2 = inlined_call_operand.vmem [shape: f32[1,32], index: 2, kind: input, shape index: {}]   ;;  %s279_s3 = inlined_call_operand.vmem [shape: f32[8,32], index: 3, kind: input, shape index: {}]   ;;  %s280_s4 = inlined_call_operand.vmem [shape: f32[1,32], index: 4, kind: input, shape index: {}]   ;;  %s281_s5 = inlined_call_operand.vmem [shape: f32[1,32], index: 5, kind: input, shape index: {}]   ;;  %s282_s6 = inlined_call_operand.hbm [shape: f32[8,32], index: 6, kind: output, shape index: {}]  }
   0x1   :  { %v28_v0 = vld [vmem:[%s277_s1 + $0x18] sm:$0xff]  ;;  %166 = vmatprep.subr.mxu0 %v204_v1  ;;  %v27_v2 = vld [vmem:[%s277_s1 + $0x10] sm:$0xff]  ;;  %174 = vmatprep.mubr.msk.f32.mxu0 %vm205_vm0, %v204_v1 }
   0x2   :  { %167 = vmatpush3.msra.mxu0 %v28_v0 }
   0x3   :  { %11 = vsyncpa [#allocation3], 0  ;;  %168 = vmatprep.subr.mxu0 %v204_v1  ;;  %v26_v3 = vld [vmem:[%s277_s1 + $0x8] sm:$0xff]  ;;  %v25_v4 = vld [vmem:[%s277_s1] sm:$0xff]  ;;  %vm36_vm1 = vcmask 261120   ;;  %s206_s11 = smov [#allocation2]  }
   0x4   :  { %169 = vmatpush3.msra.mxu0 %v27_v2  ;;  %v24_v5 = vld [vmem:[%s276_s0] sm:$0xff]  ;;  %s149_s12 = sshll.u32 %s206_s11, 4  ;;  %s150_s12 = int_to_ptr.vmem [resolvable:$true] %s149_s12 }
   0x5   :  { %170 = vmatprep.subr.mxu0 %v204_v1  ;;  %v157_v6 = vld [vmem:[%s278_s2] ss:$0 sm:$0xff]  ;;  %s182_s13 = scalar_lea.vmem %s150_s12, 128  ;;  %p187_p1 = scmp.lt.s32.totalorder %s150_s12, %s150_s12 }
   0x6   :  { %171 = vmatpush3.msra.mxu0 %v26_v3  ;;  %v110_v8 = vld [vmem:[%s279_s3] sm:$0xff]  ;;  %p183_p0 = scmp.ne.s32.totalorder %s150_s12, %s182_s13  ;;  %p188_p2 = scmp.lt.s32.totalorder %s182_s13, %s182_s13 }
   0x7   :  { %172 = vmatprep.subr.mxu0 %v204_v1  ;;  %v159_v22 = vld [vmem:[%s280_s4] ss:$0 sm:$0xff] }
   0x8   :  { %173 = vmatpush3.msra.mxu0 %v25_v4  ;;  %v160_v24 = vld [vmem:[%s281_s5] ss:$0 sm:$0xff]  ;;  %p189_p3 = por %p188_p2, %p187_p1 }
   0x9   :  { %175 = vmatmul.mubr.msk.f32.vlgmr.msra.gmra.mxu0 %vm36_vm1, %v24_v5 }
   0xa   :  { %p190_p4 = pnand %p189_p3, %p183_p0 }
  0xc9   :  { %v106_v7 = vpop.f32.mrf.mxu0 }
  0xca   :  { %v107_v9 = vadd.f32 %v157_v6, %v106_v7 }
  0xcb   :  { %v176_v10 = vpop.f32.mrf.mxu0 }
  0xcc   :  { %v111_v11 = vadd.f32 %v110_v8, %v107_v9 }
  0xce   :  { %v112_v12 = vsel %vm36_vm1, %v111_v11, 0.0 }
  0xcf   :  { %113 = vadd.xlane.f32.xlu0 %v112_v12 }
 0x158   :  { %v114_v13 = vpop.xlane.xlu0 %113 }
 0x159   :  { %v116_v14 = vmul.f32 0.03125, %v114_v13 }
 0x15b   :  { %v117_v15 = vsub.f32 %v111_v11, %v116_v14 }
 0x15d   :  { %v118_v16 = vmul.f32 %v117_v15, %v117_v15 }
 0x15f   :  { %v119_v17 = vsel %vm36_vm1, %v118_v16, 0.0 }
 0x160   :  { %120 = vadd.xlane.f32.xlu0 %v119_v17 }
 0x1e9   :  { %v121_v18 = vpop.xlane.xlu0 %120 }
 0x1ea   :  { %v122_v19 = vmul.f32 0.03125, %v121_v18 }
 0x1ec   :  { %v123_v20 = vadd.f32 1e-05, %v122_v19 }
 0x1ee   :  { %180 = vrsqrt.f32 %v123_v20 }
 0x1fb   :  { %v181_v21 = vpop.eup %180 }
 0x1fc   :  { %v125_v23 = vmul.f32 %v181_v21, %v117_v15 }
 0x1fe   :  { %v133_v25 = vmul.f32 %v159_v22, %v125_v23 }
 0x200   :  { %v141_v26 = vadd.f32 %v160_v24, %v133_v25 }
 0x202   :  { %142 = vst.msk [vmem:[#allocation2] sm:$0xff] %vm36_vm1, %v141_v26 }
 0x203   :  { %193 = shalt.err (!%p190_p4)
}
 0x204   :  { %152 = dma.vmem_to_hbm [thread:$0]  %s150_s12, 128, %s282_s6, [#allocation3]  }
 0x205   :  { %202 = dma.done.wait [#allocation3], 128  }
 0x206   :  { %203 = vsyncadd [#allocation3], 4294967168 }
 0x207   :  { %156 = vsyncpa [#allocation3], 1 }

// kernel: luna_transformer_block.15
= control target key start
LH: loop header
LB: loop body
LE: loop exit
PB: predicated region body
PF: predicated region fallthrough
CT: control target
= control target key end

     0   :  { %vm36_vm0 = vcmask 261120   ;;  %s281_s1 = inlined_call_operand.vmem [shape: f32[32,32], index: 1, kind: input, shape index: {}]   ;;  %s282_s0 = inlined_call_operand.vmem [shape: f32[16,32], index: 0, kind: input, shape index: {}]   ;;  %s283_s2 = inlined_call_operand.vmem [shape: f32[1,32], index: 2, kind: input, shape index: {}]   ;;  %s284_s3 = inlined_call_operand.vmem [shape: f32[16,32], index: 3, kind: input, shape index: {}]   ;;  %s285_s4 = inlined_call_operand.vmem [shape: f32[1,32], index: 4, kind: input, shape index: {}]   ;;  %s286_s5 = inlined_call_operand.vmem [shape: f32[1,32], index: 5, kind: input, shape index: {}]   ;;  %s287_s6 = inlined_call_operand.vmem [shape: f32[16,32], index: 6, kind: output, shape index: {}]  }
   0x1   :  { %v28_v0 = vld [vmem:[%s281_s1 + $0x18] sm:$0xff]  ;;  %v27_v1 = vld [vmem:[%s281_s1 + $0x10] sm:$0xff]  ;;  %v23_v2 = vld [vmem:[%s282_s0] sm:$0xff] }
   0x2   :  { %184 = vmatprep.subr.mxu0 %v28_v0  ;;  %v26_v3 = vld [vmem:[%s281_s1 + $0x8] sm:$0xff]  ;;  %192 = vmatprep.mubr.msk.f32.mxu0 %vm36_vm0, %v23_v2  ;;  %v25_v4 = vld [vmem:[%s281_s1] sm:$0xff] }
   0x3   :  { %185 = vmatpush3.msra.mxu0 %v28_v0  ;;  %v24_v5 = vld [vmem:[%s282_s0 + $0x8] sm:$0xff]  ;;  %v173_v7 = vld [vmem:[%s283_s2] ss:$0 sm:$0xff] }
   0x4   :  { %186 = vmatprep.subr.mxu0 %v27_v1  ;;  %v118_v9 = vld [vmem:[%s284_s3] sm:$0xff]  ;;  %v119_v12 = vld [vmem:[%s284_s3 + $0x8] sm:$0xff] }
   0x5   :  { %187 = vmatpush3.msra.mxu0 %v27_v1  ;;  %v176_v34 = vld [vmem:[%s285_s4] ss:$0 sm:$0xff] }
   0x6   :  { %188 = vmatprep.subr.mxu0 %v26_v3  ;;  %v177_v36 = vld [vmem:[%s286_s5] ss:$0 sm:$0xff] }
   0x7   :  { %189 = vmatpush3.msra.mxu0 %v26_v3 }
   0x8   :  { %190 = vmatprep.subr.mxu0 %v25_v4 }
   0x9   :  { %191 = vmatpush3.msra.mxu0 %v25_v4 }
   0xa   :  { %193 = vmatmul.mubr.msk.f32.vlgmr.msra.gmra.mxu0 %vm36_vm0, %v24_v5 }
  0xca   :  { %v194_v6 = vpop.f32.mrf.mxu0 }
  0xcb   :  { %v115_v10 = vadd.f32 %v194_v6, %v173_v7 }
  0xcc   :  { %v109_v8 = vpop.f32.mrf.mxu0 }
  0xcd   :  { %v110_v11 = vadd.f32 %v173_v7, %v109_v8  ;;  %v121_v15 = vadd.f32 %v119_v12, %v115_v10 }
  0xcf   :  { %v120_v13 = vadd.f32 %v118_v9, %v110_v11  ;;  %v125_v16 = vsel %vm36_vm0, %v121_v15, 0.0 }
  0xd1   :  { %v122_v14 = vsel %vm36_vm0, %v120_v13, 0.0 }
  0xd2   :  { %123 = vadd.xlane.f32.xlu0 %v122_v14 }
  0xd6   :  { %126 = vadd.xlane.f32.xlu0 %v125_v16 }
 0x15b   :  { %v124_v17 = vpop.xlane.xlu0 %123 }
 0x15c   :  { %v129_v18 = vmul.f32 0.03125, %v124_v17 }
 0x15e   :  { %v131_v19 = vsub.f32 %v120_v13, %v129_v18 }
 0x15f   :  { %v127_v20 = vpop.xlane.xlu0 %126 }
 0x160   :  { %v130_v21 = vmul.f32 0.03125, %v127_v20  ;;  %v133_v22 = vmul.f32 %v131_v19, %v131_v19 }
 0x162   :  { %v132_v23 = vsub.f32 %v121_v15, %v130_v21  ;;  %v135_v24 = vsel %vm36_vm0, %v133_v22, 0.0 }
 0x163   :  { %136 = vadd.xlane.f32.xlu1 %v135_v24 }
 0x164   :  { %v134_v25 = vmul.f32 %v132_v23, %v132_v23 }
 0x166   :  { %v138_v26 = vsel %vm36_vm0, %v134_v25, 0.0 }
 0x167   :  { %139 = vadd.xlane.f32.xlu1 %v138_v26 }
 0x1ec   :  { %v137_v27 = vpop.xlane.xlu1 %136 }
 0x1ed   :  { %v141_v28 = vmul.f32 0.03125, %v137_v27 }
 0x1ef   :  { %v143_v29 = vadd.f32 1e-05, %v141_v28 }
 0x1f0   :  { %v140_v30 = vpop.xlane.xlu1 %139 }
 0x1f1   :  { %195 = vrsqrt.f32 %v143_v29  ;;  %v142_v31 = vmul.f32 0.03125, %v140_v30 }
 0x1f3   :  { %v144_v32 = vadd.f32 1e-05, %v142_v31 }
 0x1f5   :  { %197 = vrsqrt.f32 %v144_v32 }
 0x1fe   :  { %v196_v33 = vpop.eup %195 }
 0x1ff   :  { %v147_v35 = vmul.f32 %v196_v33, %v131_v19 }
 0x201   :  { %v156_v37 = vmul.f32 %v176_v34, %v147_v35 }
 0x202   :  { %v198_v38 = vpop.eup %197 }
 0x203   :  { %v165_v39 = vadd.f32 %v177_v36, %v156_v37  ;;  %v148_v40 = vmul.f32 %v198_v38, %v132_v23 }
 0x205   :  { %167 = vst.msk [vmem:[%s287_s6] sm:$0xff] %vm36_vm0, %v165_v39  ;;  %v157_v41 = vmul.f32 %v176_v34, %v148_v40 }
 0x207   :  { %v166_v42 = vadd.f32 %v177_v36, %v157_v41 }
 0x209   :  { %168 = vst.msk [vmem:[%s287_s6 + $0x8] sm:$0xff] %vm36_vm0, %v166_v42 }

// kernel: luna_transformer_block.14
= control target key start
LH: loop header
LB: loop body
LE: loop exit
PB: predicated region body
PF: predicated region fallthrough
CT: control target
= control target key end

     0   :  { %s1914_s12 = smov 0   ;;  %s2083_s0 = inlined_call_operand.vmem [shape: f32[2,8,32], index: 0, kind: input, shape index: {}]   ;;  %s2084_s1 = inlined_call_operand.vmem [shape: f32[2,4,32], index: 1, kind: input, shape index: {}]   ;;  %s2085_s2 = inlined_call_operand.vmem [shape: f32[2,4,32], index: 2, kind: input, shape index: {}]   ;;  %s2086_s3 = inlined_call_operand.vmem [shape: f32[2,8,32], index: 3, kind: output, shape index: {}]  }
   0x1 LB: > { %s1659_s13 = sadd.s32 4294967295, %s1876_s12   ;;  %p1663_p0 = scmp.ge.s32.totalorder %s1876_s12, 1  ;;  %s1876_s12 = sphi %s1914_s12, %s13_s12  }
   0x2   : > { %p154_p1 = scmp.lt.s32.totalorder %s1876_s12, 3 }
   0x4   : > { %p155_p2 = pnand %p1663_p0, %p154_p1 }
   0x5   : > { %p184_p3 = scmp.lt.s32.totalorder (!%p155_p2), %s1659_s13, 1  ;;  %s1880_s22 = smov (!%p155_p2), 124  }
   0x6   : > { %158 = sbr.rel (%p155_p2) target bundleno = 1062 (0x426), region = 32  ;;  %s1881_s23 = smov (!%p155_p2), 120  }
   0x7   : > { %s1882_s24 = smov (!%p155_p2), 116   ;;  %s1883_s25 = smov (!%p155_p2), 112  }
   0x8   : > { %s1884_s26 = smov (!%p155_p2), 108   ;;  %s1885_s27 = smov (!%p155_p2), 104  }
   0x9   : > { %s1886_s28 = smov (!%p155_p2), 100   ;;  %s1887_s5 = smov (!%p155_p2), 4  }
   0xa   : > { %s1888_s6 = smov (!%p155_p2), 8   ;;  %s1889_s7 = smov (!%p155_p2), 12  }
   0xb   : > { %v1878_v0 = vmov 0.0   ;;  %vm1879_vm0 = vmmov 0   ;;  %s2088_s13 = smov (!%p184_p3, %s1659_s13), 1  ;;  %vm204_vm1 = vcmask 31744   ;;  %vm290_vm2 = vcmask 1043456   ;;  %s1890_s8 = smov 16  }
   0xc   : > { %1734 = vmatprep.subr.mxu0 %v1878_v0  ;;  %1736 = vmatprep.mubr.msk.f32.mxu0 %vm1879_vm0, %v1878_v0  ;;  %s1664_s14 = sshll.u32 %s2088_s13, 3  ;;  %s1665_s15 = sshll.u32 %s2088_s13, 2  ;;  %vm1568_vm3 = vcmask 64512   ;;  %vm1570_vm4 = vcmask 97280   ;;  %vm1572_vm5 = vcmask 130048   ;;  %vm1574_vm6 = vcmask 162816  }
   0xd   : > { %1739 = vmatprep.subr.mxu1 %v1878_v0  ;;  %1741 = vmatprep.mubr.msk.f32.mxu1 %vm1879_vm0, %v1878_v0  ;;  %s187_s18 = scalar_lea.vmem %s2083_s0, %s1664_s14  ;;  %s191_s21 = scalar_lea.vmem %s2084_s1, %s1665_s15  ;;  %vm1576_vm7 = vcmask 195584   ;;  %vm1578_vm8 = vcmask 228352   ;;  %vm1580_vm9 = vcmask 261120  }
   0xe   : > { %v200_v1 = vld [vmem:[%s187_s18] sm:$0xff]  ;;  %s195_s4 = scalar_lea.vmem %s2085_s2, %s1665_s15  ;;  %s1891_s9 = smov 20  }
   0xf   : > { %v202_v2 = vld [vmem:[%s191_s21] sm:$0xf]  ;;  %v201_v3 = vmul.f32 0.5, %v200_v1  ;;  %s1892_s10 = smov 24   ;;  %s1893_s11 = smov 28  }
  0x10   : > { %1735 = vmatpush3.xpose.msk.msra.mxu0 %vm204_vm1, %v202_v2  ;;  %v1963_v7 = vld [vmem:[%s195_s4] sm:$0xf]  ;;  %s199_s17 = scalar_lea.vmem %s2086_s3, %s1664_s14 }
  0x11   : > { %1749 = vmatprep.subr.mxu0 %v1878_v0  ;;  %370 = vrot.lane.b32.xlu1 %v201_v3, %s1880_s22 }
  0x12   : > { %1740 = vmatpush3.msk.msra.mxu1 %vm290_vm2, %v1963_v7 }
  0x13   : > { %1737 = vmatmul.mubr.msk.f32.vlgmr.msra.gmra.mxu0 %vm204_vm1, %v201_v3  ;;  %1744 = vmatprep.subr.mxu1 %v1878_v0 }
  0x14   : > { %1751 = vmatprep.mubr.msk.f32.mxu0 %vm1879_vm0, %v1878_v0 }
  0x15   : > { %539 = vrot.lane.b32.xlu1 %v202_v2, %s1881_s23 }
  0x19   : > { %537 = vrot.lane.b32.xlu1 %v201_v3, %s1881_s23 }
  0x1d   : > { %706 = vrot.lane.b32.xlu1 %v202_v2, %s1882_s24 }
  0x21   : > { %704 = vrot.lane.b32.xlu1 %v201_v3, %s1882_s24 }
  0x25   : > { %873 = vrot.lane.b32.xlu1 %v202_v2, %s1883_s25 }
  0x29   : > { %871 = vrot.lane.b32.xlu1 %v201_v3, %s1883_s25 }
  0x2d   : > { %1038 = vrot.lane.b32.xlu1 %v201_v3, %s1884_s26 }
  0x31   : > { %1205 = vrot.lane.b32.xlu1 %v201_v3, %s1885_s27 }
  0x35   : > { %1372 = vrot.lane.b32.xlu1 %v201_v3, %s1886_s28 }
  0x83   : > { %v371_v8 = vpop.permute.xlu1 %370 }
  0x87   : > { %v540_v9 = vpop.permute.xlu1 %539 }
  0x8b   : > { %v538_v12 = vpop.permute.xlu1 %537 }
  0x8f   : > { %v707_v15 = vpop.permute.xlu1 %706 }
  0x93   : > { %v705_v18 = vpop.permute.xlu1 %704 }
  0x97   : > { %v874_v22 = vpop.permute.xlu1 %873 }
  0x9b   : > { %v872_v24 = vpop.permute.xlu1 %871 }
  0x9f   : > { %v1039_v25 = vpop.permute.xlu1 %1038 }
  0xa3   : > { %v1206_v26 = vpop.permute.xlu1 %1205 }
  0xa7   : > { %v1373_v27 = vpop.permute.xlu1 %1372 }
  0xd3   : > { %v277_v4 = vpop.f32.mrf.mxu0 }
  0xd4   : > { %v281_v5 = vsel %vm204_vm1, %v277_v4, -inf }
  0xd5   : > { %282 = vmax.xlane.f32.xlu0 %v281_v5  ;;  %v1738_v6 = vpop.f32.mrf.mxu0 }
  0xeb   : > { %372 = vrot.lane.b32.xlu0 %v202_v2, %s1880_s22 }
  0xef   : > { %1040 = vrot.lane.b32.xlu0 %v202_v2, %s1884_s26 }
  0xf3   : > { %1207 = vrot.lane.b32.xlu0 %v202_v2, %s1885_s27 }
  0xf7   : > { %1374 = vrot.lane.b32.xlu0 %v202_v2, %s1886_s28 }
  0xfb   : > { %454 = vrot.lane.b32.xlu0 %v1963_v7, %s1880_s22 }
 0x15e   : > { %v283_v10 = vpop.xlane.xlu0 %282 }
 0x15f   : > { %v284_v11 = vsub.f32 %v277_v4, %v283_v10 }
 0x161   : > { %v285_v13 = vmul.f32 1.442695, %v284_v11 }
 0x162   : > { %v373_v14 = vpop.permute.xlu0 %372 }
 0x163   : > { %1838 = vpow2.f32 %v285_v13 }
 0x166   : > { %v1041_v16 = vpop.permute.xlu0 %1040 }
 0x16a   : > { %v1208_v17 = vpop.permute.xlu0 %1207 }
 0x16e   : > { %v1375_v19 = vpop.permute.xlu0 %1374 }
 0x170   : > { %v1839_v20 = vpop.eup %1838 }
 0x171   : > { %1742 = vmatmul.mubr.msk.f32.vlgmr.msra.gmra.mxu1 %vm204_vm1, %v1839_v20  ;;  %v364_v21 = vsel %vm204_vm1, %v1839_v20, 0.0 }
 0x172   : > { %1745 = vmatpush3.xpose.msk.msra.mxu1 %vm204_vm1, %v373_v14  ;;  %365 = vadd.xlane.f32.xlu0 %v364_v21  ;;  %v455_v23 = vpop.permute.xlu0 %454 }
 0x173   : > { %1746 = vmatprep.mubr.msk.f32.mxu1 %vm1879_vm0, %v1878_v0  ;;  %1754 = vmatprep.subr.mxu1 %v1878_v0 }
 0x174   : > { %1750 = vmatpush3.msk.msra.mxu0 %vm290_vm2, %v455_v23 }
 0x175   : > { %1747 = vmatmul.mubr.msk.f32.vlgmr.msra.gmra.mxu1 %vm204_vm1, %v371_v8  ;;  %1759 = vmatprep.subr.mxu0 %v1878_v0 }
 0x176   : > { %1755 = vmatpush3.xpose.msk.msra.mxu1 %vm204_vm1, %v540_v9  ;;  %1756 = vmatprep.mubr.msk.f32.mxu1 %vm1879_vm0, %v1878_v0 }
 0x177   : > { %1764 = vmatprep.subr.mxu1 %v1878_v0 }
 0x179   : > { %1757 = vmatmul.mubr.msk.f32.vlgmr.msra.gmra.mxu1 %vm204_vm1, %v538_v12 }
 0x17a   : > { %1765 = vmatpush3.xpose.msk.msra.mxu1 %vm204_vm1, %v707_v15  ;;  %1766 = vmatprep.mubr.msk.f32.mxu1 %vm1879_vm0, %v1878_v0 }
 0x17b   : > { %1774 = vmatprep.subr.mxu1 %v1878_v0 }
 0x17d   : > { %1767 = vmatmul.mubr.msk.f32.vlgmr.msra.gmra.mxu1 %vm204_vm1, %v705_v18 }
 0x17e   : > { %1775 = vmatpush3.xpose.msk.msra.mxu1 %vm204_vm1, %v874_v22  ;;  %1776 = vmatprep.mubr.msk.f32.mxu1 %vm1879_vm0, %v1878_v0 }
 0x17f   : > { %1784 = vmatprep.subr.mxu1 %v1878_v0 }
 0x181   : > { %1777 = vmatmul.mubr.msk.f32.vlgmr.msra.gmra.mxu1 %vm204_vm1, %v872_v24 }
 0x182   : > { %1785 = vmatpush3.xpose.msk.msra.mxu1 %vm204_vm1, %v1041_v16  ;;  %1786 = vmatprep.mubr.msk.f32.mxu1 %vm1879_vm0, %v1878_v0 }
 0x183   : > { %1794 = vmatprep.subr.mxu1 %v1878_v0 }
 0x185   : > { %1787 = vmatmul.mubr.msk.f32.vlgmr.msra.gmra.mxu1 %vm204_vm1, %v1039_v25 }
 0x186   : > { %1795 = vmatpush3.xpose.msk.msra.mxu1 %vm204_vm1, %v1208_v17  ;;  %1796 = vmatprep.mubr.msk.f32.mxu1 %vm1879_vm0, %v1878_v0 }
 0x187   : > { %1804 = vmatprep.subr.mxu1 %v1878_v0 }
 0x189   : > { %1797 = vmatmul.mubr.msk.f32.vlgmr.msra.gmra.mxu1 %vm204_vm1, %v1206_v26 }
 0x18a   : > { %1805 = vmatpush3.xpose.msk.msra.mxu1 %vm204_vm1, %v1375_v19  ;;  %1806 = vmatprep.mubr.msk.f32.mxu1 %vm1879_vm0, %v1878_v0 }
 0x18d   : > { %1807 = vmatmul.mubr.msk.f32.vlgmr.msra.gmra.mxu1 %vm204_vm1, %v1373_v27 }
 0x1fb   : > { %v2033_v51 = vpop.xlane.xlu0 %365 }
 0x231   : > { %v2012_v28 = vpop.f32.mrf.mxu1 }
 0x233   : > { %v1743_v29 = vpop.f32.mrf.mxu1 }
 0x235   : > { %v444_v30 = vpop.f32.mrf.mxu1 }
 0x236   : > { %v448_v31 = vsel %vm204_vm1, %v444_v30, -inf }
 0x237   : > { %449 = vmax.xlane.f32.xlu1 %v448_v31  ;;  %v1748_v32 = vpop.f32.mrf.mxu1 }
 0x239   : > { %v611_v33 = vpop.f32.mrf.mxu1 }
 0x23a   : > { %v615_v34 = vsel %vm204_vm1, %v611_v33, -inf }
 0x23b   : > { %616 = vmax.xlane.f32.xlu0 %v615_v34  ;;  %v1758_v35 = vpop.f32.mrf.mxu1 }
 0x23d   : > { %v778_v36 = vpop.f32.mrf.mxu1 }
 0x23e   : > { %v782_v37 = vsel %vm204_vm1, %v778_v36, -inf }
 0x23f   : > { %783 = vmax.xlane.f32.xlu1 %v782_v37  ;;  %v1768_v38 = vpop.f32.mrf.mxu1 }
 0x241   : > { %v945_v39 = vpop.f32.mrf.mxu1 }
 0x242   : > { %v949_v40 = vsel %vm204_vm1, %v945_v39, -inf }
 0x243   : > { %950 = vmax.xlane.f32.xlu1 %v949_v40  ;;  %v1778_v41 = vpop.f32.mrf.mxu1 }
 0x245   : > { %v1112_v42 = vpop.f32.mrf.mxu1 }
 0x246   : > { %v1116_v43 = vsel %vm204_vm1, %v1112_v42, -inf }
 0x247   : > { %1117 = vmax.xlane.f32.xlu1 %v1116_v43  ;;  %v1788_v44 = vpop.f32.mrf.mxu1 }
 0x249   : > { %v1279_v45 = vpop.f32.mrf.mxu1 }
 0x24a   : > { %v1283_v46 = vsel %vm204_vm1, %v1279_v45, -inf }
 0x24b   : > { %1284 = vmax.xlane.f32.xlu1 %v1283_v46  ;;  %v1798_v47 = vpop.f32.mrf.mxu1 }
 0x24d   : > { %v1446_v48 = vpop.f32.mrf.mxu1 }
 0x24e   : > { %v1450_v49 = vsel %vm204_vm1, %v1446_v48, -inf }
 0x24f   : > { %1451 = vmax.xlane.f32.xlu1 %v1450_v49  ;;  %v1808_v50 = vpop.f32.mrf.mxu1 }
 0x251   : > { %621 = vrot.lane.b32.xlu0 %v1963_v7, %s1881_s23 }
 0x255   : > { %955 = vrot.lane.b32.xlu0 %v1963_v7, %s1883_s25 }
 0x259   : > { %1122 = vrot.lane.b32.xlu0 %v1963_v7, %s1884_s26 }
 0x25d   : > { %1289 = vrot.lane.b32.xlu0 %v1963_v7, %s1885_s27 }
 0x260   : > { %788 = vrot.lane.b32.xlu1 %v1963_v7, %s1882_s24 }
 0x261   : > { %1456 = vrot.lane.b32.xlu0 %v1963_v7, %s1886_s28 }
 0x2c0   : > { %v450_v52 = vpop.xlane.xlu1 %449 }
 0x2c1   : > { %v451_v53 = vsub.f32 %v444_v30, %v450_v52 }
 0x2c3   : > { %v452_v54 = vmul.f32 1.442695, %v451_v53 }
 0x2c4   : > { %v617_v55 = vpop.xlane.xlu0 %616 }
 0x2c5   : > { %1840 = vpow2.f32 %v452_v54  ;;  %v618_v56 = vsub.f32 %v611_v33, %v617_v55 }
 0x2c7   : > { %v619_v57 = vmul.f32 1.442695, %v618_v56 }
 0x2c8   : > { %v784_v58 = vpop.xlane.xlu1 %783  ;;  %v622_v3 = vpop.permute.xlu0 %621 }
 0x2c9   : > { %1842 = vpow2.f32 %v619_v57  ;;  %v785_v59 = vsub.f32 %v778_v36, %v784_v58 }
 0x2cb   : > { %v786_v60 = vmul.f32 1.442695, %v785_v59 }
 0x2cc   : > { %v951_v61 = vpop.xlane.xlu1 %950  ;;  %v956_v10 = vpop.permute.xlu0 %955 }
 0x2cd   : > { %1844 = vpow2.f32 %v786_v60  ;;  %v952_v62 = vsub.f32 %v945_v39, %v951_v61 }
 0x2cf   : > { %v953_v63 = vmul.f32 1.442695, %v952_v62 }
 0x2d0   : > { %v1118_v1 = vpop.xlane.xlu1 %1117  ;;  %v1123_v19 = vpop.permute.xlu0 %1122 }
 0x2d1   : > { %1846 = vpow2.f32 %v953_v63  ;;  %v1119_v2 = vsub.f32 %v1112_v42, %v1118_v1 }
 0x2d2   : > { %v1841_v4 = vpop.eup %1840 }
 0x2d3   : > { %v1120_v5 = vmul.f32 1.442695, %v1119_v2  ;;  %1752 = vmatmul.mubr.msk.f32.vlgmr.msra.gmra.mxu0 %vm204_vm1, %v1841_v4  ;;  %v531_v6 = vsel %vm204_vm1, %v1841_v4, 0.0 }
 0x2d4   : > { %v1285_v7 = vpop.xlane.xlu1 %1284  ;;  %532 = vadd.xlane.f32.xlu1 %v531_v6  ;;  %1760 = vmatpush3.msk.msra.mxu0 %vm290_vm2, %v622_v3  ;;  %v1290_v23 = vpop.permute.xlu0 %1289 }
 0x2d5   : > { %1848 = vpow2.f32 %v1120_v5  ;;  %v1286_v8 = vsub.f32 %v1279_v45, %v1285_v7  ;;  %1761 = vmatprep.mubr.msk.f32.mxu0 %vm1879_vm0, %v1878_v0  ;;  %1769 = vmatprep.subr.mxu0 %v1878_v0 }
 0x2d6   : > { %v1843_v9 = vpop.eup %1842 }
 0x2d7   : > { %v1287_v11 = vmul.f32 1.442695, %v1286_v8  ;;  %1762 = vmatmul.mubr.msk.f32.vlgmr.msra.gmra.mxu0 %vm204_vm1, %v1843_v9  ;;  %v698_v12 = vsel %vm204_vm1, %v1843_v9, 0.0 }
 0x2d8   : > { %v1452_v13 = vpop.xlane.xlu1 %1451  ;;  %699 = vadd.xlane.f32.xlu0 %v698_v12  ;;  %1771 = vmatprep.mubr.msk.f32.mxu0 %vm1879_vm0, %v1878_v0  ;;  %v1457_v27 = vpop.permute.xlu0 %1456 }
 0x2d9   : > { %1850 = vpow2.f32 %v1287_v11  ;;  %v1453_v14 = vsub.f32 %v1446_v48, %v1452_v13 }
 0x2da   : > { %v1845_v15 = vpop.eup %1844 }
 0x2db   : > { %v1454_v16 = vmul.f32 1.442695, %v1453_v14  ;;  %v865_v17 = vsel %vm204_vm1, %v1845_v15, 0.0 }
 0x2dc   : > { %v789_v18 = vpop.permute.xlu1 %788  ;;  %866 = vadd.xlane.f32.xlu0 %v865_v17 }
 0x2dd   : > { %1852 = vpow2.f32 %v1454_v16  ;;  %1770 = vmatpush3.msk.msra.mxu0 %vm290_vm2, %v789_v18 }
 0x2de   : > { %v1847_v20 = vpop.eup %1846  ;;  %1772 = vmatmul.mubr.msk.f32.vlgmr.msra.gmra.mxu0 %vm204_vm1, %v1845_v15  ;;  %1779 = vmatprep.subr.mxu0 %v1878_v0 }
 0x2df   : > { %v1032_v21 = vsel %vm204_vm1, %v1847_v20, 0.0  ;;  %1780 = vmatpush3.msk.msra.mxu0 %vm290_vm2, %v956_v10  ;;  %1781 = vmatprep.mubr.msk.f32.mxu0 %vm1879_vm0, %v1878_v0 }
 0x2e0   : > { %1033 = vadd.xlane.f32.xlu1 %v1032_v21  ;;  %1789 = vmatprep.subr.mxu0 %v1878_v0 }
 0x2e2   : > { %v1849_v22 = vpop.eup %1848  ;;  %1782 = vmatmul.mubr.msk.f32.vlgmr.msra.gmra.mxu0 %vm204_vm1, %v1847_v20 }
 0x2e3   : > { %v1199_v24 = vsel %vm204_vm1, %v1849_v22, 0.0  ;;  %1790 = vmatpush3.msk.msra.mxu0 %vm290_vm2, %v1123_v19  ;;  %1791 = vmatprep.mubr.msk.f32.mxu0 %vm1879_vm0, %v1878_v0 }
 0x2e4   : > { %1200 = vadd.xlane.f32.xlu0 %v1199_v24  ;;  %1799 = vmatprep.subr.mxu0 %v1878_v0 }
 0x2e6   : > { %v1851_v25 = vpop.eup %1850  ;;  %1792 = vmatmul.mubr.msk.f32.vlgmr.msra.gmra.mxu0 %vm204_vm1, %v1849_v22 }
 0x2e7   : > { %v1366_v26 = vsel %vm204_vm1, %v1851_v25, 0.0  ;;  %1800 = vmatpush3.msk.msra.mxu0 %vm290_vm2, %v1290_v23  ;;  %1801 = vmatprep.mubr.msk.f32.mxu0 %vm1879_vm0, %v1878_v0 }
 0x2e8   : > { %1367 = vadd.xlane.f32.xlu1 %v1366_v26  ;;  %1809 = vmatprep.subr.mxu0 %v1878_v0 }
 0x2ea   : > { %v1853_v29 = vpop.eup %1852  ;;  %1802 = vmatmul.mubr.msk.f32.vlgmr.msra.gmra.mxu0 %vm204_vm1, %v1851_v25 }
 0x2eb   : > { %v1533_v30 = vsel %vm204_vm1, %v1853_v29, 0.0  ;;  %1810 = vmatpush3.msk.msra.mxu0 %vm290_vm2, %v1457_v27  ;;  %1811 = vmatprep.mubr.msk.f32.mxu0 %vm1879_vm0, %v1878_v0 }
 0x2ec   : > { %1534 = vadd.xlane.f32.xlu0 %v1533_v30 }
 0x2ee   : > { %1812 = vmatmul.mubr.msk.f32.vlgmr.msra.gmra.mxu0 %vm204_vm1, %v1853_v29 }
 0x35d   : > { %v533_v31 = vpop.xlane.xlu1 %532 }
 0x35e   : > { %1854 = vrcp.f32 %v533_v31 }
 0x361   : > { %v700_v32 = vpop.xlane.xlu0 %699 }
 0x362   : > { %1856 = vrcp.f32 %v700_v32 }
 0x365   : > { %v867_v33 = vpop.xlane.xlu0 %866 }
 0x366   : > { %1858 = vrcp.f32 %v867_v33 }
 0x369   : > { %v1034_v34 = vpop.xlane.xlu1 %1033 }
 0x36a   : > { %1860 = vrcp.f32 %v1034_v34 }
 0x36b   : > { %v1855_v35 = vpop.eup %1854 }
 0x36d   : > { %v1201_v39 = vpop.xlane.xlu0 %1200 }
 0x36e   : > { %1862 = vrcp.f32 %v1201_v39 }
 0x36f   : > { %v1857_v40 = vpop.eup %1856 }
 0x371   : > { %v1368_v43 = vpop.xlane.xlu1 %1367 }
 0x372   : > { %1864 = vrcp.f32 %v1368_v43 }
 0x373   : > { %v1859_v44 = vpop.eup %1858 }
 0x375   : > { %v1535_v45 = vpop.xlane.xlu0 %1534 }
 0x376   : > { %1866 = vrcp.f32 %v1535_v45 }
 0x377   : > { %v1861_v49 = vpop.eup %1860  ;;  %1868 = vrcp.f32 %v2033_v51 }
 0x37b   : > { %v1863_v54 = vpop.eup %1862 }
 0x37f   : > { %v1865_v58 = vpop.eup %1864 }
 0x383   : > { %v1867_v62 = vpop.eup %1866 }
 0x384   : > { %v1869_v5 = vpop.eup %1868 }
 0x385   : > { %v369_v7 = vmul.f32 %v1869_v5, %v2012_v28 }
 0x393   : > { %v527_v36 = vpop.f32.mrf.mxu0 }
 0x394   : > { %v536_v37 = vmul.f32 %v1855_v35, %v527_v36 }
 0x395   : > { %v1753_v38 = vpop.f32.mrf.mxu0 }
 0x396   : > { %1540 = vrot.lane.b32.xlu1 %v536_v37, %s1887_s5 }
 0x397   : > { %v694_v0 = vpop.f32.mrf.mxu0 }
 0x398   : > { %v703_v41 = vmul.f32 %v1857_v40, %v694_v0 }
 0x399   : > { %v1763_v42 = vpop.f32.mrf.mxu0 }
 0x39a   : > { %1544 = vrot.lane.b32.xlu0 %v703_v41, %s1888_s6 }
 0x39e   : > { %v861_v46 = vpop.f32.mrf.mxu0 }
 0x39f   : > { %v870_v47 = vmul.f32 %v1859_v44, %v861_v46 }
 0x3a0   : > { %v1773_v48 = vpop.f32.mrf.mxu0 }
 0x3a1   : > { %1548 = vrot.lane.b32.xlu1 %v870_v47, %s1889_s7 }
 0x3a2   : > { %v1028_v50 = vpop.f32.mrf.mxu0 }
 0x3a3   : > { %v1037_v52 = vmul.f32 %v1861_v49, %v1028_v50 }
 0x3a4   : > { %v1783_v53 = vpop.f32.mrf.mxu0 }
 0x3a5   : > { %1552 = vrot.lane.b32.xlu1 %v1037_v52, %s1890_s8 }
 0x3a6   : > { %v1195_v55 = vpop.f32.mrf.mxu0 }
 0x3a7   : > { %v1204_v56 = vmul.f32 %v1863_v54, %v1195_v55 }
 0x3a8   : > { %v1793_v57 = vpop.f32.mrf.mxu0 }
 0x3a9   : > { %1556 = vrot.lane.b32.xlu0 %v1204_v56, %s1891_s9 }
 0x3aa   : > { %v1362_v59 = vpop.f32.mrf.mxu0 }
 0x3ab   : > { %v1371_v60 = vmul.f32 %v1865_v58, %v1362_v59 }
 0x3ac   : > { %v1803_v61 = vpop.f32.mrf.mxu0 }
 0x3ad   : > { %1560 = vrot.lane.b32.xlu1 %v1371_v60, %s1892_s10 }
 0x3ae   : > { %v1529_v63 = vpop.f32.mrf.mxu0 }
 0x3af   : > { %v1538_v1 = vmul.f32 %v1867_v62, %v1529_v63 }
 0x3b0   : > { %v1813_v2 = vpop.f32.mrf.mxu0 }
 0x3b1   : > { %1564 = vrot.lane.b32.xlu0 %v1538_v1, %s1893_s11 }
 0x408   : > { %v1541_v3 = vpop.permute.xlu1 %1540 }
 0x409   : > { %v1567_v9 = vsel %vm204_vm1, %v369_v7, %v1541_v3 }
 0x40c   : > { %v1545_v6 = vpop.permute.xlu0 %1544 }
 0x40d   : > { %v1569_v10 = vsel %vm1568_vm3, %v1567_v9, %v1545_v6 }
 0x413   : > { %v1549_v4 = vpop.permute.xlu1 %1548 }
 0x414   : > { %v1571_v12 = vsel %vm1570_vm4, %v1569_v10, %v1549_v4 }
 0x417   : > { %v1553_v8 = vpop.permute.xlu1 %1552 }
 0x418   : > { %v1573_v51 = vsel %vm1572_vm5, %v1571_v12, %v1553_v8 }
 0x41b   : > { %v1557_v11 = vpop.permute.xlu0 %1556 }
 0x41c   : > { %v1575_v14 = vsel %vm1574_vm6, %v1573_v51, %v1557_v11 }
 0x41f   : > { %v1561_v13 = vpop.permute.xlu1 %1560 }
 0x420   : > { %v1577_v28 = vsel %vm1576_vm7, %v1575_v14, %v1561_v13 }
 0x423   : > { %v1565_v15 = vpop.permute.xlu0 %1564 }
 0x424   : > { %v1579_v16 = vsel %vm1578_vm8, %v1577_v28, %v1565_v15 }
 0x425   : > { %1581 = vst.msk [vmem:[%s199_s17] sm:$0xff] %vm1580_vm9, %v1579_v16 }
 0x426 PF: > { %s13_s12 = sadd.s32 1, %s1876_s12  }
 0x427   : > { %p10_p4 = scmp.ge.s32.totalorder %s13_s12, 4  }
 0x429   :  { %12 = sbr.rel (!%p10_p4) target bundleno = 1 (0x1), region = 68 }

// kernel: luna_transformer_block.17
= control target key start
LH: loop header
LB: loop body
LE: loop exit
PB: predicated region body
PF: predicated region fallthrough
CT: control target
= control target key end

     0   :  { %vm40_vm0 = vcmask 261120   ;;  %s493_s0 = inlined_call_operand.vmem [shape: f32[16,32], index: 0, kind: input, shape index: {}]   ;;  %s494_s1 = inlined_call_operand.vmem [shape: f32[32,64], index: 1, kind: input, shape index: {}]   ;;  %s495_s2 = inlined_call_operand.vmem [shape: f32[1,64], index: 2, kind: input, shape index: {}]   ;;  %s496_s3 = inlined_call_operand.vmem [shape: f32[64,32], index: 3, kind: input, shape index: {}]   ;;  %s497_s4 = inlined_call_operand.vmem [shape: f32[1,32], index: 4, kind: input, shape index: {}]   ;;  %s498_s5 = inlined_call_operand.vmem [shape: f32[1,32], index: 5, kind: input, shape index: {}]   ;;  %s499_s6 = inlined_call_operand.vmem [shape: f32[1,32], index: 6, kind: input, shape index: {}]   ;;  %s500_s7 = inlined_call_operand.hbm [shape: f32[16,32], index: 7, kind: output, shape index: {}]  }
   0x1   :  { %v32_v0 = vld [vmem:[%s494_s1 + $0x18] sm:$0xff]  ;;  %v31_v1 = vld [vmem:[%s494_s1 + $0x10] sm:$0xff]  ;;  %v433_v2 = vld [vmem:[%s493_s0] sm:$0xff] }
   0x2   :  { %318 = vmatprep.subr.mxu0 %v32_v0  ;;  %v30_v3 = vld [vmem:[%s494_s1 + $0x8] sm:$0xff]  ;;  %326 = vmatprep.mubr.msk.f32.mxu0 %vm40_vm0, %v433_v2 }
   0x3   :  { %319 = vmatpush3.msra.mxu0 %v32_v0 }
   0x4   :  { %12 = vsyncpa [#allocation3], 0  ;;  %320 = vmatprep.subr.mxu0 %v31_v1  ;;  %v29_v4 = vld [vmem:[%s494_s1] sm:$0xff]  ;;  %v28_v5 = vld [vmem:[%s493_s0 + $0x8] sm:$0xff]  ;;  %vm147_vm1 = vcmask 523264   ;;  %s381_s9 = smov [#allocation2]  }
   0x5   :  { %321 = vmatpush3.msra.mxu0 %v31_v1  ;;  %v139_v6 = vld [vmem:[%s496_s3 + $0x38] sm:$0xff]  ;;  %v138_v7 = vld [vmem:[%s496_s3 + $0x30] sm:$0xff]  ;;  %v137_v8 = vld [vmem:[%s496_s3 + $0x28] sm:$0xff]  ;;  %s283_s10 = sshll.u32 %s381_s9, 4  ;;  %s284_s10 = int_to_ptr.vmem [resolvable:$true] %s283_s10 }
   0x6   :  { %322 = vmatprep.subr.mxu0 %v30_v3  ;;  %329 = vmatprep.subr.mxu1 %v139_v6  ;;  %v136_v9 = vld [vmem:[%s496_s3 + $0x20] sm:$0xff]  ;;  %v135_v10 = vld [vmem:[%s496_s3 + $0x18] sm:$0xff]  ;;  %v134_v11 = vld [vmem:[%s496_s3 + $0x10] sm:$0xff]  ;;  %s359_s11 = scalar_lea.vmem %s284_s10, 256  ;;  %p364_p1 = scmp.lt.s32.totalorder %s284_s10, %s284_s10 }
   0x7   :  { %323 = vmatpush3.msra.mxu0 %v30_v3  ;;  %330 = vmatpush3.msra.mxu1 %v139_v6  ;;  %v133_v12 = vld [vmem:[%s496_s3 + $0x8] sm:$0xff]  ;;  %v132_v13 = vld [vmem:[%s496_s3] sm:$0xff]  ;;  %p360_p0 = scmp.ne.s32.totalorder %s284_s10, %s359_s11  ;;  %p365_p2 = scmp.lt.s32.totalorder %s359_s11, %s359_s11 }
   0x8   :  { %324 = vmatprep.subr.mxu0 %v29_v4  ;;  %331 = vmatprep.subr.mxu1 %v138_v7  ;;  %v294_v14 = vld [vmem:[%s495_s2] ss:$0 sm:$0xff] }
   0x9   :  { %325 = vmatpush3.msra.mxu0 %v29_v4  ;;  %332 = vmatpush3.msra.mxu1 %v138_v7  ;;  %v297_v30 = vld [vmem:[%s497_s4] ss:$0 sm:$0xff]  ;;  %p366_p3 = por %p365_p2, %p364_p1 }
   0xa   :  { %327 = vmatmul.mubr.msk.f32.vlgmr.msra.gmra.mxu0 %vm40_vm0, %v28_v5  ;;  %333 = vmatprep.subr.mxu1 %v137_v8  ;;  %v300_v55 = vld [vmem:[%s498_s5] ss:$0 sm:$0xff] }
   0xb   :  { %334 = vmatpush3.msra.mxu1 %v137_v8  ;;  %v301_v57 = vld [vmem:[%s499_s6] ss:$0 sm:$0xff]  ;;  %p367_p4 = pnand %p366_p3, %p360_p0 }
   0xc   :  { %335 = vmatprep.subr.mxu1 %v136_v9 }
   0xd   :  { %336 = vmatpush3.msra.mxu1 %v136_v9 }
   0xe   :  { %337 = vmatprep.subr.mxu1 %v135_v10 }
   0xf   :  { %338 = vmatpush3.msra.mxu1 %v135_v10 }
  0x10   :  { %339 = vmatprep.subr.mxu1 %v134_v11 }
  0x11   :  { %340 = vmatpush3.msra.mxu1 %v134_v11 }
  0x12   :  { %341 = vmatprep.subr.mxu1 %v133_v12 }
  0x13   :  { %342 = vmatpush3.msra.mxu1 %v133_v12 }
  0x14   :  { %343 = vmatprep.subr.mxu1 %v132_v13 }
  0x15   :  { %344 = vmatpush3.msra.mxu1 %v132_v13 }
  0xca   :  { %v328_v15 = vpop.f32.mrf.mxu0 }
  0xcb   :  { %v119_v16 = vadd.f32 %v328_v15, %v294_v14 }
  0xcc   :  { %v113_v17 = vpop.f32.mrf.mxu0 }
  0xcd   :  { %v125_v18 = vmul.f32 0.70710677, %v119_v16  ;;  %v114_v19 = vadd.f32 %v294_v14, %v113_v17  ;;  %v123_v26 = vmul.f32 0.5, %v119_v16 }
  0xcf   :  { %351 = verf.f32 %v125_v18  ;;  %v124_v20 = vmul.f32 0.70710677, %v114_v19  ;;  %v122_v24 = vmul.f32 0.5, %v114_v19 }
  0xd1   :  { %353 = verf.f32 %v124_v20 }
  0xdc   :  { %v352_v21 = vpop.eup %351 }
  0xdd   :  { %v129_v23 = vadd.f32 1.0, %v352_v21 }
  0xde   :  { %v354_v22 = vpop.eup %353 }
  0xdf   :  { %v128_v25 = vadd.f32 1.0, %v354_v22  ;;  %v131_v28 = vmul.f32 %v129_v23, %v123_v26 }
  0xe1   :  { %v130_v27 = vmul.f32 %v128_v25, %v122_v24 }
  0xe3   :  { %345 = vmatprep.mubr.msk.f32.mxu1 %vm147_vm1, %v130_v27 }
  0xe4   :  { %346 = vmatmul.mubr.msk.f32.vlgmr.msra.gmra.mxu1 %vm147_vm1, %v131_v28 }
 0x1a4   :  { %v347_v29 = vpop.f32.mrf.mxu1 }
 0x1a5   :  { %v226_v32 = vadd.f32 %v347_v29, %v297_v30 }
 0x1a6   :  { %v220_v31 = vpop.f32.mrf.mxu1 }
 0x1a7   :  { %v221_v33 = vadd.f32 %v297_v30, %v220_v31  ;;  %v230_v36 = vadd.f32 %v226_v32, %v28_v5 }
 0x1a9   :  { %v229_v34 = vadd.f32 %v221_v33, %v433_v2  ;;  %v234_v37 = vsel %vm40_vm0, %v230_v36, 0.0 }
 0x1ab   :  { %v231_v35 = vsel %vm40_vm0, %v229_v34, 0.0 }
 0x1ac   :  { %232 = vadd.xlane.f32.xlu0 %v231_v35 }
 0x1b0   :  { %235 = vadd.xlane.f32.xlu0 %v234_v37 }
 0x235   :  { %v233_v38 = vpop.xlane.xlu0 %232 }
 0x236   :  { %v238_v39 = vmul.f32 0.03125, %v233_v38 }
 0x238   :  { %v240_v40 = vsub.f32 %v229_v34, %v238_v39 }
 0x239   :  { %v236_v41 = vpop.xlane.xlu0 %235 }
 0x23a   :  { %v239_v42 = vmul.f32 0.03125, %v236_v41  ;;  %v242_v43 = vmul.f32 %v240_v40, %v240_v40 }
 0x23c   :  { %v241_v44 = vsub.f32 %v230_v36, %v239_v42  ;;  %v244_v45 = vsel %vm40_vm0, %v242_v43, 0.0 }
 0x23d   :  { %245 = vadd.xlane.f32.xlu1 %v244_v45 }
 0x23e   :  { %v243_v46 = vmul.f32 %v241_v44, %v241_v44 }
 0x240   :  { %v247_v47 = vsel %vm40_vm0, %v243_v46, 0.0 }
 0x241   :  { %248 = vadd.xlane.f32.xlu1 %v247_v47 }
 0x2c6   :  { %v246_v48 = vpop.xlane.xlu1 %245 }
 0x2c7   :  { %v250_v49 = vmul.f32 0.03125, %v246_v48 }
 0x2c9   :  { %v252_v50 = vadd.f32 1e-05, %v250_v49 }
 0x2ca   :  { %v249_v51 = vpop.xlane.xlu1 %248 }
 0x2cb   :  { %355 = vrsqrt.f32 %v252_v50  ;;  %v251_v52 = vmul.f32 0.03125, %v249_v51 }
 0x2cd   :  { %v253_v53 = vadd.f32 1e-05, %v251_v52 }
 0x2cf   :  { %357 = vrsqrt.f32 %v253_v53 }
 0x2d8   :  { %v356_v54 = vpop.eup %355 }
 0x2d9   :  { %v256_v56 = vmul.f32 %v356_v54, %v240_v40 }
 0x2db   :  { %v265_v58 = vmul.f32 %v300_v55, %v256_v56 }
 0x2dc   :  { %v358_v59 = vpop.eup %357 }
 0x2dd   :  { %v257_v60 = vmul.f32 %v358_v59, %v241_v44  ;;  %v274_v61 = vadd.f32 %v301_v57, %v265_v58 }
 0x2df   :  { %v266_v62 = vmul.f32 %v300_v55, %v257_v60  ;;  %276 = vst.msk [vmem:[#allocation2] sm:$0xff] %vm40_vm0, %v274_v61 }
 0x2e1   :  { %v275_v63 = vadd.f32 %v301_v57, %v266_v62 }
 0x2e3   :  { %277 = vst.msk [vmem:[#allocation2 + $0x8] sm:$0xff] %vm40_vm0, %v275_v63 }
 0x2e4   :  { %370 = shalt.err (!%p367_p4)
}
 0x2e5   :  { %s382_s5 = smov 128   ;;  %s383_s6 = smov 8  }
 0x2e6   :  { %289 = dma.vmem_to_hbm [thread:$0]  %s284_s10, 256, %s500_s7, [#allocation3], %s382_s5, %s382_s5, %s383_s6  }
 0x2e7   :  { %379 = dma.done.wait [#allocation3], 256  }
 0x2e8   :  { %380 = vsyncadd [#allocation3], 4294967040 }
 0x2e9   :  { %293 = vsyncpa [#allocation3], 1 }

</bundles_post_ra>
